<compile_context>
chip_gen: v5e
topology: v5e:2x2
jax: 0.10.0
libtpu: 0.0.40
codegen_flags: <defaults>
</compile_context>

<pallas_src>
import functools
from math import ceil

import jax
import jax.numpy as jnp
from jax import lax
from jax.experimental import pallas as pl
from jax.experimental.pallas import tpu as pltpu

F32 = jnp.float32
BF16 = jnp.bfloat16
MXU_DTYPE = jnp.bfloat16


def _vmem_limit_bytes():
    """Generation-aware scoped-VMEM budget (v5e/v6e: 128 MiB phys, v7x: 64 MiB)."""
    cap = None
    try:
        get_info = getattr(pltpu, "get_tpu_info", None)
        if get_info is not None:
            cap = getattr(get_info(), "vmem_capacity_bytes", None)
    except Exception:
        cap = None
    if not cap:
        return 32 * 1024 * 1024
    return max(32 * 1024 * 1024, min(int(cap * 0.7), 96 * 1024 * 1024))


_VMEM_LIMIT = _vmem_limit_bytes()


def _cparams(*sem):
    return pltpu.CompilerParams(dimension_semantics=sem,
                                vmem_limit_bytes=_VMEM_LIMIT)


def _pick_tile(dim, pref, quantum):
    """Largest tile <= pref that divides dim and is a multiple of `quantum`;
    falls back to the full dim (always legal: block dims == array dims)."""
    if dim <= pref:
        return dim
    t = (pref // quantum) * quantum
    while t >= quantum:
        if dim % t == 0:
            return t
        t -= quantum
    return dim


# -----------------------------------------------------------------------------
# Tiled bf16 matmul (projections, down_proj, lm_head)
# -----------------------------------------------------------------------------
def _matmul_kernel(x_ref, w_ref, o_ref, acc_ref):
    @pl.when(pl.program_id(2) == 0)
    def _():
        acc_ref[...] = jnp.zeros_like(acc_ref)

    acc_ref[...] += jnp.dot(x_ref[...], w_ref[...],
                            preferred_element_type=jnp.float32)

    @pl.when(pl.program_id(2) == pl.num_programs(2) - 1)
    def _():
        o_ref[...] = acc_ref[...].astype(o_ref.dtype)


def matmul(x, w, out_dtype=F32):
    """x: (M, K), w: (K, N) (already (in,out)-layout, bf16)."""
    M, K = x.shape
    _, N = w.shape
    tm = _pick_tile(M, 512, 8)
    tn = _pick_tile(N, 512, 128)
    tk = _pick_tile(K, 1024, 128)
    flops = 2 * M * N * K
    bytes_acc = int(M * K * x.dtype.itemsize + K * N * w.dtype.itemsize
                    + M * N * jnp.dtype(out_dtype).itemsize)
    return pl.pallas_call(
        _matmul_kernel,
        grid=(M // tm, N // tn, K // tk),
        out_shape=jax.ShapeDtypeStruct((M, N), out_dtype),
        in_specs=[pl.BlockSpec((tm, tk), lambda i, j, k: (i, k)),
                  pl.BlockSpec((tk, tn), lambda i, j, k: (k, j))],
        out_specs=pl.BlockSpec((tm, tn), lambda i, j, k: (i, j)),
        scratch_shapes=[pltpu.VMEM((tm, tn), jnp.float32)],
        compiler_params=_cparams("parallel", "parallel", "arbitrary"),
        cost_estimate=pl.CostEstimate(flops=flops, transcendentals=0,
                                      bytes_accessed=bytes_acc),
    )(x, w)


def linear(x, w_io, out_dtype=F32):
    """nn.Linear (no bias) with pre-transposed (in, out) bf16 weight."""
    shp = x.shape
    y = matmul(x.reshape(-1, shp[-1]).astype(MXU_DTYPE), w_io, out_dtype)
    return y.reshape(shp[:-1] + (w_io.shape[1],))


# -----------------------------------------------------------------------------
# SwiGLU fused matmul: out = silu(x@W1) * (x@W2), two resident f32 accumulators
# -----------------------------------------------------------------------------
def _swiglu_matmul_kernel(x_ref, w1_ref, w2_ref, o_ref, acc1, acc2):
    @pl.when(pl.program_id(2) == 0)
    def _():
        acc1[...] = jnp.zeros_like(acc1)
        acc2[...] = jnp.zeros_like(acc2)

    x = x_ref[...]
    acc1[...] += jnp.dot(x, w1_ref[...], preferred_element_type=jnp.float32)
    acc2[...] += jnp.dot(x, w2_ref[...], preferred_element_type=jnp.float32)

    @pl.when(pl.program_id(2) == pl.num_programs(2) - 1)
    def _():
        a = acc1[...]
        o_ref[...] = (a * jax.nn.sigmoid(a) * acc2[...]).astype(o_ref.dtype)


def swiglu_matmul(x2d, w1, w2, out_dtype=MXU_DTYPE):
    M, K = x2d.shape
    N = w1.shape[1]
    tm = _pick_tile(M, 512, 8)
    tn = _pick_tile(N, 512, 128)
    tk = _pick_tile(K, 1024, 128)
    return pl.pallas_call(
        _swiglu_matmul_kernel,
        grid=(M // tm, N // tn, K // tk),
        out_shape=jax.ShapeDtypeStruct((M, N), out_dtype),
        in_specs=[pl.BlockSpec((tm, tk), lambda i, j, k: (i, k)),
                  pl.BlockSpec((tk, tn), lambda i, j, k: (k, j)),
                  pl.BlockSpec((tk, tn), lambda i, j, k: (k, j))],
        out_specs=pl.BlockSpec((tm, tn), lambda i, j, k: (i, j)),
        scratch_shapes=[pltpu.VMEM((tm, tn), jnp.float32),
                        pltpu.VMEM((tm, tn), jnp.float32)],
        compiler_params=_cparams("parallel", "parallel", "arbitrary"),
    )(x2d, w1, w2)


# -----------------------------------------------------------------------------
# Row-tiled RMSNorm (hidden-size norms; head-dim o_norm is fused into delta)
# -----------------------------------------------------------------------------
def _rmsnorm_kernel(x_ref, w_ref, o_ref, *, eps):
    x = x_ref[...]
    ms = jnp.mean(x * x, axis=-1, keepdims=True)
    o_ref[...] = x * lax.rsqrt(ms + eps) * w_ref[...]


def rmsnorm(x, w, eps):
    shp = x.shape
    N = shp[-1]
    x2d = x.reshape(-1, N)
    M = x2d.shape[0]
    tm = _pick_tile(M, 256, 8)
    y = pl.pallas_call(
        functools.partial(_rmsnorm_kernel, eps=eps),
        grid=(M // tm,),
        out_shape=jax.ShapeDtypeStruct((M, N), F32),
        in_specs=[pl.BlockSpec((tm, N), lambda i: (i, 0)),
                  pl.BlockSpec((1, N), lambda i: (0, 0))],
        out_specs=pl.BlockSpec((tm, N), lambda i: (i, 0)),
        compiler_params=_cparams("parallel"),
    )(x2d, w.reshape(1, N))
    return y.reshape(shp)


# -----------------------------------------------------------------------------
# Causal depthwise Conv1d + SiLU, tiled over (B, channel, L) with an L-carry
# -----------------------------------------------------------------------------
def _conv_silu_kernel(x_ref, w_ref, o_ref, win_ref, *, K, TL, TC):
    l = pl.program_id(2)

    @pl.when(l == 0)
    def _():
        win_ref[0:K - 1, :] = jnp.zeros((K - 1, TC), F32)

    @pl.when(l > 0)
    def _():
        win_ref[0:K - 1, :] = win_ref[TL:TL + K - 1, :]

    win_ref[K - 1:K - 1 + TL, :] = x_ref[...].astype(F32)

    w = w_ref[...]                                    # (K, TC) f32
    acc = jnp.zeros((TL, TC), F32)
    for k in range(K):                                # K is tiny (4): unroll
        acc = acc + win_ref[k:k + TL, :] * w[k:k + 1, :]
    y = acc * jax.nn.sigmoid(acc)                     # SiLU in f32
    o_ref[...] = y.astype(o_ref.dtype)


def conv1d_silu(x, w_kc):
    """x: (B, L, C) bf16; w_kc: (K, C) f32 (pre-transposed from torch (C,1,K))."""
    B, L, Cch = x.shape
    K = w_kc.shape[0]
    TL = _pick_tile(L, 256, 8)
    TC = _pick_tile(Cch, 512, 128)
    return pl.pallas_call(
        functools.partial(_conv_silu_kernel, K=K, TL=TL, TC=TC),
        grid=(B, Cch // TC, L // TL),
        out_shape=jax.ShapeDtypeStruct((B, L, Cch), x.dtype),
        in_specs=[pl.BlockSpec((None, TL, TC), lambda b, c, l: (b, l, c)),
                  pl.BlockSpec((K, TC), lambda b, c, l: (0, c))],
        out_specs=pl.BlockSpec((None, TL, TC), lambda b, c, l: (b, l, c)),
        scratch_shapes=[pltpu.VMEM((TL + K - 1, TC), F32)],
        compiler_params=_cparams("parallel", "parallel", "arbitrary"),
    )(x, w_kc)


# -----------------------------------------------------------------------------
# Chunked delta rule: grid (batch, chunk), fused qkv input, in-kernel sigmoid
# for beta, fused kq-norm + o_norm, closed-form forward substitution,
# resident S accumulator output + diag(S) VMEM scratch.
# -----------------------------------------------------------------------------
def _chunk_delta_kernel(qkv_ref, braw_ref, seg_ref, segT_ref, won_ref,
                        o_ref, s_ref, diag_ref, *, H, D, C, HD, L, eps):
    b = pl.program_id(0)
    n = pl.program_id(1)

    @pl.when(n == 0)
    def _():
        s_ref[...] = jnp.zeros_like(s_ref)
        diag_ref[...] = jnp.zeros_like(diag_ref)

    seg = seg_ref[...]                                 # (HD, H) 0/1
    segT = segT_ref[...]                               # (H, HD) 0/1

    qkv = qkv_ref[...].astype(F32)                     # (C, 3*HD)
    q = qkv[:, 0:HD]
    k = qkv[:, HD:2 * HD]
    v = qkv[:, 2 * HD:3 * HD]

    cpos = lax.broadcasted_iota(jnp.int32, (C, 1), 0)
    valid = (n * C + cpos) < L                         # mask chunk-padding rows

    def l2norm(x):                                     # per-head x / ||x||, no eps
        ss = jnp.dot(x * x, seg, preferred_element_type=F32)          # (C, H)
        return x * jnp.dot(lax.rsqrt(ss), segT, preferred_element_type=F32)

    q = jnp.where(valid, l2norm(q), 0.0)
    k = jnp.where(valid, l2norm(k), 0.0)

    # sigmoid fused here; expand per-head beta over D via segT
    beta = jnp.dot(jax.nn.sigmoid(braw_ref[...].astype(F32)), segT,
                   preferred_element_type=F32)         # (C, HD)
    kb = k * beta
    vb = v * beta

    # T init: I - tril(-1, Kb @ K^T).  The reference's sequential row-update
    # loop has the closed form T = I + 3*(N + N^2 + ... + N^(C-1)) with
    # N = -tril(-1, Kb K^T) (nilpotent) -> log-squaring geometric sum on MXU.
    prod = lax.dot_general(kb, k, (((1,), (1,)), ((), ())),
                           preferred_element_type=F32)                 # (C, C)
    ri = lax.broadcasted_iota(jnp.int32, (C, C), 0)
    ci = lax.broadcasted_iota(jnp.int32, (C, C), 1)
    eye = (ri == ci).astype(F32)
    nmat = jnp.where(ri > ci, -prod, 0.0)

    a_geo = eye + nmat                                 # sum_{k=0}^{1} N^k
    p_pow = nmat
    steps = (C - 1).bit_length()                       # ceil(log2(C))
    for _ in range(max(0, steps - 1)):
        p_pow = jnp.dot(p_pow, p_pow, preferred_element_type=F32)
        a_geo = a_geo + jnp.dot(a_geo, p_pow, preferred_element_type=F32)
    t_mat = 3.0 * a_geo - 2.0 * eye                    # == I + 3*sum_{k>=1} N^k

    diag = diag_ref[...]                               # (1, HD) = diag(S) per head
    w = jnp.dot(t_mat, kb, preferred_element_type=F32)                 # (C, HD)
    u = jnp.dot(t_mat, vb, preferred_element_type=F32) - w * diag

    a = jnp.sum(q * k, axis=1, keepdims=True)          # (C, 1): sum over H AND D
    a = jnp.where(cpos <= b, a, 0.0)                   # reference .tril() on (B, C)
    o = q * diag + a * u

    # fused o_norm (per-head RMSNorm over D lanes) + weight, lane-dense store
    ms = jnp.dot(o * o, seg, preferred_element_type=F32) * (1.0 / D)
    o = o * jnp.dot(lax.rsqrt(ms + eps), segT, preferred_element_type=F32)
    o_ref[...] = (o * won_ref[...]).astype(o_ref.dtype)

    # state updates after the chunk output (as in the reference)
    diag_ref[...] = diag + jnp.sum(k * u, axis=0, keepdims=True)
    k3 = jnp.transpose(k.reshape(C, H, D), (1, 0, 2))  # (H, C, D)
    u3 = jnp.transpose(u.reshape(C, H, D), (1, 0, 2))
    s_ref[...] = s_ref[...] + jnp.einsum('hcd,hce->hde', k3, u3,
                                         preferred_element_type=F32)


def chunk_delta_rule(qkv, braw, o_norm_w, seg, segT, cfg):
    """qkv: (B, L, 3*H*D) bf16 (post conv+SiLU); braw: (B, L, H) f32 pre-sigmoid."""
    B, L, HD3 = qkv.shape
    HD = HD3 // 3
    H = cfg["num_heads"]
    D = HD // H
    C = cfg["chunk_size"]
    NC = ceil(L / C)
    Lp = NC * C
    pad = Lp - L
    if pad > 0:
        qkv = jnp.pad(qkv, ((0, 0), (0, pad), (0, 0)))
        braw = jnp.pad(braw, ((0, 0), (0, pad), (0, 0)))

    kernel = functools.partial(_chunk_delta_kernel, H=H, D=D, C=C, HD=HD,
                               L=L, eps=cfg["norm_eps"])
    # NOTE(v7x): only the batch axis is parallel (NC is a carried recurrence);
    # keep B >= 2 per chip to use both TensorCores.
    o, s = pl.pallas_call(
        kernel,
        grid=(B, NC),
        out_shape=(jax.ShapeDtypeStruct((B, Lp, HD), BF16),
                   jax.ShapeDtypeStruct((B, H, D, D), F32)),
        in_specs=[pl.BlockSpec((None, C, HD3), lambda b, n: (b, n, 0)),
                  pl.BlockSpec((None, C, H), lambda b, n: (b, n, 0)),
                  pl.BlockSpec((HD, H), lambda b, n: (0, 0)),
                  pl.BlockSpec((H, HD), lambda b, n: (0, 0)),
                  pl.BlockSpec((1, HD), lambda b, n: (0, 0))],
        out_specs=(pl.BlockSpec((None, C, HD), lambda b, n: (b, n, 0)),
                   pl.BlockSpec((None, H, D, D), lambda b, n: (b, 0, 0, 0))),
        scratch_shapes=[pltpu.VMEM((1, HD), F32)],
        compiler_params=_cparams("parallel", "arbitrary"),
    )(qkv, braw, seg, segT, o_norm_w)

    if pad > 0:
        o = o[:, :L]
    return o, s


# -----------------------------------------------------------------------------
# Model glue (plain JAX around the Pallas kernels)
# -----------------------------------------------------------------------------
def deltanet_attn(p, x, seg, segT, cfg):
    qkv = linear(x, p["qkv_proj"], out_dtype=MXU_DTYPE)      # fused q|k|v proj
    qkv = conv1d_silu(qkv, p["qkv_conv"])                    # one conv for all three
    braw = linear(x, p["b_proj"], out_dtype=F32)             # sigmoid fused in delta
    o, state = chunk_delta_rule(qkv, braw, p["o_norm"], seg, segT, cfg)
    o = linear(o, p["o_proj"], out_dtype=F32)
    return o, state


def block_forward(p, hidden, seg, segT, cfg):
    eps = cfg["norm_eps"]
    x = rmsnorm(hidden, p["attn_norm"], eps)
    attn_out, state = deltanet_attn(p["attn"], x, seg, segT, cfg)
    hidden = hidden + attn_out

    m = rmsnorm(hidden, p["mlp_norm"], eps)
    B, L, _ = m.shape
    y = linear(m, p["up_proj"], out_dtype=MXU_DTYPE)         # (B, L, inter) bf16
    g = swiglu_matmul(y.reshape(-1, y.shape[-1]),
                      p["swiglu_w1"], p["swiglu_w2"])        # fused silu(a)*b
    down = matmul(g, p["down_proj"], out_dtype=F32)
    hidden = hidden + down.reshape(B, L, -1)
    return hidden, state


def model_forward(params, input_ids, cfg):
    # TODO(synk): embedding gather stays in plain JAX (no dense Pallas hot path).
    hidden = params["embeddings"][input_ids]
    seg, segT = params["seg"], params["segT"]
    memory_states = []
    for lp in params["layers"]:
        hidden, st = block_forward(lp, hidden, seg, segT, cfg)
        memory_states.append(st)
    hidden = rmsnorm(hidden, params["norm"], cfg["norm_eps"])
    logits = linear(hidden, params["lm_head"])               # logits_to_keep=0 -> full seq
    return logits, hidden, memory_states


# -----------------------------------------------------------------------------
# Parameters: torch-layout init + one-time kernel-layout preparation
# -----------------------------------------------------------------------------
def init_params(key, cfg):
    hidden = cfg["hidden_size"]
    H = cfg["num_heads"]
    D = hidden // H
    K = cfg["conv_size"]
    inter = cfg["intermediate_size"]
    vocab = cfg["vocab_size"]
    cnt = [0]

    def w(shape, scale=0.02):
        cnt[0] += 1
        return scale * jax.random.normal(jax.random.fold_in(key, cnt[0]),
                                         shape, dtype=F32)

    params = {
        "embeddings": w((vocab, hidden)),
        "norm": jnp.ones((hidden,), F32),
        "lm_head": w((vocab, hidden)),
        "layers": [],
    }
    for _ in range(cfg["num_layers"]):
        params["layers"].append({
            "attn_norm": jnp.ones((hidden,), F32),
            "mlp_norm": jnp.ones((hidden,), F32),
            "attn": {
                "q_proj": w((hidden, hidden)),
                "k_proj": w((hidden, hidden)),
                "v_proj": w((hidden, hidden)),
                "b_proj": w((H, hidden)),
                "q_conv": w((hidden, 1, K)),
                "k_conv": w((hidden, 1, K)),
                "v_conv": w((hidden, 1, K)),
                "o_norm": jnp.ones((D,), F32),
                "o_proj": w((hidden, hidden)),
            },
            "up_proj": w((inter, hidden)),
            "down_proj": w((hidden, inter)),
            # TODO(synk): SwiGLU class is not defined in the reference file;
            # assuming standard gated form silu(y @ W1.T) * (y @ W2.T).
            "swiglu_w1": w((inter, inter)),
            "swiglu_w2": w((inter, inter)),
        })
    return params


def prepare_params(tp, cfg):
    """One-time conversion of torch-layout f32 params into kernel layout:
    (in,out) bf16 matmul weights, fused q|k|v projection and conv taps,
    per-head-tiled o_norm weight, hoisted head-segment matrices."""
    H = cfg["num_heads"]
    hidden = cfg["hidden_size"]
    D = hidden // H
    HD = hidden

    def t(w):        # torch Linear (out, in) -> (in, out) bf16
        return jnp.transpose(w).astype(MXU_DTYPE)

    def conv(w):     # torch depthwise Conv1d (C, 1, K) -> (K, C) f32
        return jnp.transpose(w[:, 0, :], (1, 0)).astype(F32)

    layers = []
    for lp in tp["layers"]:
        a = lp["attn"]
        layers.append({
            "attn_norm": lp["attn_norm"],
            "mlp_norm": lp["mlp_norm"],
            "attn": {
                "qkv_proj": jnp.concatenate(
                    [t(a["q_proj"]), t(a["k_proj"]), t(a["v_proj"])], axis=1),
                "qkv_conv": jnp.concatenate(
                    [conv(a["q_conv"]), conv(a["k_conv"]), conv(a["v_conv"])],
                    axis=1),
                "b_proj": t(a["b_proj"]),
                "o_norm": jnp.tile(a["o_norm"], H).reshape(1, HD),
                "o_proj": t(a["o_proj"]),
            },
            "up_proj": t(lp["up_proj"]),
            "down_proj": t(lp["down_proj"]),
            "swiglu_w1": t(lp["swiglu_w1"]),
            "swiglu_w2": t(lp["swiglu_w2"]),
        })

    lane = jnp.arange(HD, dtype=jnp.int32)
    head = jnp.arange(H, dtype=jnp.int32)
    seg = (lane[:, None] // D == head[None, :]).astype(F32)   # (HD, H)

    return {
        "embeddings": tp["embeddings"],
        "norm": tp["norm"],
        "lm_head": t(tp["lm_head"]),
        "layers": layers,
        "seg": seg,
        "segT": jnp.transpose(seg),
    }


if __name__ == "__main__":
    hidden_size = 32
    hidden_ratio = 4
    inter = int(hidden_size * hidden_ratio * 2 / 3)
    inter = 256 * ((inter + 256 - 1) // 256)
    cfg = dict(
        hidden_size=hidden_size,
        num_heads=4,
        conv_size=4,
        num_layers=2,
        chunk_size=8,
        norm_eps=1e-6,
        vocab_size=64,
        intermediate_size=inter,
    )

    root = jax.random.PRNGKey(0)
    k_params, k_ids = jax.random.split(root)
    params = prepare_params(init_params(k_params, cfg), cfg)

    B, L = 2, 16
    input_ids = jax.random.randint(k_ids, (B, L), 0, cfg["vocab_size"])

    fwd = jax.jit(functools.partial(model_forward, cfg=cfg))
    logits, hidden_states, memory_states = fwd(params, input_ids)
    jax.block_until_ready((logits, hidden_states, memory_states))

    D = hidden_size // cfg["num_heads"]
    assert logits.shape == (B, L, cfg["vocab_size"])
    assert hidden_states.shape == (B, L, cfg["hidden_size"])
    assert memory_states[0].shape == (B, cfg["num_heads"], D, D)
    print("KERNEL_OK")
</pallas_src>

<mosaic_0001>
module attributes {stable_mosaic.version = 11 : i64} {
  func.func @_rmsnorm_kernel(%arg0: i32, %arg1: memref<32x32xf32, #tpu.memory_space<vmem>>, %arg2: memref<1x32xf32, #tpu.memory_space<vmem>>, %arg3: memref<32x32xf32, #tpu.memory_space<vmem>>) attributes {dimension_semantics = [#tpu.dimension_semantics<parallel>], iteration_bounds = array<i64: 1>, scalar_prefetch = 0 : i64, scratch_operands = 0 : i64, tpu.core_type = #tpu.core_type<tc>, window_params = [{transform_indices = @transform_0, window_bounds = array<i64: 32, 32>}, {pipeline_mode = #tpu.pipeline_mode<synchronous>, transform_indices = @transform_1, window_bounds = array<i64: 1, 32>}, {transform_indices = @transform_2, window_bounds = array<i64: 32, 32>}]} {
    %c0 = arith.constant 0 : index
    %c0_0 = arith.constant 0 : index
    %0 = vector.load %arg1[%c0, %c0_0] : memref<32x32xf32, #tpu.memory_space<vmem>>, vector<32x32xf32>
    %1 = arith.mulf %0, %0 : vector<32x32xf32>
    %cst = arith.constant dense<0.000000e+00> : vector<32xf32>
    %2 = vector.multi_reduction <add>, %1, %cst [1] : vector<32x32xf32> to vector<32xf32>
    %3 = vector.shape_cast %2 : vector<32xf32> to vector<32x1xf32>
    %cst_1 = arith.constant 3.200000e+01 : f32
    %4 = vector.broadcast %cst_1 : f32 to vector<32x1xf32>
    %5 = arith.divf %3, %4 : vector<32x1xf32>
    %cst_2 = arith.constant 9.99999997E-7 : f32
    %6 = vector.broadcast %cst_2 : f32 to vector<32x1xf32>
    %7 = arith.addf %5, %6 : vector<32x1xf32>
    %8 = math.rsqrt %7 : vector<32x1xf32>
    %9 = vector.broadcast %8 : vector<32x1xf32> to vector<32x32xf32>
    %10 = arith.mulf %0, %9 : vector<32x32xf32>
    %c0_3 = arith.constant 0 : index
    %c0_4 = arith.constant 0 : index
    %11 = vector.load %arg2[%c0_3, %c0_4] : memref<1x32xf32, #tpu.memory_space<vmem>>, vector<1x32xf32>
    %12 = vector.broadcast %11 : vector<1x32xf32> to vector<32x32xf32>
    %13 = arith.mulf %10, %12 : vector<32x32xf32>
    %c0_5 = arith.constant 0 : index
    %c0_6 = arith.constant 0 : index
    %14 = vector.load %arg3[%c0_5, %c0_6] : memref<32x32xf32, #tpu.memory_space<vmem>>, vector<32x32xf32>
    tpu.vector_store %arg3[%c0_5, %c0_6], %13 {strides = array<i32>} : memref<32x32xf32, #tpu.memory_space<vmem>>, vector<32x32xf32>,
    return
  }
  func.func @transform_0(%arg0: i32) -> (i32, i32) {
    %c0_i32 = arith.constant 0 : i32
    %c0_i32_0 = arith.constant 0 : i32
    return %arg0, %c0_i32 : i32, i32
  }
  func.func @transform_1(%arg0: i32) -> (i32, i32) {
    %c0_i32 = arith.constant 0 : i32
    %c0_i32_0 = arith.constant 0 : i32
    %c0_i32_1 = arith.constant 0 : i32
    return %c0_i32, %c0_i32_0 : i32, i32
  }
  func.func @transform_2(%arg0: i32) -> (i32, i32) {
    %c0_i32 = arith.constant 0 : i32
    %c0_i32_0 = arith.constant 0 : i32
    return %arg0, %c0_i32 : i32, i32
  }
}

module attributes {stable_mosaic.version = 11 : i64} {
  func.func @_matmul_kernel(%arg0: i32, %arg1: i32, %arg2: i32, %arg3: memref<32x32xbf16, #tpu.memory_space<vmem>>, %arg4: memref<32x96xbf16, #tpu.memory_space<vmem>>, %arg5: memref<32x96xbf16, #tpu.memory_space<vmem>>, %arg6: memref<32x96xf32, #tpu.memory_space<vmem>>) attributes {dimension_semantics = [#tpu.dimension_semantics<parallel>, #tpu.dimension_semantics<parallel>, #tpu.dimension_semantics<arbitrary>], iteration_bounds = array<i64: 1, 1, 1>, scalar_prefetch = 0 : i64, scratch_operands = 1 : i64, tpu.core_type = #tpu.core_type<tc>, window_params = [{transform_indices = @transform_0, window_bounds = array<i64: 32, 32>}, {transform_indices = @transform_1, window_bounds = array<i64: 32, 96>}, {transform_indices = @transform_2, window_bounds = array<i64: 32, 96>}]} {
    %c0_i32 = arith.constant 0 : i32
    %0 = arith.cmpi eq, %arg2, %c0_i32 : i32
    %1 = arith.extui %0 : i1 to i32
    %c0_i32_0 = arith.constant 0 : i32
    %2 = arith.cmpi ne, %1, %c0_i32_0 : i32
    scf.if %2 {
      %cst_10 = arith.constant 0.000000e+00 : f32
      %12 = vector.broadcast %cst_10 : f32 to vector<32x96xf32>
      %c0_11 = arith.constant 0 : index
      %c0_12 = arith.constant 0 : index
      %13 = vector.load %arg6[%c0_11, %c0_12] : memref<32x96xf32, #tpu.memory_space<vmem>>, vector<32x96xf32>
      tpu.vector_store %arg6[%c0_11, %c0_12], %12 {strides = array<i32>} : memref<32x96xf32, #tpu.memory_space<vmem>>, vector<32x96xf32>,
    } else {
    }
    %c0 = arith.constant 0 : index
    %c0_1 = arith.constant 0 : index
    %3 = vector.load %arg6[%c0, %c0_1] : memref<32x96xf32, #tpu.memory_space<vmem>>, vector<32x96xf32>
    %c0_2 = arith.constant 0 : index
    %c0_3 = arith.constant 0 : index
    %4 = vector.load %arg3[%c0_2, %c0_3] : memref<32x32xbf16, #tpu.memory_space<vmem>>, vector<32x32xbf16>
    %c0_4 = arith.constant 0 : index
    %c0_5 = arith.constant 0 : index
    %5 = vector.load %arg4[%c0_4, %c0_5] : memref<32x96xbf16, #tpu.memory_space<vmem>>, vector<32x96xbf16>
    %cst = arith.constant dense<0.000000e+00> : vector<32x96xf32>
    %6 = tpu.matmul %4, %5, %cst {dimension_numbers = #tpu.dot_dimension_numbers<[1], [0], [0], [1], [0, 0, 1, 1], [], []>} : vector<32x32xbf16>, vector<32x96xbf16>, vector<32x96xf32> -> vector<32x96xf32>
    %7 = arith.addf %3, %6 : vector<32x96xf32>
    %c0_6 = arith.constant 0 : index
    %c0_7 = arith.constant 0 : index
    %8 = vector.load %arg6[%c0_6, %c0_7] : memref<32x96xf32, #tpu.memory_space<vmem>>, vector<32x96xf32>
    tpu.vector_store %arg6[%c0_6, %c0_7], %7 {strides = array<i32>} : memref<32x96xf32, #tpu.memory_space<vmem>>, vector<32x96xf32>,
    %c0_i32_8 = arith.constant 0 : i32
    %9 = arith.cmpi eq, %arg2, %c0_i32_8 : i32
    %10 = arith.extui %9 : i1 to i32
    %c0_i32_9 = arith.constant 0 : i32
    %11 = arith.cmpi ne, %10, %c0_i32_9 : i32
    scf.if %11 {
      %c0_10 = arith.constant 0 : index
      %c0_11 = arith.constant 0 : index
      %12 = vector.load %arg6[%c0_10, %c0_11] : memref<32x96xf32, #tpu.memory_space<vmem>>, vector<32x96xf32>
      %13 = arith.truncf %12 : vector<32x96xf32> to vector<32x96xbf16>
      %c0_12 = arith.constant 0 : index
      %c0_13 = arith.constant 0 : index
      %14 = vector.load %arg5[%c0_12, %c0_13] : memref<32x96xbf16, #tpu.memory_space<vmem>>, vector<32x96xbf16>
      tpu.vector_store %arg5[%c0_12, %c0_13], %13 {strides = array<i32>} : memref<32x96xbf16, #tpu.memory_space<vmem>>, vector<32x96xbf16>,
    } else {
    }
    return
  }
  func.func @transform_0(%arg0: i32, %arg1: i32, %arg2: i32) -> (i32, i32) {
    %c0_i32 = arith.constant 0 : i32
    return %arg0, %arg2 : i32, i32
  }
  func.func @transform_1(%arg0: i32, %arg1: i32, %arg2: i32) -> (i32, i32) {
    %c0_i32 = arith.constant 0 : i32
    return %arg2, %arg1 : i32, i32
  }
  func.func @transform_2(%arg0: i32, %arg1: i32, %arg2: i32) -> (i32, i32) {
    %c0_i32 = arith.constant 0 : i32
    return %arg0, %arg1 : i32, i32
  }
}

module attributes {stable_mosaic.version = 11 : i64} {
  func.func @_matmul_kernel(%arg0: i32, %arg1: i32, %arg2: i32, %arg3: memref<32x32xbf16, #tpu.memory_space<vmem>>, %arg4: memref<32x4xbf16, #tpu.memory_space<vmem>>, %arg5: memref<32x4xf32, #tpu.memory_space<vmem>>, %arg6: memref<32x4xf32, #tpu.memory_space<vmem>>) attributes {dimension_semantics = [#tpu.dimension_semantics<parallel>, #tpu.dimension_semantics<parallel>, #tpu.dimension_semantics<arbitrary>], iteration_bounds = array<i64: 1, 1, 1>, scalar_prefetch = 0 : i64, scratch_operands = 1 : i64, tpu.core_type = #tpu.core_type<tc>, window_params = [{transform_indices = @transform_0, window_bounds = array<i64: 32, 32>}, {transform_indices = @transform_1, window_bounds = array<i64: 32, 4>}, {transform_indices = @transform_2, window_bounds = array<i64: 32, 4>}]} {
    %c0_i32 = arith.constant 0 : i32
    %0 = arith.cmpi eq, %arg2, %c0_i32 : i32
    %1 = arith.extui %0 : i1 to i32
    %c0_i32_0 = arith.constant 0 : i32
    %2 = arith.cmpi ne, %1, %c0_i32_0 : i32
    scf.if %2 {
      %cst_10 = arith.constant 0.000000e+00 : f32
      %12 = vector.broadcast %cst_10 : f32 to vector<32x4xf32>
      %c0_11 = arith.constant 0 : index
      %c0_12 = arith.constant 0 : index
      %13 = vector.load %arg6[%c0_11, %c0_12] : memref<32x4xf32, #tpu.memory_space<vmem>>, vector<32x4xf32>
      tpu.vector_store %arg6[%c0_11, %c0_12], %12 {strides = array<i32>} : memref<32x4xf32, #tpu.memory_space<vmem>>, vector<32x4xf32>,
    } else {
    }
    %c0 = arith.constant 0 : index
    %c0_1 = arith.constant 0 : index
    %3 = vector.load %arg6[%c0, %c0_1] : memref<32x4xf32, #tpu.memory_space<vmem>>, vector<32x4xf32>
    %c0_2 = arith.constant 0 : index
    %c0_3 = arith.constant 0 : index
    %4 = vector.load %arg3[%c0_2, %c0_3] : memref<32x32xbf16, #tpu.memory_space<vmem>>, vector<32x32xbf16>
    %c0_4 = arith.constant 0 : index
    %c0_5 = arith.constant 0 : index
    %5 = vector.load %arg4[%c0_4, %c0_5] : memref<32x4xbf16, #tpu.memory_space<vmem>>, vector<32x4xbf16>
    %cst = arith.constant dense<0.000000e+00> : vector<32x4xf32>
    %6 = tpu.matmul %4, %5, %cst {dimension_numbers = #tpu.dot_dimension_numbers<[1], [0], [0], [1], [0, 0, 1, 1], [], []>} : vector<32x32xbf16>, vector<32x4xbf16>, vector<32x4xf32> -> vector<32x4xf32>
    %7 = arith.addf %3, %6 : vector<32x4xf32>
    %c0_6 = arith.constant 0 : index
    %c0_7 = arith.constant 0 : index
    %8 = vector.load %arg6[%c0_6, %c0_7] : memref<32x4xf32, #tpu.memory_space<vmem>>, vector<32x4xf32>
    tpu.vector_store %arg6[%c0_6, %c0_7], %7 {strides = array<i32>} : memref<32x4xf32, #tpu.memory_space<vmem>>, vector<32x4xf32>,
    %c0_i32_8 = arith.constant 0 : i32
    %9 = arith.cmpi eq, %arg2, %c0_i32_8 : i32
    %10 = arith.extui %9 : i1 to i32
    %c0_i32_9 = arith.constant 0 : i32
    %11 = arith.cmpi ne, %10, %c0_i32_9 : i32
    scf.if %11 {
      %c0_10 = arith.constant 0 : index
      %c0_11 = arith.constant 0 : index
      %12 = vector.load %arg6[%c0_10, %c0_11] : memref<32x4xf32, #tpu.memory_space<vmem>>, vector<32x4xf32>
      %c0_12 = arith.constant 0 : index
      %c0_13 = arith.constant 0 : index
      %13 = vector.load %arg5[%c0_12, %c0_13] : memref<32x4xf32, #tpu.memory_space<vmem>>, vector<32x4xf32>
      tpu.vector_store %arg5[%c0_12, %c0_13], %12 {strides = array<i32>} : memref<32x4xf32, #tpu.memory_space<vmem>>, vector<32x4xf32>,
    } else {
    }
    return
  }
  func.func @transform_0(%arg0: i32, %arg1: i32, %arg2: i32) -> (i32, i32) {
    %c0_i32 = arith.constant 0 : i32
    return %arg0, %arg2 : i32, i32
  }
  func.func @transform_1(%arg0: i32, %arg1: i32, %arg2: i32) -> (i32, i32) {
    %c0_i32 = arith.constant 0 : i32
    return %arg2, %arg1 : i32, i32
  }
  func.func @transform_2(%arg0: i32, %arg1: i32, %arg2: i32) -> (i32, i32) {
    %c0_i32 = arith.constant 0 : i32
    return %arg0, %arg1 : i32, i32
  }
}

module attributes {stable_mosaic.version = 11 : i64} {
  func.func @_conv_silu_kernel(%arg0: i32, %arg1: i32, %arg2: i32, %arg3: memref<1x16x96xbf16, #tpu.memory_space<vmem>>, %arg4: memref<4x96xf32, #tpu.memory_space<vmem>>, %arg5: memref<1x16x96xbf16, #tpu.memory_space<vmem>>, %arg6: memref<19x96xf32, #tpu.memory_space<vmem>>) attributes {dimension_semantics = [#tpu.dimension_semantics<parallel>, #tpu.dimension_semantics<parallel>, #tpu.dimension_semantics<arbitrary>], iteration_bounds = array<i64: 2, 1, 1>, scalar_prefetch = 0 : i64, scratch_operands = 1 : i64, tpu.core_type = #tpu.core_type<tc>, window_params = [{transform_indices = @transform_0, window_bounds = array<i64: 1, 16, 96>}, {transform_indices = @transform_1, window_bounds = array<i64: 4, 96>}, {transform_indices = @transform_2, window_bounds = array<i64: 1, 16, 96>}]} {
    %c0_i32 = arith.constant 0 : i32
    %0 = arith.cmpi eq, %arg2, %c0_i32 : i32
    %1 = arith.extui %0 : i1 to i32
    %c0_i32_0 = arith.constant 0 : i32
    %2 = arith.cmpi ne, %1, %c0_i32_0 : i32
    scf.if %2 {
      %cst_18 = arith.constant 0.000000e+00 : f32
      %42 = vector.broadcast %cst_18 : f32 to vector<3x96xf32>
      %c0_19 = arith.constant 0 : index
      %c0_20 = arith.constant 0 : index
      %43 = vector.load %arg6[%c0_19, %c0_20] : memref<19x96xf32, #tpu.memory_space<vmem>>, vector<3x96xf32>
      tpu.vector_store %arg6[%c0_19, %c0_20], %42 {strides = array<i32>} : memref<19x96xf32, #tpu.memory_space<vmem>>, vector<3x96xf32>,
    } else {
    }
    %c0_i32_1 = arith.constant 0 : i32
    %3 = arith.cmpi sgt, %arg2, %c0_i32_1 : i32
    %4 = arith.extui %3 : i1 to i32
    %c0_i32_2 = arith.constant 0 : i32
    %5 = arith.cmpi ne, %4, %c0_i32_2 : i32
    scf.if %5 {
      %c16 = arith.constant 16 : index
      %c0_18 = arith.constant 0 : index
      %42 = vector.load %arg6[%c16, %c0_18] : memref<19x96xf32, #tpu.memory_space<vmem>>, vector<3x96xf32>
      %c0_19 = arith.constant 0 : index
      %c0_20 = arith.constant 0 : index
      %43 = vector.load %arg6[%c0_19, %c0_20] : memref<19x96xf32, #tpu.memory_space<vmem>>, vector<3x96xf32>
      tpu.vector_store %arg6[%c0_19, %c0_20], %42 {strides = array<i32>} : memref<19x96xf32, #tpu.memory_space<vmem>>, vector<3x96xf32>,
    } else {
    }
    %c0 = arith.constant 0 : index
    %c0_3 = arith.constant 0 : index
    %c0_4 = arith.constant 0 : index
    %6 = vector.load %arg3[%c0, %c0_3, %c0_4] : memref<1x16x96xbf16, #tpu.memory_space<vmem>>, vector<1x16x96xbf16>
    %7 = vector.shape_cast %6 : vector<1x16x96xbf16> to vector<16x96xbf16>
    %8 = arith.extf %7 : vector<16x96xbf16> to vector<16x96xf32>
    %c3 = arith.constant 3 : index
    %c0_5 = arith.constant 0 : index
    %9 = vector.load %arg6[%c3, %c0_5] : memref<19x96xf32, #tpu.memory_space<vmem>>, vector<16x96xf32>
    tpu.vector_store %arg6[%c3, %c0_5], %8 {strides = array<i32>} : memref<19x96xf32, #tpu.memory_space<vmem>>, vector<16x96xf32>,
    %c0_6 = arith.constant 0 : index
    %c0_7 = arith.constant 0 : index
    %10 = vector.load %arg4[%c0_6, %c0_7] : memref<4x96xf32, #tpu.memory_space<vmem>>, vector<4x96xf32>
    %cst = arith.constant 0.000000e+00 : f32
    %11 = vector.broadcast %cst : f32 to vector<16x96xf32>
    %c0_8 = arith.constant 0 : index
    %c0_9 = arith.constant 0 : index
    %12 = vector.load %arg6[%c0_8, %c0_9] : memref<19x96xf32, #tpu.memory_space<vmem>>, vector<16x96xf32>
    %13 = vector.extract_strided_slice %10 {offsets = [0, 0], sizes = [1, 96], strides = [1, 1]} : vector<4x96xf32> to vector<1x96xf32>
    %14 = vector.broadcast %13 : vector<1x96xf32> to vector<16x96xf32>
    %15 = arith.mulf %12, %14 : vector<16x96xf32>
    %16 = arith.addf %11, %15 : vector<16x96xf32>
    %c1 = arith.constant 1 : index
    %c0_10 = arith.constant 0 : index
    %17 = vector.load %arg6[%c1, %c0_10] : memref<19x96xf32, #tpu.memory_space<vmem>>, vector<16x96xf32>
    %18 = vector.extract_strided_slice %10 {offsets = [1, 0], sizes = [1, 96], strides = [1, 1]} : vector<4x96xf32> to vector<1x96xf32>
    %19 = vector.broadcast %18 : vector<1x96xf32> to vector<16x96xf32>
    %20 = arith.mulf %17, %19 : vector<16x96xf32>
    %21 = arith.addf %16, %20 : vector<16x96xf32>
    %c2 = arith.constant 2 : index
    %c0_11 = arith.constant 0 : index
    %22 = vector.load %arg6[%c2, %c0_11] : memref<19x96xf32, #tpu.memory_space<vmem>>, vector<16x96xf32>
    %23 = vector.extract_strided_slice %10 {offsets = [2, 0], sizes = [1, 96], strides = [1, 1]} : vector<4x96xf32> to vector<1x96xf32>
    %24 = vector.broadcast %23 : vector<1x96xf32> to vector<16x96xf32>
    %25 = arith.mulf %22, %24 : vector<16x96xf32>
    %26 = arith.addf %21, %25 : vector<16x96xf32>
    %c3_12 = arith.constant 3 : index
    %c0_13 = arith.constant 0 : index
    %27 = vector.load %arg6[%c3_12, %c0_13] : memref<19x96xf32, #tpu.memory_space<vmem>>, vector<16x96xf32>
    %28 = vector.extract_strided_slice %10 {offsets = [3, 0], sizes = [1, 96], strides = [1, 1]} : vector<4x96xf32> to vector<1x96xf32>
    %29 = vector.broadcast %28 : vector<1x96xf32> to vector<16x96xf32>
    %30 = arith.mulf %27, %29 : vector<16x96xf32>
    %31 = arith.addf %26, %30 : vector<16x96xf32>
    %32 = arith.negf %31 : vector<16x96xf32>
    %33 = math.exp %32 : vector<16x96xf32>
    %cst_14 = arith.constant 1.000000e+00 : f32
    %34 = vector.broadcast %cst_14 : f32 to vector<16x96xf32>
    %35 = arith.addf %34, %33 : vector<16x96xf32>
    %36 = arith.divf %34, %35 : vector<16x96xf32>
    %37 = arith.mulf %31, %36 : vector<16x96xf32>
    %38 = arith.truncf %37 : vector<16x96xf32> to vector<16x96xbf16>
    %c0_15 = arith.constant 0 : index
    %c0_16 = arith.constant 0 : index
    %c0_17 = arith.constant 0 : index
    %39 = vector.load %arg5[%c0_15, %c0_16, %c0_17] : memref<1x16x96xbf16, #tpu.memory_space<vmem>>, vector<1x16x96xbf16>
    %40 = vector.shape_cast %39 : vector<1x16x96xbf16> to vector<16x96xbf16>
    %41 = vector.shape_cast %38 : vector<16x96xbf16> to vector<1x16x96xbf16>
    tpu.vector_store %arg5[%c0_15, %c0_16, %c0_17], %41 {strides = array<i32>} : memref<1x16x96xbf16, #tpu.memory_space<vmem>>, vector<1x16x96xbf16>,
    return
  }
  func.func @transform_0(%arg0: i32, %arg1: i32, %arg2: i32) -> (i32, i32, i32) {
    %c0_i32 = arith.constant 0 : i32
    return %arg0, %arg2, %arg1 : i32, i32, i32
  }
  func.func @transform_1(%arg0: i32, %arg1: i32, %arg2: i32) -> (i32, i32) {
    %c0_i32 = arith.constant 0 : i32
    %c0_i32_0 = arith.constant 0 : i32
    return %c0_i32, %arg1 : i32, i32
  }
  func.func @transform_2(%arg0: i32, %arg1: i32, %arg2: i32) -> (i32, i32, i32) {
    %c0_i32 = arith.constant 0 : i32
    return %arg0, %arg2, %arg1 : i32, i32, i32
  }
}

module attributes {stable_mosaic.version = 11 : i64} {
  func.func @_matmul_kernel(%arg0: i32, %arg1: i32, %arg2: i32, %arg3: memref<32x32xbf16, #tpu.memory_space<vmem>>, %arg4: memref<32x256xbf16, #tpu.memory_space<vmem>>, %arg5: memref<32x256xbf16, #tpu.memory_space<vmem>>, %arg6: memref<32x256xf32, #tpu.memory_space<vmem>>) attributes {dimension_semantics = [#tpu.dimension_semantics<parallel>, #tpu.dimension_semantics<parallel>, #tpu.dimension_semantics<arbitrary>], iteration_bounds = array<i64: 1, 1, 1>, scalar_prefetch = 0 : i64, scratch_operands = 1 : i64, tpu.core_type = #tpu.core_type<tc>, window_params = [{transform_indices = @transform_0, window_bounds = array<i64: 32, 32>}, {transform_indices = @transform_1, window_bounds = array<i64: 32, 256>}, {transform_indices = @transform_2, window_bounds = array<i64: 32, 256>}]} {
    %c0_i32 = arith.constant 0 : i32
    %0 = arith.cmpi eq, %arg2, %c0_i32 : i32
    %1 = arith.extui %0 : i1 to i32
    %c0_i32_0 = arith.constant 0 : i32
    %2 = arith.cmpi ne, %1, %c0_i32_0 : i32
    scf.if %2 {
      %cst_10 = arith.constant 0.000000e+00 : f32
      %12 = vector.broadcast %cst_10 : f32 to vector<32x256xf32>
      %c0_11 = arith.constant 0 : index
      %c0_12 = arith.constant 0 : index
      %13 = vector.load %arg6[%c0_11, %c0_12] : memref<32x256xf32, #tpu.memory_space<vmem>>, vector<32x256xf32>
      tpu.vector_store %arg6[%c0_11, %c0_12], %12 {strides = array<i32>} : memref<32x256xf32, #tpu.memory_space<vmem>>, vector<32x256xf32>,
    } else {
    }
    %c0 = arith.constant 0 : index
    %c0_1 = arith.constant 0 : index
    %3 = vector.load %arg6[%c0, %c0_1] : memref<32x256xf32, #tpu.memory_space<vmem>>, vector<32x256xf32>
    %c0_2 = arith.constant 0 : index
    %c0_3 = arith.constant 0 : index
    %4 = vector.load %arg3[%c0_2, %c0_3] : memref<32x32xbf16, #tpu.memory_space<vmem>>, vector<32x32xbf16>
    %c0_4 = arith.constant 0 : index
    %c0_5 = arith.constant 0 : index
    %5 = vector.load %arg4[%c0_4, %c0_5] : memref<32x256xbf16, #tpu.memory_space<vmem>>, vector<32x256xbf16>
    %cst = arith.constant dense<0.000000e+00> : vector<32x256xf32>
    %6 = tpu.matmul %4, %5, %cst {dimension_numbers = #tpu.dot_dimension_numbers<[1], [0], [0], [1], [0, 0, 1, 1], [], []>} : vector<32x32xbf16>, vector<32x256xbf16>, vector<32x256xf32> -> vector<32x256xf32>
    %7 = arith.addf %3, %6 : vector<32x256xf32>
    %c0_6 = arith.constant 0 : index
    %c0_7 = arith.constant 0 : index
    %8 = vector.load %arg6[%c0_6, %c0_7] : memref<32x256xf32, #tpu.memory_space<vmem>>, vector<32x256xf32>
    tpu.vector_store %arg6[%c0_6, %c0_7], %7 {strides = array<i32>} : memref<32x256xf32, #tpu.memory_space<vmem>>, vector<32x256xf32>,
    %c0_i32_8 = arith.constant 0 : i32
    %9 = arith.cmpi eq, %arg2, %c0_i32_8 : i32
    %10 = arith.extui %9 : i1 to i32
    %c0_i32_9 = arith.constant 0 : i32
    %11 = arith.cmpi ne, %10, %c0_i32_9 : i32
    scf.if %11 {
      %c0_10 = arith.constant 0 : index
      %c0_11 = arith.constant 0 : index
      %12 = vector.load %arg6[%c0_10, %c0_11] : memref<32x256xf32, #tpu.memory_space<vmem>>, vector<32x256xf32>
      %13 = arith.truncf %12 : vector<32x256xf32> to vector<32x256xbf16>
      %c0_12 = arith.constant 0 : index
      %c0_13 = arith.constant 0 : index
      %14 = vector.load %arg5[%c0_12, %c0_13] : memref<32x256xbf16, #tpu.memory_space<vmem>>, vector<32x256xbf16>
      tpu.vector_store %arg5[%c0_12, %c0_13], %13 {strides = array<i32>} : memref<32x256xbf16, #tpu.memory_space<vmem>>, vector<32x256xbf16>,
    } else {
    }
    return
  }
  func.func @transform_0(%arg0: i32, %arg1: i32, %arg2: i32) -> (i32, i32) {
    %c0_i32 = arith.constant 0 : i32
    return %arg0, %arg2 : i32, i32
  }
  func.func @transform_1(%arg0: i32, %arg1: i32, %arg2: i32) -> (i32, i32) {
    %c0_i32 = arith.constant 0 : i32
    return %arg2, %arg1 : i32, i32
  }
  func.func @transform_2(%arg0: i32, %arg1: i32, %arg2: i32) -> (i32, i32) {
    %c0_i32 = arith.constant 0 : i32
    return %arg0, %arg1 : i32, i32
  }
}

module attributes {stable_mosaic.version = 11 : i64} {
  func.func @_matmul_kernel(%arg0: i32, %arg1: i32, %arg2: i32, %arg3: memref<32x32xbf16, #tpu.memory_space<vmem>>, %arg4: memref<32x32xbf16, #tpu.memory_space<vmem>>, %arg5: memref<32x32xf32, #tpu.memory_space<vmem>>, %arg6: memref<32x32xf32, #tpu.memory_space<vmem>>) attributes {dimension_semantics = [#tpu.dimension_semantics<parallel>, #tpu.dimension_semantics<parallel>, #tpu.dimension_semantics<arbitrary>], iteration_bounds = array<i64: 1, 1, 1>, scalar_prefetch = 0 : i64, scratch_operands = 1 : i64, tpu.core_type = #tpu.core_type<tc>, window_params = [{transform_indices = @transform_0, window_bounds = array<i64: 32, 32>}, {transform_indices = @transform_1, window_bounds = array<i64: 32, 32>}, {transform_indices = @transform_2, window_bounds = array<i64: 32, 32>}]} {
    %c0_i32 = arith.constant 0 : i32
    %0 = arith.cmpi eq, %arg2, %c0_i32 : i32
    %1 = arith.extui %0 : i1 to i32
    %c0_i32_0 = arith.constant 0 : i32
    %2 = arith.cmpi ne, %1, %c0_i32_0 : i32
    scf.if %2 {
      %cst_10 = arith.constant 0.000000e+00 : f32
      %12 = vector.broadcast %cst_10 : f32 to vector<32x32xf32>
      %c0_11 = arith.constant 0 : index
      %c0_12 = arith.constant 0 : index
      %13 = vector.load %arg6[%c0_11, %c0_12] : memref<32x32xf32, #tpu.memory_space<vmem>>, vector<32x32xf32>
      tpu.vector_store %arg6[%c0_11, %c0_12], %12 {strides = array<i32>} : memref<32x32xf32, #tpu.memory_space<vmem>>, vector<32x32xf32>,
    } else {
    }
    %c0 = arith.constant 0 : index
    %c0_1 = arith.constant 0 : index
    %3 = vector.load %arg6[%c0, %c0_1] : memref<32x32xf32, #tpu.memory_space<vmem>>, vector<32x32xf32>
    %c0_2 = arith.constant 0 : index
    %c0_3 = arith.constant 0 : index
    %4 = vector.load %arg3[%c0_2, %c0_3] : memref<32x32xbf16, #tpu.memory_space<vmem>>, vector<32x32xbf16>
    %c0_4 = arith.constant 0 : index
    %c0_5 = arith.constant 0 : index
    %5 = vector.load %arg4[%c0_4, %c0_5] : memref<32x32xbf16, #tpu.memory_space<vmem>>, vector<32x32xbf16>
    %cst = arith.constant dense<0.000000e+00> : vector<32x32xf32>
    %6 = tpu.matmul %4, %5, %cst {dimension_numbers = #tpu.dot_dimension_numbers<[1], [0], [0], [1], [0, 0, 1, 1], [], []>} : vector<32x32xbf16>, vector<32x32xbf16>, vector<32x32xf32> -> vector<32x32xf32>
    %7 = arith.addf %3, %6 : vector<32x32xf32>
    %c0_6 = arith.constant 0 : index
    %c0_7 = arith.constant 0 : index
    %8 = vector.load %arg6[%c0_6, %c0_7] : memref<32x32xf32, #tpu.memory_space<vmem>>, vector<32x32xf32>
    tpu.vector_store %arg6[%c0_6, %c0_7], %7 {strides = array<i32>} : memref<32x32xf32, #tpu.memory_space<vmem>>, vector<32x32xf32>,
    %c0_i32_8 = arith.constant 0 : i32
    %9 = arith.cmpi eq, %arg2, %c0_i32_8 : i32
    %10 = arith.extui %9 : i1 to i32
    %c0_i32_9 = arith.constant 0 : i32
    %11 = arith.cmpi ne, %10, %c0_i32_9 : i32
    scf.if %11 {
      %c0_10 = arith.constant 0 : index
      %c0_11 = arith.constant 0 : index
      %12 = vector.load %arg6[%c0_10, %c0_11] : memref<32x32xf32, #tpu.memory_space<vmem>>, vector<32x32xf32>
      %c0_12 = arith.constant 0 : index
      %c0_13 = arith.constant 0 : index
      %13 = vector.load %arg5[%c0_12, %c0_13] : memref<32x32xf32, #tpu.memory_space<vmem>>, vector<32x32xf32>
      tpu.vector_store %arg5[%c0_12, %c0_13], %12 {strides = array<i32>} : memref<32x32xf32, #tpu.memory_space<vmem>>, vector<32x32xf32>,
    } else {
    }
    return
  }
  func.func @transform_0(%arg0: i32, %arg1: i32, %arg2: i32) -> (i32, i32) {
    %c0_i32 = arith.constant 0 : i32
    return %arg0, %arg2 : i32, i32
  }
  func.func @transform_1(%arg0: i32, %arg1: i32, %arg2: i32) -> (i32, i32) {
    %c0_i32 = arith.constant 0 : i32
    return %arg2, %arg1 : i32, i32
  }
  func.func @transform_2(%arg0: i32, %arg1: i32, %arg2: i32) -> (i32, i32) {
    %c0_i32 = arith.constant 0 : i32
    return %arg0, %arg1 : i32, i32
  }
}

module attributes {stable_mosaic.version = 11 : i64} {
  func.func @_chunk_delta_kernel(%arg0: i32, %arg1: i32, %arg2: memref<1x8x96xbf16, #tpu.memory_space<vmem>>, %arg3: memref<1x8x4xf32, #tpu.memory_space<vmem>>, %arg4: memref<32x4xf32, #tpu.memory_space<vmem>>, %arg5: memref<4x32xf32, #tpu.memory_space<vmem>>, %arg6: memref<1x32xf32, #tpu.memory_space<vmem>>, %arg7: memref<1x8x32xbf16, #tpu.memory_space<vmem>>, %arg8: memref<1x4x8x8xf32, #tpu.memory_space<vmem>>, %arg9: memref<1x32xf32, #tpu.memory_space<vmem>>) attributes {dimension_semantics = [#tpu.dimension_semantics<parallel>, #tpu.dimension_semantics<arbitrary>], iteration_bounds = array<i64: 2, 2>, scalar_prefetch = 0 : i64, scratch_operands = 1 : i64, tpu.core_type = #tpu.core_type<tc>, window_params = [{transform_indices = @transform_0, window_bounds = array<i64: 1, 8, 96>}, {transform_indices = @transform_1, window_bounds = array<i64: 1, 8, 4>}, {pipeline_mode = #tpu.pipeline_mode<synchronous>, transform_indices = @transform_2, window_bounds = array<i64: 32, 4>}, {pipeline_mode = #tpu.pipeline_mode<synchronous>, transform_indices = @transform_3, window_bounds = array<i64: 4, 32>}, {pipeline_mode = #tpu.pipeline_mode<synchronous>, transform_indices = @transform_4, window_bounds = array<i64: 1, 32>}, {transform_indices = @transform_5, window_bounds = array<i64: 1, 8, 32>}, {transform_indices = @transform_6, window_bounds = array<i64: 1, 4, 8, 8>}]} {
    %c0_i32 = arith.constant 0 : i32
    %0 = arith.cmpi eq, %arg1, %c0_i32 : i32
    %1 = arith.extui %0 : i1 to i32
    %c0_i32_0 = arith.constant 0 : i32
    %2 = arith.cmpi ne, %1, %c0_i32_0 : i32
    scf.if %2 {
      %cst_53 = arith.constant 0.000000e+00 : f32
      %118 = vector.broadcast %cst_53 : f32 to vector<4x8x8xf32>
      %c0_54 = arith.constant 0 : index
      %c0_55 = arith.constant 0 : index
      %c0_56 = arith.constant 0 : index
      %c0_57 = arith.constant 0 : index
      %119 = vector.load %arg8[%c0_54, %c0_55, %c0_56, %c0_57] : memref<1x4x8x8xf32, #tpu.memory_space<vmem>>, vector<1x4x8x8xf32>
      %120 = vector.shape_cast %119 : vector<1x4x8x8xf32> to vector<4x8x8xf32>
      %121 = vector.shape_cast %118 : vector<4x8x8xf32> to vector<1x4x8x8xf32>
      tpu.vector_store %arg8[%c0_54, %c0_55, %c0_56, %c0_57], %121 {strides = array<i32>} : memref<1x4x8x8xf32, #tpu.memory_space<vmem>>, vector<1x4x8x8xf32>,
      %cst_58 = arith.constant 0.000000e+00 : f32
      %122 = vector.broadcast %cst_58 : f32 to vector<1x32xf32>
      %c0_59 = arith.constant 0 : index
      %c0_60 = arith.constant 0 : index
      %123 = vector.load %arg9[%c0_59, %c0_60] : memref<1x32xf32, #tpu.memory_space<vmem>>, vector<1x32xf32>
      tpu.vector_store %arg9[%c0_59, %c0_60], %122 {strides = array<i32>} : memref<1x32xf32, #tpu.memory_space<vmem>>, vector<1x32xf32>,
    } else {
    }
    %c0 = arith.constant 0 : index
    %c0_1 = arith.constant 0 : index
    %3 = vector.load %arg4[%c0, %c0_1] : memref<32x4xf32, #tpu.memory_space<vmem>>, vector<32x4xf32>
    %c0_2 = arith.constant 0 : index
    %c0_3 = arith.constant 0 : index
    %4 = vector.load %arg5[%c0_2, %c0_3] : memref<4x32xf32, #tpu.memory_space<vmem>>, vector<4x32xf32>
    %c0_4 = arith.constant 0 : index
    %c0_5 = arith.constant 0 : index
    %c0_6 = arith.constant 0 : index
    %5 = vector.load %arg2[%c0_4, %c0_5, %c0_6] : memref<1x8x96xbf16, #tpu.memory_space<vmem>>, vector<1x8x96xbf16>
    %6 = vector.shape_cast %5 : vector<1x8x96xbf16> to vector<8x96xbf16>
    %7 = arith.extf %6 : vector<8x96xbf16> to vector<8x96xf32>
    %8 = vector.extract_strided_slice %7 {offsets = [0, 0], sizes = [8, 32], strides = [1, 1]} : vector<8x96xf32> to vector<8x32xf32>
    %9 = vector.extract_strided_slice %7 {offsets = [0, 32], sizes = [8, 32], strides = [1, 1]} : vector<8x96xf32> to vector<8x32xf32>
    %10 = vector.extract_strided_slice %7 {offsets = [0, 64], sizes = [8, 32], strides = [1, 1]} : vector<8x96xf32> to vector<8x32xf32>
    %11 = tpu.iota {dimensions = array<i32: 0>} : vector<8x1xi32>
    %c8_i32 = arith.constant 8 : i32
    %12 = arith.muli %arg1, %c8_i32 : i32
    %13 = vector.broadcast %12 : i32 to vector<8x1xi32>
    %14 = arith.addi %13, %11 : vector<8x1xi32>
    %c16_i32 = arith.constant 16 : i32
    %15 = vector.broadcast %c16_i32 : i32 to vector<8x1xi32>
    %16 = arith.cmpi slt, %14, %15 : vector<8x1xi32>
    %17 = arith.mulf %8, %8 : vector<8x32xf32>
    %cst = arith.constant dense<0.000000e+00> : vector<8x4xf32>
    %18 = tpu.matmul %17, %3, %cst {dimension_numbers = #tpu.dot_dimension_numbers<[1], [0], [0], [1], [0, 0, 1, 1], [], []>} : vector<8x32xf32>, vector<32x4xf32>, vector<8x4xf32> -> vector<8x4xf32>
    %19 = math.rsqrt %18 : vector<8x4xf32>
    %cst_7 = arith.constant dense<0.000000e+00> : vector<8x32xf32>
    %20 = tpu.matmul %19, %4, %cst_7 {dimension_numbers = #tpu.dot_dimension_numbers<[1], [0], [0], [1], [0, 0, 1, 1], [], []>} : vector<8x4xf32>, vector<4x32xf32>, vector<8x32xf32> -> vector<8x32xf32>
    %21 = arith.mulf %8, %20 : vector<8x32xf32>
    %cst_8 = arith.constant 0.000000e+00 : f32
    %22 = vector.shape_cast %16 : vector<8x1xi1> to vector<8x1xi1>
    %23 = vector.broadcast %22 : vector<8x1xi1> to vector<8x32xi1>
    %24 = vector.broadcast %cst_8 : f32 to vector<8x32xf32>
    %25 = arith.select %23, %21, %24 : vector<8x32xi1>, vector<8x32xf32>
    %26 = arith.mulf %9, %9 : vector<8x32xf32>
    %cst_9 = arith.constant dense<0.000000e+00> : vector<8x4xf32>
    %27 = tpu.matmul %26, %3, %cst_9 {dimension_numbers = #tpu.dot_dimension_numbers<[1], [0], [0], [1], [0, 0, 1, 1], [], []>} : vector<8x32xf32>, vector<32x4xf32>, vector<8x4xf32> -> vector<8x4xf32>
    %28 = math.rsqrt %27 : vector<8x4xf32>
    %cst_10 = arith.constant dense<0.000000e+00> : vector<8x32xf32>
    %29 = tpu.matmul %28, %4, %cst_10 {dimension_numbers = #tpu.dot_dimension_numbers<[1], [0], [0], [1], [0, 0, 1, 1], [], []>} : vector<8x4xf32>, vector<4x32xf32>, vector<8x32xf32> -> vector<8x32xf32>
    %30 = arith.mulf %9, %29 : vector<8x32xf32>
    %cst_11 = arith.constant 0.000000e+00 : f32
    %31 = vector.shape_cast %16 : vector<8x1xi1> to vector<8x1xi1>
    %32 = vector.broadcast %31 : vector<8x1xi1> to vector<8x32xi1>
    %33 = vector.broadcast %cst_11 : f32 to vector<8x32xf32>
    %34 = arith.select %32, %30, %33 : vector<8x32xi1>, vector<8x32xf32>
    %c0_12 = arith.constant 0 : index
    %c0_13 = arith.constant 0 : index
    %c0_14 = arith.constant 0 : index
    %35 = vector.load %arg3[%c0_12, %c0_13, %c0_14] : memref<1x8x4xf32, #tpu.memory_space<vmem>>, vector<1x8x4xf32>
    %36 = vector.shape_cast %35 : vector<1x8x4xf32> to vector<8x4xf32>
    %37 = arith.negf %36 : vector<8x4xf32>
    %38 = math.exp %37 : vector<8x4xf32>
    %cst_15 = arith.constant 1.000000e+00 : f32
    %39 = vector.broadcast %cst_15 : f32 to vector<8x4xf32>
    %40 = arith.addf %39, %38 : vector<8x4xf32>
    %41 = arith.divf %39, %40 : vector<8x4xf32>
    %cst_16 = arith.constant dense<0.000000e+00> : vector<8x32xf32>
    %42 = tpu.matmul %41, %4, %cst_16 {dimension_numbers = #tpu.dot_dimension_numbers<[1], [0], [0], [1], [0, 0, 1, 1], [], []>} : vector<8x4xf32>, vector<4x32xf32>, vector<8x32xf32> -> vector<8x32xf32>
    %43 = arith.mulf %34, %42 : vector<8x32xf32>
    %44 = arith.mulf %10, %42 : vector<8x32xf32>
    %cst_17 = arith.constant dense<0.000000e+00> : vector<8x8xf32>
    %45 = tpu.matmul %43, %34, %cst_17 {dimension_numbers = #tpu.dot_dimension_numbers<[1], [1], [0], [0], [0, 0, 1, 0], [], []>} : vector<8x32xf32>, vector<8x32xf32>, vector<8x8xf32> -> vector<8x8xf32>
    %46 = tpu.iota {dimensions = array<i32: 0>} : vector<8x8xi32>
    %47 = tpu.iota {dimensions = array<i32: 1>} : vector<8x8xi32>
    %48 = arith.cmpi eq, %46, %47 : vector<8x8xi32>
    %49 = arith.extui %48 : vector<8x8xi1> to vector<8x8xi32>
    %50 = arith.sitofp %49 : vector<8x8xi32> to vector<8x8xf32>
    %51 = arith.cmpi sgt, %46, %47 : vector<8x8xi32>
    %cst_18 = arith.constant 0.000000e+00 : f32
    %52 = vector.broadcast %cst_18 : f32 to vector<8x8xf32>
    %53 = arith.subf %52, %45 : vector<8x8xf32>
    %cst_19 = arith.constant 0.000000e+00 : f32
    %54 = vector.broadcast %cst_19 : f32 to vector<8x8xf32>
    %55 = arith.select %51, %53, %54 : vector<8x8xi1>, vector<8x8xf32>
    %56 = arith.addf %50, %55 : vector<8x8xf32>
    %cst_20 = arith.constant dense<0.000000e+00> : vector<8x8xf32>
    %57 = tpu.matmul %55, %55, %cst_20 {dimension_numbers = #tpu.dot_dimension_numbers<[1], [0], [0], [1], [0, 0, 1, 1], [], []>} : vector<8x8xf32>, vector<8x8xf32>, vector<8x8xf32> -> vector<8x8xf32>
    %cst_21 = arith.constant dense<0.000000e+00> : vector<8x8xf32>
    %58 = tpu.matmul %56, %57, %cst_21 {dimension_numbers = #tpu.dot_dimension_numbers<[1], [0], [0], [1], [0, 0, 1, 1], [], []>} : vector<8x8xf32>, vector<8x8xf32>, vector<8x8xf32> -> vector<8x8xf32>
    %59 = arith.addf %56, %58 : vector<8x8xf32>
    %cst_22 = arith.constant dense<0.000000e+00> : vector<8x8xf32>
    %60 = tpu.matmul %57, %57, %cst_22 {dimension_numbers = #tpu.dot_dimension_numbers<[1], [0], [0], [1], [0, 0, 1, 1], [], []>} : vector<8x8xf32>, vector<8x8xf32>, vector<8x8xf32> -> vector<8x8xf32>
    %cst_23 = arith.constant dense<0.000000e+00> : vector<8x8xf32>
    %61 = tpu.matmul %59, %60, %cst_23 {dimension_numbers = #tpu.dot_dimension_numbers<[1], [0], [0], [1], [0, 0, 1, 1], [], []>} : vector<8x8xf32>, vector<8x8xf32>, vector<8x8xf32> -> vector<8x8xf32>
    %62 = arith.addf %59, %61 : vector<8x8xf32>
    %cst_24 = arith.constant 3.000000e+00 : f32
    %63 = vector.broadcast %cst_24 : f32 to vector<8x8xf32>
    %64 = arith.mulf %63, %62 : vector<8x8xf32>
    %cst_25 = arith.constant 2.000000e+00 : f32
    %65 = vector.broadcast %cst_25 : f32 to vector<8x8xf32>
    %66 = arith.mulf %65, %50 : vector<8x8xf32>
    %67 = arith.subf %64, %66 : vector<8x8xf32>
    %c0_26 = arith.constant 0 : index
    %c0_27 = arith.constant 0 : index
    %68 = vector.load %arg9[%c0_26, %c0_27] : memref<1x32xf32, #tpu.memory_space<vmem>>, vector<1x32xf32>
    %cst_28 = arith.constant dense<0.000000e+00> : vector<8x32xf32>
    %69 = tpu.matmul %67, %43, %cst_28 {dimension_numbers = #tpu.dot_dimension_numbers<[1], [0], [0], [1], [0, 0, 1, 1], [], []>} : vector<8x8xf32>, vector<8x32xf32>, vector<8x32xf32> -> vector<8x32xf32>
    %cst_29 = arith.constant dense<0.000000e+00> : vector<8x32xf32>
    %70 = tpu.matmul %67, %44, %cst_29 {dimension_numbers = #tpu.dot_dimension_numbers<[1], [0], [0], [1], [0, 0, 1, 1], [], []>} : vector<8x8xf32>, vector<8x32xf32>, vector<8x32xf32> -> vector<8x32xf32>
    %71 = vector.broadcast %68 : vector<1x32xf32> to vector<8x32xf32>
    %72 = arith.mulf %69, %71 : vector<8x32xf32>
    %73 = arith.subf %70, %72 : vector<8x32xf32>
    %74 = arith.mulf %25, %34 : vector<8x32xf32>
    %cst_30 = arith.constant dense<0.000000e+00> : vector<8xf32>
    %75 = vector.multi_reduction <add>, %74, %cst_30 [1] : vector<8x32xf32> to vector<8xf32>
    %76 = vector.shape_cast %75 : vector<8xf32> to vector<8x1xf32>
    %77 = vector.broadcast %arg0 : i32 to vector<8x1xi32>
    %78 = arith.cmpi sle, %11, %77 : vector<8x1xi32>
    %cst_31 = arith.constant 0.000000e+00 : f32
    %79 = vector.broadcast %cst_31 : f32 to vector<8x1xf32>
    %80 = arith.select %78, %76, %79 : vector<8x1xi1>, vector<8x1xf32>
    %81 = vector.broadcast %68 : vector<1x32xf32> to vector<8x32xf32>
    %82 = arith.mulf %25, %81 : vector<8x32xf32>
    %83 = vector.broadcast %80 : vector<8x1xf32> to vector<8x32xf32>
    %84 = arith.mulf %83, %73 : vector<8x32xf32>
    %85 = arith.addf %82, %84 : vector<8x32xf32>
    %86 = arith.mulf %85, %85 : vector<8x32xf32>
    %cst_32 = arith.constant dense<0.000000e+00> : vector<8x4xf32>
    %87 = tpu.matmul %86, %3, %cst_32 {dimension_numbers = #tpu.dot_dimension_numbers<[1], [0], [0], [1], [0, 0, 1, 1], [], []>} : vector<8x32xf32>, vector<32x4xf32>, vector<8x4xf32> -> vector<8x4xf32>
    %cst_33 = arith.constant 1.250000e-01 : f32
    %88 = vector.broadcast %cst_33 : f32 to vector<8x4xf32>
    %89 = arith.mulf %87, %88 : vector<8x4xf32>
    %cst_34 = arith.constant 9.99999997E-7 : f32
    %90 = vector.broadcast %cst_34 : f32 to vector<8x4xf32>
    %91 = arith.addf %89, %90 : vector<8x4xf32>
    %92 = math.rsqrt %91 : vector<8x4xf32>
    %cst_35 = arith.constant dense<0.000000e+00> : vector<8x32xf32>
    %93 = tpu.matmul %92, %4, %cst_35 {dimension_numbers = #tpu.dot_dimension_numbers<[1], [0], [0], [1], [0, 0, 1, 1], [], []>} : vector<8x4xf32>, vector<4x32xf32>, vector<8x32xf32> -> vector<8x32xf32>
    %94 = arith.mulf %85, %93 : vector<8x32xf32>
    %c0_36 = arith.constant 0 : index
    %c0_37 = arith.constant 0 : index
    %95 = vector.load %arg6[%c0_36, %c0_37] : memref<1x32xf32, #tpu.memory_space<vmem>>, vector<1x32xf32>
    %96 = vector.broadcast %95 : vector<1x32xf32> to vector<8x32xf32>
    %97 = arith.mulf %94, %96 : vector<8x32xf32>
    %98 = arith.truncf %97 : vector<8x32xf32> to vector<8x32xbf16>
    %c0_38 = arith.constant 0 : index
    %c0_39 = arith.constant 0 : index
    %c0_40 = arith.constant 0 : index
    %99 = vector.load %arg7[%c0_38, %c0_39, %c0_40] : memref<1x8x32xbf16, #tpu.memory_space<vmem>>, vector<1x8x32xbf16>
    %100 = vector.shape_cast %99 : vector<1x8x32xbf16> to vector<8x32xbf16>
    %101 = vector.shape_cast %98 : vector<8x32xbf16> to vector<1x8x32xbf16>
    tpu.vector_store %arg7[%c0_38, %c0_39, %c0_40], %101 {strides = array<i32>} : memref<1x8x32xbf16, #tpu.memory_space<vmem>>, vector<1x8x32xbf16>,
    %102 = arith.mulf %34, %73 : vector<8x32xf32>
    %cst_41 = arith.constant dense<0.000000e+00> : vector<32xf32>
    %103 = vector.multi_reduction <add>, %102, %cst_41 [0] : vector<8x32xf32> to vector<32xf32>
    %104 = vector.shape_cast %103 : vector<32xf32> to vector<1x32xf32>
    %105 = arith.addf %68, %104 : vector<1x32xf32>
    %c0_42 = arith.constant 0 : index
    %c0_43 = arith.constant 0 : index
    %106 = vector.load %arg9[%c0_42, %c0_43] : memref<1x32xf32, #tpu.memory_space<vmem>>, vector<1x32xf32>
    tpu.vector_store %arg9[%c0_42, %c0_43], %105 {strides = array<i32>} : memref<1x32xf32, #tpu.memory_space<vmem>>, vector<1x32xf32>,
    %107 = vector.shape_cast %34 : vector<8x32xf32> to vector<8x4x8xf32>
    %108 = tpu.transpose %107, [1, 0, 2] : vector<8x4x8xf32> -> vector<4x8x8xf32>
    %109 = vector.shape_cast %73 : vector<8x32xf32> to vector<8x4x8xf32>
    %110 = tpu.transpose %109, [1, 0, 2] : vector<8x4x8xf32> -> vector<4x8x8xf32>
    %c0_44 = arith.constant 0 : index
    %c0_45 = arith.constant 0 : index
    %c0_46 = arith.constant 0 : index
    %c0_47 = arith.constant 0 : index
    %111 = vector.load %arg8[%c0_44, %c0_45, %c0_46, %c0_47] : memref<1x4x8x8xf32, #tpu.memory_space<vmem>>, vector<1x4x8x8xf32>
    %112 = vector.shape_cast %111 : vector<1x4x8x8xf32> to vector<4x8x8xf32>
    "tpu.trace_start"() <{level = 10 : i32, message = "hcd,hce->hde"}> : () -> ()
    %cst_48 = arith.constant dense<0.000000e+00> : vector<4x8x8xf32>
    %113 = tpu.matmul %108, %110, %cst_48 {dimension_numbers = #tpu.dot_dimension_numbers<[1], [1], [2], [2], [0, 0, 0, 2, 1, 2], [0], [0]>} : vector<4x8x8xf32>, vector<4x8x8xf32>, vector<4x8x8xf32> -> vector<4x8x8xf32>
    "tpu.trace_stop"() : () -> ()
    %114 = arith.addf %112, %113 : vector<4x8x8xf32>
    %c0_49 = arith.constant 0 : index
    %c0_50 = arith.constant 0 : index
    %c0_51 = arith.constant 0 : index
    %c0_52 = arith.constant 0 : index
    %115 = vector.load %arg8[%c0_49, %c0_50, %c0_51, %c0_52] : memref<1x4x8x8xf32, #tpu.memory_space<vmem>>, vector<1x4x8x8xf32>
    %116 = vector.shape_cast %115 : vector<1x4x8x8xf32> to vector<4x8x8xf32>
    %117 = vector.shape_cast %114 : vector<4x8x8xf32> to vector<1x4x8x8xf32>
    tpu.vector_store %arg8[%c0_49, %c0_50, %c0_51, %c0_52], %117 {strides = array<i32>} : memref<1x4x8x8xf32, #tpu.memory_space<vmem>>, vector<1x4x8x8xf32>,
    return
  }
  func.func @transform_0(%arg0: i32, %arg1: i32) -> (i32, i32, i32) {
    %c0_i32 = arith.constant 0 : i32
    %c0_i32_0 = arith.constant 0 : i32
    return %arg0, %arg1, %c0_i32 : i32, i32, i32
  }
  func.func @transform_1(%arg0: i32, %arg1: i32) -> (i32, i32, i32) {
    %c0_i32 = arith.constant 0 : i32
    %c0_i32_0 = arith.constant 0 : i32
    return %arg0, %arg1, %c0_i32 : i32, i32, i32
  }
  func.func @transform_2(%arg0: i32, %arg1: i32) -> (i32, i32) {
    %c0_i32 = arith.constant 0 : i32
    %c0_i32_0 = arith.constant 0 : i32
    %c0_i32_1 = arith.constant 0 : i32
    return %c0_i32, %c0_i32_0 : i32, i32
  }
  func.func @transform_3(%arg0: i32, %arg1: i32) -> (i32, i32) {
    %c0_i32 = arith.constant 0 : i32
    %c0_i32_0 = arith.constant 0 : i32
    %c0_i32_1 = arith.constant 0 : i32
    return %c0_i32, %c0_i32_0 : i32, i32
  }
  func.func @transform_4(%arg0: i32, %arg1: i32) -> (i32, i32) {
    %c0_i32 = arith.constant 0 : i32
    %c0_i32_0 = arith.constant 0 : i32
    %c0_i32_1 = arith.constant 0 : i32
    return %c0_i32, %c0_i32_0 : i32, i32
  }
  func.func @transform_5(%arg0: i32, %arg1: i32) -> (i32, i32, i32) {
    %c0_i32 = arith.constant 0 : i32
    %c0_i32_0 = arith.constant 0 : i32
    return %arg0, %arg1, %c0_i32 : i32, i32, i32
  }
  func.func @transform_6(%arg0: i32, %arg1: i32) -> (i32, i32, i32, i32) {
    %c0_i32 = arith.constant 0 : i32
    %c0_i32_0 = arith.constant 0 : i32
    %c0_i32_1 = arith.constant 0 : i32
    %c0_i32_2 = arith.constant 0 : i32
    return %arg0, %c0_i32, %c0_i32_0, %c0_i32_1 : i32, i32, i32, i32
  }
}

module attributes {stable_mosaic.version = 11 : i64} {
  func.func @_swiglu_matmul_kernel(%arg0: i32, %arg1: i32, %arg2: i32, %arg3: memref<32x256xbf16, #tpu.memory_space<vmem>>, %arg4: memref<256x256xbf16, #tpu.memory_space<vmem>>, %arg5: memref<256x256xbf16, #tpu.memory_space<vmem>>, %arg6: memref<32x256xbf16, #tpu.memory_space<vmem>>, %arg7: memref<32x256xf32, #tpu.memory_space<vmem>>, %arg8: memref<32x256xf32, #tpu.memory_space<vmem>>) attributes {dimension_semantics = [#tpu.dimension_semantics<parallel>, #tpu.dimension_semantics<parallel>, #tpu.dimension_semantics<arbitrary>], iteration_bounds = array<i64: 1, 1, 1>, scalar_prefetch = 0 : i64, scratch_operands = 2 : i64, tpu.core_type = #tpu.core_type<tc>, window_params = [{transform_indices = @transform_0, window_bounds = array<i64: 32, 256>}, {transform_indices = @transform_1, window_bounds = array<i64: 256, 256>}, {transform_indices = @transform_2, window_bounds = array<i64: 256, 256>}, {transform_indices = @transform_3, window_bounds = array<i64: 32, 256>}]} {
    %c0_i32 = arith.constant 0 : i32
    %0 = arith.cmpi eq, %arg2, %c0_i32 : i32
    %1 = arith.extui %0 : i1 to i32
    %c0_i32_0 = arith.constant 0 : i32
    %2 = arith.cmpi ne, %1, %c0_i32_0 : i32
    scf.if %2 {
      %cst_17 = arith.constant 0.000000e+00 : f32
      %17 = vector.broadcast %cst_17 : f32 to vector<32x256xf32>
      %c0_18 = arith.constant 0 : index
      %c0_19 = arith.constant 0 : index
      %18 = vector.load %arg7[%c0_18, %c0_19] : memref<32x256xf32, #tpu.memory_space<vmem>>, vector<32x256xf32>
      tpu.vector_store %arg7[%c0_18, %c0_19], %17 {strides = array<i32>} : memref<32x256xf32, #tpu.memory_space<vmem>>, vector<32x256xf32>,
      %cst_20 = arith.constant 0.000000e+00 : f32
      %19 = vector.broadcast %cst_20 : f32 to vector<32x256xf32>
      %c0_21 = arith.constant 0 : index
      %c0_22 = arith.constant 0 : index
      %20 = vector.load %arg8[%c0_21, %c0_22] : memref<32x256xf32, #tpu.memory_space<vmem>>, vector<32x256xf32>
      tpu.vector_store %arg8[%c0_21, %c0_22], %19 {strides = array<i32>} : memref<32x256xf32, #tpu.memory_space<vmem>>, vector<32x256xf32>,
    } else {
    }
    %c0 = arith.constant 0 : index
    %c0_1 = arith.constant 0 : index
    %3 = vector.load %arg3[%c0, %c0_1] : memref<32x256xbf16, #tpu.memory_space<vmem>>, vector<32x256xbf16>
    %c0_2 = arith.constant 0 : index
    %c0_3 = arith.constant 0 : index
    %4 = vector.load %arg7[%c0_2, %c0_3] : memref<32x256xf32, #tpu.memory_space<vmem>>, vector<32x256xf32>
    %c0_4 = arith.constant 0 : index
    %c0_5 = arith.constant 0 : index
    %5 = vector.load %arg4[%c0_4, %c0_5] : memref<256x256xbf16, #tpu.memory_space<vmem>>, vector<256x256xbf16>
    %cst = arith.constant dense<0.000000e+00> : vector<32x256xf32>
    %6 = tpu.matmul %3, %5, %cst {dimension_numbers = #tpu.dot_dimension_numbers<[1], [0], [0], [1], [0, 0, 1, 1], [], []>} : vector<32x256xbf16>, vector<256x256xbf16>, vector<32x256xf32> -> vector<32x256xf32>
    %7 = arith.addf %4, %6 : vector<32x256xf32>
    %c0_6 = arith.constant 0 : index
    %c0_7 = arith.constant 0 : index
    %8 = vector.load %arg7[%c0_6, %c0_7] : memref<32x256xf32, #tpu.memory_space<vmem>>, vector<32x256xf32>
    tpu.vector_store %arg7[%c0_6, %c0_7], %7 {strides = array<i32>} : memref<32x256xf32, #tpu.memory_space<vmem>>, vector<32x256xf32>,
    %c0_8 = arith.constant 0 : index
    %c0_9 = arith.constant 0 : index
    %9 = vector.load %arg8[%c0_8, %c0_9] : memref<32x256xf32, #tpu.memory_space<vmem>>, vector<32x256xf32>
    %c0_10 = arith.constant 0 : index
    %c0_11 = arith.constant 0 : index
    %10 = vector.load %arg5[%c0_10, %c0_11] : memref<256x256xbf16, #tpu.memory_space<vmem>>, vector<256x256xbf16>
    %cst_12 = arith.constant dense<0.000000e+00> : vector<32x256xf32>
    %11 = tpu.matmul %3, %10, %cst_12 {dimension_numbers = #tpu.dot_dimension_numbers<[1], [0], [0], [1], [0, 0, 1, 1], [], []>} : vector<32x256xbf16>, vector<256x256xbf16>, vector<32x256xf32> -> vector<32x256xf32>
    %12 = arith.addf %9, %11 : vector<32x256xf32>
    %c0_13 = arith.constant 0 : index
    %c0_14 = arith.constant 0 : index
    %13 = vector.load %arg8[%c0_13, %c0_14] : memref<32x256xf32, #tpu.memory_space<vmem>>, vector<32x256xf32>
    tpu.vector_store %arg8[%c0_13, %c0_14], %12 {strides = array<i32>} : memref<32x256xf32, #tpu.memory_space<vmem>>, vector<32x256xf32>,
    %c0_i32_15 = arith.constant 0 : i32
    %14 = arith.cmpi eq, %arg2, %c0_i32_15 : i32
    %15 = arith.extui %14 : i1 to i32
    %c0_i32_16 = arith.constant 0 : i32
    %16 = arith.cmpi ne, %15, %c0_i32_16 : i32
    scf.if %16 {
      %c0_17 = arith.constant 0 : index
      %c0_18 = arith.constant 0 : index
      %17 = vector.load %arg7[%c0_17, %c0_18] : memref<32x256xf32, #tpu.memory_space<vmem>>, vector<32x256xf32>
      %18 = arith.negf %17 : vector<32x256xf32>
      %19 = math.exp %18 : vector<32x256xf32>
      %cst_19 = arith.constant 1.000000e+00 : f32
      %20 = vector.broadcast %cst_19 : f32 to vector<32x256xf32>
      %21 = arith.addf %20, %19 : vector<32x256xf32>
      %22 = arith.divf %20, %21 : vector<32x256xf32>
      %23 = arith.mulf %17, %22 : vector<32x256xf32>
      %c0_20 = arith.constant 0 : index
      %c0_21 = arith.constant 0 : index
      %24 = vector.load %arg8[%c0_20, %c0_21] : memref<32x256xf32, #tpu.memory_space<vmem>>, vector<32x256xf32>
      %25 = arith.mulf %23, %24 : vector<32x256xf32>
      %26 = arith.truncf %25 : vector<32x256xf32> to vector<32x256xbf16>
      %c0_22 = arith.constant 0 : index
      %c0_23 = arith.constant 0 : index
      %27 = vector.load %arg6[%c0_22, %c0_23] : memref<32x256xbf16, #tpu.memory_space<vmem>>, vector<32x256xbf16>
      tpu.vector_store %arg6[%c0_22, %c0_23], %26 {strides = array<i32>} : memref<32x256xbf16, #tpu.memory_space<vmem>>, vector<32x256xbf16>,
    } else {
    }
    return
  }
  func.func @transform_0(%arg0: i32, %arg1: i32, %arg2: i32) -> (i32, i32) {
    %c0_i32 = arith.constant 0 : i32
    return %arg0, %arg2 : i32, i32
  }
  func.func @transform_1(%arg0: i32, %arg1: i32, %arg2: i32) -> (i32, i32) {
    %c0_i32 = arith.constant 0 : i32
    return %arg2, %arg1 : i32, i32
  }
  func.func @transform_2(%arg0: i32, %arg1: i32, %arg2: i32) -> (i32, i32) {
    %c0_i32 = arith.constant 0 : i32
    return %arg2, %arg1 : i32, i32
  }
  func.func @transform_3(%arg0: i32, %arg1: i32, %arg2: i32) -> (i32, i32) {
    %c0_i32 = arith.constant 0 : i32
    return %arg0, %arg1 : i32, i32
  }
}

module attributes {stable_mosaic.version = 11 : i64} {
  func.func @_matmul_kernel(%arg0: i32, %arg1: i32, %arg2: i32, %arg3: memref<32x32xbf16, #tpu.memory_space<vmem>>, %arg4: memref<32x64xbf16, #tpu.memory_space<vmem>>, %arg5: memref<32x64xf32, #tpu.memory_space<vmem>>, %arg6: memref<32x64xf32, #tpu.memory_space<vmem>>) attributes {dimension_semantics = [#tpu.dimension_semantics<parallel>, #tpu.dimension_semantics<parallel>, #tpu.dimension_semantics<arbitrary>], iteration_bounds = array<i64: 1, 1, 1>, scalar_prefetch = 0 : i64, scratch_operands = 1 : i64, tpu.core_type = #tpu.core_type<tc>, window_params = [{transform_indices = @transform_0, window_bounds = array<i64: 32, 32>}, {transform_indices = @transform_1, window_bounds = array<i64: 32, 64>}, {transform_indices = @transform_2, window_bounds = array<i64: 32, 64>}]} {
    %c0_i32 = arith.constant 0 : i32
    %0 = arith.cmpi eq, %arg2, %c0_i32 : i32
    %1 = arith.extui %0 : i1 to i32
    %c0_i32_0 = arith.constant 0 : i32
    %2 = arith.cmpi ne, %1, %c0_i32_0 : i32
    scf.if %2 {
      %cst_10 = arith.constant 0.000000e+00 : f32
      %12 = vector.broadcast %cst_10 : f32 to vector<32x64xf32>
      %c0_11 = arith.constant 0 : index
      %c0_12 = arith.constant 0 : index
      %13 = vector.load %arg6[%c0_11, %c0_12] : memref<32x64xf32, #tpu.memory_space<vmem>>, vector<32x64xf32>
      tpu.vector_store %arg6[%c0_11, %c0_12], %12 {strides = array<i32>} : memref<32x64xf32, #tpu.memory_space<vmem>>, vector<32x64xf32>,
    } else {
    }
    %c0 = arith.constant 0 : index
    %c0_1 = arith.constant 0 : index
    %3 = vector.load %arg6[%c0, %c0_1] : memref<32x64xf32, #tpu.memory_space<vmem>>, vector<32x64xf32>
    %c0_2 = arith.constant 0 : index
    %c0_3 = arith.constant 0 : index
    %4 = vector.load %arg3[%c0_2, %c0_3] : memref<32x32xbf16, #tpu.memory_space<vmem>>, vector<32x32xbf16>
    %c0_4 = arith.constant 0 : index
    %c0_5 = arith.constant 0 : index
    %5 = vector.load %arg4[%c0_4, %c0_5] : memref<32x64xbf16, #tpu.memory_space<vmem>>, vector<32x64xbf16>
    %cst = arith.constant dense<0.000000e+00> : vector<32x64xf32>
    %6 = tpu.matmul %4, %5, %cst {dimension_numbers = #tpu.dot_dimension_numbers<[1], [0], [0], [1], [0, 0, 1, 1], [], []>} : vector<32x32xbf16>, vector<32x64xbf16>, vector<32x64xf32> -> vector<32x64xf32>
    %7 = arith.addf %3, %6 : vector<32x64xf32>
    %c0_6 = arith.constant 0 : index
    %c0_7 = arith.constant 0 : index
    %8 = vector.load %arg6[%c0_6, %c0_7] : memref<32x64xf32, #tpu.memory_space<vmem>>, vector<32x64xf32>
    tpu.vector_store %arg6[%c0_6, %c0_7], %7 {strides = array<i32>} : memref<32x64xf32, #tpu.memory_space<vmem>>, vector<32x64xf32>,
    %c0_i32_8 = arith.constant 0 : i32
    %9 = arith.cmpi eq, %arg2, %c0_i32_8 : i32
    %10 = arith.extui %9 : i1 to i32
    %c0_i32_9 = arith.constant 0 : i32
    %11 = arith.cmpi ne, %10, %c0_i32_9 : i32
    scf.if %11 {
      %c0_10 = arith.constant 0 : index
      %c0_11 = arith.constant 0 : index
      %12 = vector.load %arg6[%c0_10, %c0_11] : memref<32x64xf32, #tpu.memory_space<vmem>>, vector<32x64xf32>
      %c0_12 = arith.constant 0 : index
      %c0_13 = arith.constant 0 : index
      %13 = vector.load %arg5[%c0_12, %c0_13] : memref<32x64xf32, #tpu.memory_space<vmem>>, vector<32x64xf32>
      tpu.vector_store %arg5[%c0_12, %c0_13], %12 {strides = array<i32>} : memref<32x64xf32, #tpu.memory_space<vmem>>, vector<32x64xf32>,
    } else {
    }
    return
  }
  func.func @transform_0(%arg0: i32, %arg1: i32, %arg2: i32) -> (i32, i32) {
    %c0_i32 = arith.constant 0 : i32
    return %arg0, %arg2 : i32, i32
  }
  func.func @transform_1(%arg0: i32, %arg1: i32, %arg2: i32) -> (i32, i32) {
    %c0_i32 = arith.constant 0 : i32
    return %arg2, %arg1 : i32, i32
  }
  func.func @transform_2(%arg0: i32, %arg1: i32, %arg2: i32) -> (i32, i32) {
    %c0_i32 = arith.constant 0 : i32
    return %arg0, %arg1 : i32, i32
  }
}

module attributes {stable_mosaic.version = 11 : i64} {
  func.func @_matmul_kernel(%arg0: i32, %arg1: i32, %arg2: i32, %arg3: memref<32x256xbf16, #tpu.memory_space<vmem>>, %arg4: memref<256x32xbf16, #tpu.memory_space<vmem>>, %arg5: memref<32x32xf32, #tpu.memory_space<vmem>>, %arg6: memref<32x32xf32, #tpu.memory_space<vmem>>) attributes {dimension_semantics = [#tpu.dimension_semantics<parallel>, #tpu.dimension_semantics<parallel>, #tpu.dimension_semantics<arbitrary>], iteration_bounds = array<i64: 1, 1, 1>, scalar_prefetch = 0 : i64, scratch_operands = 1 : i64, tpu.core_type = #tpu.core_type<tc>, window_params = [{transform_indices = @transform_0, window_bounds = array<i64: 32, 256>}, {transform_indices = @transform_1, window_bounds = array<i64: 256, 32>}, {transform_indices = @transform_2, window_bounds = array<i64: 32, 32>}]} {
    %c0_i32 = arith.constant 0 : i32
    %0 = arith.cmpi eq, %arg2, %c0_i32 : i32
    %1 = arith.extui %0 : i1 to i32
    %c0_i32_0 = arith.constant 0 : i32
    %2 = arith.cmpi ne, %1, %c0_i32_0 : i32
    scf.if %2 {
      %cst_10 = arith.constant 0.000000e+00 : f32
      %12 = vector.broadcast %cst_10 : f32 to vector<32x32xf32>
      %c0_11 = arith.constant 0 : index
      %c0_12 = arith.constant 0 : index
      %13 = vector.load %arg6[%c0_11, %c0_12] : memref<32x32xf32, #tpu.memory_space<vmem>>, vector<32x32xf32>
      tpu.vector_store %arg6[%c0_11, %c0_12], %12 {strides = array<i32>} : memref<32x32xf32, #tpu.memory_space<vmem>>, vector<32x32xf32>,
    } else {
    }
    %c0 = arith.constant 0 : index
    %c0_1 = arith.constant 0 : index
    %3 = vector.load %arg6[%c0, %c0_1] : memref<32x32xf32, #tpu.memory_space<vmem>>, vector<32x32xf32>
    %c0_2 = arith.constant 0 : index
    %c0_3 = arith.constant 0 : index
    %4 = vector.load %arg3[%c0_2, %c0_3] : memref<32x256xbf16, #tpu.memory_space<vmem>>, vector<32x256xbf16>
    %c0_4 = arith.constant 0 : index
    %c0_5 = arith.constant 0 : index
    %5 = vector.load %arg4[%c0_4, %c0_5] : memref<256x32xbf16, #tpu.memory_space<vmem>>, vector<256x32xbf16>
    %cst = arith.constant dense<0.000000e+00> : vector<32x32xf32>
    %6 = tpu.matmul %4, %5, %cst {dimension_numbers = #tpu.dot_dimension_numbers<[1], [0], [0], [1], [0, 0, 1, 1], [], []>} : vector<32x256xbf16>, vector<256x32xbf16>, vector<32x32xf32> -> vector<32x32xf32>
    %7 = arith.addf %3, %6 : vector<32x32xf32>
    %c0_6 = arith.constant 0 : index
    %c0_7 = arith.constant 0 : index
    %8 = vector.load %arg6[%c0_6, %c0_7] : memref<32x32xf32, #tpu.memory_space<vmem>>, vector<32x32xf32>
    tpu.vector_store %arg6[%c0_6, %c0_7], %7 {strides = array<i32>} : memref<32x32xf32, #tpu.memory_space<vmem>>, vector<32x32xf32>,
    %c0_i32_8 = arith.constant 0 : i32
    %9 = arith.cmpi eq, %arg2, %c0_i32_8 : i32
    %10 = arith.extui %9 : i1 to i32
    %c0_i32_9 = arith.constant 0 : i32
    %11 = arith.cmpi ne, %10, %c0_i32_9 : i32
    scf.if %11 {
      %c0_10 = arith.constant 0 : index
      %c0_11 = arith.constant 0 : index
      %12 = vector.load %arg6[%c0_10, %c0_11] : memref<32x32xf32, #tpu.memory_space<vmem>>, vector<32x32xf32>
      %c0_12 = arith.constant 0 : index
      %c0_13 = arith.constant 0 : index
      %13 = vector.load %arg5[%c0_12, %c0_13] : memref<32x32xf32, #tpu.memory_space<vmem>>, vector<32x32xf32>
      tpu.vector_store %arg5[%c0_12, %c0_13], %12 {strides = array<i32>} : memref<32x32xf32, #tpu.memory_space<vmem>>, vector<32x32xf32>,
    } else {
    }
    return
  }
  func.func @transform_0(%arg0: i32, %arg1: i32, %arg2: i32) -> (i32, i32) {
    %c0_i32 = arith.constant 0 : i32
    return %arg0, %arg2 : i32, i32
  }
  func.func @transform_1(%arg0: i32, %arg1: i32, %arg2: i32) -> (i32, i32) {
    %c0_i32 = arith.constant 0 : i32
    return %arg2, %arg1 : i32, i32
  }
  func.func @transform_2(%arg0: i32, %arg1: i32, %arg2: i32) -> (i32, i32) {
    %c0_i32 = arith.constant 0 : i32
    return %arg0, %arg1 : i32, i32
  }
}

</mosaic_0001>

<bundles_post_ra>
// kernel: model_forward.22
= control target key start
LH: loop header
LB: loop body
LE: loop exit
PB: predicated region body
PF: predicated region fallthrough
CT: control target
= control target key end

     0   :  { %vm19_vm0 = vcmask 261120   ;;  %v119_v12 = vmov 32.0   ;;  %s190_s0 = inlined_call_operand.vmem [shape: f32[32,32], index: 0, kind: input, shape index: {}]   ;;  %s191_s1 = inlined_call_operand.vmem [shape: f32[1,32], index: 1, kind: input, shape index: {}]   ;;  %s192_s2 = inlined_call_operand.vmem [shape: f32[32,32], index: 2, kind: output, shape index: {}]  }
   0x1   :  { %v138_v0 = vld [vmem:[%s190_s0 + $0x10] sm:$0xff]  ;;  %v143_v1 = vld [vmem:[%s190_s0] sm:$0xff]  ;;  %v152_v4 = vld [vmem:[%s190_s0 + $0x18] sm:$0xff]  ;;  %109 = vrcp.f32 %v119_v12 }
   0x2   :  { %v17_v2 = vmul.f32 %v138_v0, %v138_v0  ;;  %v15_v3 = vmul.f32 %v143_v1, %v143_v1  ;;  %v157_v5 = vld [vmem:[%s190_s0 + $0x8] sm:$0xff]  ;;  %v18_v8 = vmul.f32 %v152_v4, %v152_v4  ;;  %v108_v45 = vld [vmem:[%s191_s1] ss:$0 sm:$0xff] }
   0x3   :  { %v16_v9 = vmul.f32 %v157_v5, %v157_v5 }
   0x4   :  { %v26_v6 = vsel %vm19_vm0, %v17_v2, 0.0  ;;  %v20_v7 = vsel %vm19_vm0, %v15_v3, 0.0  ;;  %v29_v10 = vsel %vm19_vm0, %v18_v8, 0.0 }
   0x5   :  { %27 = vadd.xlane.f32.xlu1 %v26_v6  ;;  %21 = vadd.xlane.f32.xlu0 %v20_v7  ;;  %v23_v11 = vsel %vm19_vm0, %v16_v9, 0.0 }
   0x7   :  { %v110_v13 = vpop.eup %109 }
   0x8   :  { %v33_v14 = vmul.f32 32.0, %v110_v13  ;;  %vm37_vm1 = vweird.f32 %v110_v13 }
   0xa   :  { %v34_v15 = vsub.f32 1.0, %v33_v14 }
   0xc   :  { %v35_v16 = vmul.f32 %v110_v13, %v34_v15 }
   0xd   :  { %30 = vadd.xlane.f32.xlu1 %v29_v10  ;;  %24 = vadd.xlane.f32.xlu0 %v23_v11 }
   0xe   :  { %v36_v17 = vadd.f32 %v110_v13, %v35_v16 }
  0x10   :  { %v38_v18 = vsel %vm37_vm1, %v110_v13, %v36_v17 }
  0x78   :  { %v28_v19 = vpop.xlane.xlu1 %27  ;;  %v22_v20 = vpop.xlane.xlu0 %21 }
  0x79   :  { %v41_v21 = vmul.f32 %v38_v18, %v28_v19  ;;  %v39_v22 = vmul.f32 %v38_v18, %v22_v20 }
  0x7b   :  { %v45_v23 = vadd.f32 1e-06, %v41_v21  ;;  %v43_v24 = vadd.f32 1e-06, %v39_v22 }
  0x7d   :  { %111 = vrsqrt.f32 %v45_v23  ;;  %vm73_vm4 = vweird.f32 %v45_v23  ;;  %vm53_vm6 = vweird.f32 %v43_v24 }
  0x7e   :  { %113 = vrsqrt.f32 %v43_v24 }
  0x80   :  { %v31_v25 = vpop.xlane.xlu1 %30  ;;  %v25_v26 = vpop.xlane.xlu0 %24 }
  0x81   :  { %v42_v27 = vmul.f32 %v38_v18, %v31_v25  ;;  %v40_v28 = vmul.f32 %v38_v18, %v25_v26 }
  0x83   :  { %v112_v29 = vpop.eup %111  ;;  %v46_v30 = vadd.f32 1e-06, %v42_v27  ;;  %v44_v31 = vadd.f32 1e-06, %v40_v28 }
  0x84   :  { %v114_v32 = vpop.eup %113  ;;  %v68_v33 = vmul.f32 %v112_v29, %v45_v23  ;;  %vm74_vm2 = vweird.f32 %v112_v29 }
  0x85   :  { %v48_v34 = vmul.f32 %v114_v32, %v43_v24  ;;  %115 = vrsqrt.f32 %v46_v30  ;;  %vm54_vm3 = vweird.f32 %v114_v32  ;;  %vm75_vm5 = vmor %vm73_vm4, %vm74_vm2  ;;  %vm83_vm10 = vweird.f32 %v46_v30 }
  0x86   :  { %v69_v35 = vmul.f32 %v112_v29, %v68_v33  ;;  %117 = vrsqrt.f32 %v44_v31  ;;  %vm55_vm7 = vmor %vm53_vm6, %vm54_vm3  ;;  %vm63_vm12 = vweird.f32 %v44_v31 }
  0x87   :  { %v49_v36 = vmul.f32 %v114_v32, %v48_v34 }
  0x88   :  { %v70_v37 = vmul.f32 0.5, %v69_v35 }
  0x89   :  { %v50_v38 = vmul.f32 0.5, %v49_v36 }
  0x8a   :  { %v71_v39 = vsub.f32 1.5, %v70_v37 }
  0x8b   :  { %v116_v40 = vpop.eup %115  ;;  %v51_v41 = vsub.f32 1.5, %v50_v38 }
  0x8c   :  { %v118_v42 = vpop.eup %117  ;;  %v72_v43 = vmul.f32 %v112_v29, %v71_v39  ;;  %v78_v44 = vmul.f32 %v116_v40, %v46_v30  ;;  %vm84_vm8 = vweird.f32 %v116_v40 }
  0x8d   :  { %v52_v46 = vmul.f32 %v114_v32, %v51_v41  ;;  %v58_v47 = vmul.f32 %v118_v42, %v44_v31  ;;  %vm64_vm9 = vweird.f32 %v118_v42  ;;  %vm85_vm11 = vmor %vm83_vm10, %vm84_vm8 }
  0x8e   :  { %v76_v48 = vsel %vm75_vm5, %v112_v29, %v72_v43  ;;  %v79_v49 = vmul.f32 %v116_v40, %v78_v44  ;;  %vm65_vm13 = vmor %vm63_vm12, %vm64_vm9 }
  0x8f   :  { %v89_v50 = vmul.f32 %v76_v48, %v138_v0  ;;  %v56_v51 = vsel %vm55_vm7, %v114_v32, %v52_v46  ;;  %v59_v52 = vmul.f32 %v118_v42, %v58_v47 }
  0x90   :  { %v87_v53 = vmul.f32 %v56_v51, %v143_v1  ;;  %v80_v54 = vmul.f32 0.5, %v79_v49 }
  0x91   :  { %v97_v55 = vmul.f32 %v108_v45, %v89_v50  ;;  %v60_v56 = vmul.f32 0.5, %v59_v52 }
  0x92   :  { %v95_v57 = vmul.f32 %v108_v45, %v87_v53  ;;  %v81_v58 = vsub.f32 1.5, %v80_v54 }
  0x93   :  { %101 = vst.msk [vmem:[%s192_s2 + $0x10] sm:$0xff] %vm19_vm0, %v97_v55  ;;  %v61_v59 = vsub.f32 1.5, %v60_v56 }
  0x94   :  { %99 = vst.msk [vmem:[%s192_s2] sm:$0xff] %vm19_vm0, %v95_v57  ;;  %v82_v60 = vmul.f32 %v116_v40, %v81_v58 }
  0x95   :  { %v62_v61 = vmul.f32 %v118_v42, %v61_v59 }
  0x96   :  { %v86_v62 = vsel %vm85_vm11, %v116_v40, %v82_v60 }
  0x97   :  { %v90_v63 = vmul.f32 %v86_v62, %v152_v4  ;;  %v66_v0 = vsel %vm65_vm13, %v118_v42, %v62_v61 }
  0x98   :  { %v88_v1 = vmul.f32 %v66_v0, %v157_v5 }
  0x99   :  { %v98_v2 = vmul.f32 %v108_v45, %v90_v63 }
  0x9a   :  { %v96_v3 = vmul.f32 %v108_v45, %v88_v1 }
  0x9b   :  { %102 = vst.msk [vmem:[%s192_s2 + $0x18] sm:$0xff] %vm19_vm0, %v98_v2 }
  0x9c   :  { %100 = vst.msk [vmem:[%s192_s2 + $0x8] sm:$0xff] %vm19_vm0, %v96_v3 }

// kernel: model_forward.25
= control target key start
LH: loop header
LB: loop body
LE: loop exit
PB: predicated region body
PF: predicated region fallthrough
CT: control target
= control target key end

     0   :  { %vm16_vm0 = vcmask 31744   ;;  %v130_v1 = vmov 0.0   ;;  %vm55_vm1 = vcmask 261120   ;;  %s182_s1 = inlined_call_operand.vmem [shape: bf16[32,4], index: 1, kind: input, shape index: {}]   ;;  %s183_s0 = inlined_call_operand.vmem [shape: bf16[32,32], index: 0, kind: input, shape index: {}]   ;;  %s184_s2 = inlined_call_operand.vmem [shape: f32[32,4], index: 2, kind: output, shape index: {}]  }
   0x1   :  { %v126_v0 = vld [vmem:[%s182_s1 + $0x8] sm:$0xff]  ;;  %17 = vst.msk [vmem:[#allocation2] sm:$0xff] %vm16_vm0, %v130_v1  ;;  %v125_v2 = vld [vmem:[%s182_s1] sm:$0xff] }
   0x2   :  { %18 = vst.msk [vmem:[#allocation2 + $0x8] sm:$0xff] %vm16_vm0, %v130_v1  ;;  %68 = vmatpush.bf16.msra.mxu0 %v126_v0  ;;  %127 = vmatpush.bf16.msra.mxu1 %v126_v0  ;;  %v123_v3 = vld [vmem:[%s183_s0] sm:$0xff]  ;;  %v124_v4 = vld [vmem:[%s183_s0 + $0x8] sm:$0xff] }
   0x3   :  { %19 = vst.msk [vmem:[#allocation2 + $0x10] sm:$0xff] %vm16_vm0, %v130_v1 }
   0x4   :  { %20 = vst.msk [vmem:[#allocation2 + $0x18] sm:$0xff] %vm16_vm0, %v130_v1 }
   0x6   :  { %69 = vmatpush.bf16.msra.mxu0 %v125_v2  ;;  %128 = vmatpush.bf16.msra.mxu1 %v125_v2 }
   0x8   :  { %v21_v5 = vld [vmem:[#allocation2] sm:$0xff] }
   0x9   :  { %121 = vmatmul.msk.bf16.vlgmr.msra.gmra.mxu0 %vm55_vm1, %v123_v3  ;;  %122 = vmatmul.msk.bf16.vlgmr.msra.gmra.mxu1 %vm55_vm1, %v124_v4  ;;  %v22_v11 = vld [vmem:[#allocation2 + $0x8] sm:$0xff] }
   0xa   :  { %v23_v6 = vld [vmem:[#allocation2 + $0x10] sm:$0xff] }
   0xb   :  { %v24_v12 = vld [vmem:[#allocation2 + $0x18] sm:$0xff] }
  0x86   :  { %v71_v7 = vpop.f32.mrf.mxu0  ;;  %v76_v8 = vpop.f32.mrf.mxu1 }
  0x87   :  { %v81_v9 = vadd.f32 %v71_v7, %v21_v5  ;;  %v83_v10 = vadd.f32 %v76_v8, %v23_v6 }
  0x89   :  { %86 = vst.msk [vmem:[#allocation2] sm:$0xff] %vm16_vm0, %v81_v9 }
  0x8a   :  { %88 = vst.msk [vmem:[#allocation2 + $0x10] sm:$0xff] %vm16_vm0, %v83_v10 }
  0x8e   :  { %v73_v13 = vpop.f32.mrf.mxu0  ;;  %v78_v14 = vpop.f32.mrf.mxu1 }
  0x8f   :  { %v82_v15 = vadd.f32 %v73_v13, %v22_v11  ;;  %v84_v17 = vadd.f32 %v78_v14, %v24_v12 }
  0x90   :  { %v93_v16 = vld [vmem:[#allocation2] sm:$0xff] }
  0x91   :  { %97 = vst.msk [vmem:[%s184_s2] sm:$0xff] %vm16_vm0, %v93_v16  ;;  %v95_v18 = vld [vmem:[#allocation2 + $0x10] sm:$0xff] }
  0x92   :  { %99 = vst.msk [vmem:[%s184_s2 + $0x10] sm:$0xff] %vm16_vm0, %v95_v18 }
  0x93   :  { %87 = vst.msk [vmem:[#allocation2 + $0x8] sm:$0xff] %vm16_vm0, %v82_v15 }
  0x94   :  { %89 = vst.msk [vmem:[#allocation2 + $0x18] sm:$0xff] %vm16_vm0, %v84_v17 }
  0x9a   :  { %v94_v19 = vld [vmem:[#allocation2 + $0x8] sm:$0xff] }
  0x9b   :  { %98 = vst.msk [vmem:[%s184_s2 + $0x8] sm:$0xff] %vm16_vm0, %v94_v19  ;;  %v96_v20 = vld [vmem:[#allocation2 + $0x18] sm:$0xff] }
  0x9c   :  { %100 = vst.msk [vmem:[%s184_s2 + $0x18] sm:$0xff] %vm16_vm0, %v96_v20 }

// kernel: model_forward.23
= control target key start
LH: loop header
LB: loop body
LE: loop exit
PB: predicated region body
PF: predicated region fallthrough
CT: control target
= control target key end

     0   :  { %vm16_vm0 = vcmask 785408   ;;  %v135_v1 = vmov 0.0   ;;  %vm55_vm1 = vcmask 261120   ;;  %vm101_vm2 = vcmask 781312   ;;  %s183_s1 = inlined_call_operand.vmem [shape: bf16[32,96], index: 1, kind: input, shape index: {}]   ;;  %s184_s0 = inlined_call_operand.vmem [shape: bf16[32,32], index: 0, kind: input, shape index: {}]   ;;  %s185_s2 = inlined_call_operand.vmem [shape: bf16[32,96], index: 2, kind: output, shape index: {}]  }
   0x1   :  { %v131_v0 = vld [vmem:[%s183_s1 + $0x8] sm:$0xff]  ;;  %17 = vst.msk [vmem:[#allocation2] sm:$0xff] %vm16_vm0, %v135_v1  ;;  %v130_v2 = vld [vmem:[%s183_s1] sm:$0xff] }
   0x2   :  { %18 = vst.msk [vmem:[#allocation2 + $0x8] sm:$0xff] %vm16_vm0, %v135_v1  ;;  %68 = vmatpush.bf16.msra.mxu0 %v131_v0  ;;  %132 = vmatpush.bf16.msra.mxu1 %v131_v0  ;;  %v128_v3 = vld [vmem:[%s184_s0] sm:$0xff]  ;;  %v129_v4 = vld [vmem:[%s184_s0 + $0x8] sm:$0xff] }
   0x3   :  { %19 = vst.msk [vmem:[#allocation2 + $0x10] sm:$0xff] %vm16_vm0, %v135_v1 }
   0x4   :  { %20 = vst.msk [vmem:[#allocation2 + $0x18] sm:$0xff] %vm16_vm0, %v135_v1 }
   0x6   :  { %69 = vmatpush.bf16.msra.mxu0 %v130_v2  ;;  %133 = vmatpush.bf16.msra.mxu1 %v130_v2 }
   0x8   :  { %v21_v5 = vld [vmem:[#allocation2] sm:$0xff] }
   0x9   :  { %126 = vmatmul.msk.bf16.vlgmr.msra.gmra.mxu0 %vm55_vm1, %v128_v3  ;;  %127 = vmatmul.msk.bf16.vlgmr.msra.gmra.mxu1 %vm55_vm1, %v129_v4  ;;  %v22_v11 = vld [vmem:[#allocation2 + $0x8] sm:$0xff] }
   0xa   :  { %v23_v6 = vld [vmem:[#allocation2 + $0x10] sm:$0xff] }
   0xb   :  { %v24_v12 = vld [vmem:[#allocation2 + $0x18] sm:$0xff] }
  0x86   :  { %v71_v7 = vpop.f32.mrf.mxu0  ;;  %v76_v8 = vpop.f32.mrf.mxu1 }
  0x87   :  { %v81_v9 = vadd.f32 %v71_v7, %v21_v5  ;;  %v83_v10 = vadd.f32 %v76_v8, %v23_v6 }
  0x89   :  { %86 = vst.msk [vmem:[#allocation2] sm:$0xff] %vm16_vm0, %v81_v9 }
  0x8a   :  { %88 = vst.msk [vmem:[#allocation2 + $0x10] sm:$0xff] %vm16_vm0, %v83_v10 }
  0x8e   :  { %v73_v13 = vpop.f32.mrf.mxu0  ;;  %v78_v14 = vpop.f32.mrf.mxu1 }
  0x8f   :  { %v82_v15 = vadd.f32 %v73_v13, %v22_v11  ;;  %v84_v16 = vadd.f32 %v78_v14, %v24_v12 }
  0x90   :  { %v93_v17 = vld [vmem:[#allocation2] sm:$0xff] }
  0x91   :  { %v97_v18 = vpack.c.bf16 %v93_v17, %v93_v17  ;;  %v95_v19 = vld [vmem:[#allocation2 + $0x10] sm:$0xff]  ;;  %87 = vst.msk [vmem:[#allocation2 + $0x8] sm:$0xff] %vm16_vm0, %v82_v15 }
  0x92   :  { %v99_v20 = vpack.c.bf16 %v95_v19, %v95_v19  ;;  %89 = vst.msk [vmem:[#allocation2 + $0x18] sm:$0xff] %vm16_vm0, %v84_v16 }
  0x93   :  { %102 = vst.msk [vmem:[%s185_s2] sm:$0xf] %vm101_vm2, %v97_v18 }
  0x94   :  { %104 = vst.msk [vmem:[%s185_s2 + $0x8] sm:$0xf] %vm101_vm2, %v99_v20 }
  0x98   :  { %v94_v21 = vld [vmem:[#allocation2 + $0x8] sm:$0xff] }
  0x99   :  { %v98_v22 = vpack.c.bf16 %v94_v21, %v94_v21  ;;  %v96_v23 = vld [vmem:[#allocation2 + $0x18] sm:$0xff] }
  0x9a   :  { %v100_v24 = vpack.c.bf16 %v96_v23, %v96_v23 }
  0x9b   :  { %103 = vst.msk [vmem:[%s185_s2 + $0x4] sm:$0xf] %vm101_vm2, %v98_v22 }
  0x9c   :  { %105 = vst.msk [vmem:[%s185_s2 + $0xc] sm:$0xf] %vm101_vm2, %v100_v24 }

// kernel: model_forward.24
= control target key start
LH: loop header
LB: loop body
LE: loop exit
PB: predicated region body
PF: predicated region fallthrough
CT: control target
= control target key end

     0   :  { %s531_s9 = smov 0   ;;  %s533_s10 = smov 0   ;;  %s574_s0 = inlined_call_operand.vmem [shape: bf16[2,16,96], index: 0, kind: input, shape index: {}]   ;;  %s575_s1 = inlined_call_operand.vmem [shape: f32[4,96], index: 1, kind: input, shape index: {}]   ;;  %s576_s2 = inlined_call_operand.vmem [shape: bf16[2,16,96], index: 2, kind: output, shape index: {}]  }
   0x1   :  { %s535_s11 = smov 0  }
   0x2 LB: > { %s31_s12 = sadd.s32 1, %s509_s10  ;;  %p443_p0 = scmp.ge.s32.totalorder %s513_s11, 1  ;;  %s513_s11 = sphi %s535_s11, %s12_s11   ;;  %s509_s10 = sphi %s533_s10, %s578_s10   ;;  %s505_s9 = sphi %s531_s9, %s577_s9  }
   0x3   : > { %p33_p1 = scmp.ge.s32.totalorder %s31_s12, 2  ;;  %p156_p2 = scmp.lt.s32.totalorder %s513_s11, 3 }
   0x5   : > { %s580_s12 = smov (%p33_p1, %s31_s12), 0  ;;  %p157_p3 = pnand %p443_p0, %p156_p2 }
   0x6   : > { %p197_p4 = scmp.lt.s32.totalorder (!%p157_p3), %s505_s9, 1 }
   0x7   : > { %160 = sbr.rel (%p157_p3) target bundleno = 70 (0x46), region = 28 }
   0xc   : > { %vm230_vm0 = vcmask 780288   ;;  %v515_v0 = vmov 0.0   ;;  %s582_s9 = smov (!%p197_p4, %s505_s9), 1  ;;  %vm243_vm1 = vcmask 785408   ;;  %v246_v4 = vld [vmem:[%s575_s1] sm:$0xf] }
   0xd   : > { %231 = vst.msk [vmem:[#allocation2] sm:$0x7] %vm230_vm0, %v515_v0  ;;  %s452_s13 = sshll.u32 %s582_s9, 3  ;;  %v249_v5 = vperm.slane %v246_v4, 0  ;;  %v256_v6 = vperm.slane %v246_v4, 1  ;;  %v263_v7 = vperm.slane %v246_v4, 2 }
   0xe   : > { %s207_s16 = scalar_lea.vmem %s574_s0, %s452_s13  ;;  %v270_v13 = vperm.slane %v246_v4, 3  ;;  %s224_s21 = scalar_lea.vmem %s576_s2, %s452_s13  ;;  %vm317_vm10 = vcmask 781312  }
   0xf   : > { %v455_v1 = vld [vmem:[%s207_s16] sm:$0xff]  }
  0x10   : > { %v456_v2 = vunpack.c.l.bf16 %v455_v1  ;;  %v457_v3 = vunpack.c.h.bf16 %v455_v1 }
  0x12   : > { %244 = vst.msk [vmem:[#allocation2 + $0x3] sm:$0xff] %vm243_vm1, %v456_v2 }
  0x13   : > { %245 = vst.msk [vmem:[#allocation2 + $0xb] sm:$0xff] %vm243_vm1, %v457_v3 }
  0x19   : > { %v247_v8 = vld [vmem:[#allocation2] sm:$0xff] }
  0x1a   : > { %v254_v9 = vld [vmem:[#allocation2 + $0x1] sm:$0xff]  ;;  %v250_v11 = vmul.f32 %v249_v5, %v247_v8  ;;  %v255_v15 = vld [vmem:[#allocation2 + $0x9] sm:$0xff] }
  0x1b   : > { %v261_v10 = vld [vmem:[#allocation2 + $0x2] sm:$0xff]  ;;  %v257_v12 = vmul.f32 %v256_v6, %v254_v9  ;;  %v258_v18 = vmul.f32 %v256_v6, %v255_v15  ;;  %v262_v19 = vld [vmem:[#allocation2 + $0xa] sm:$0xff] }
  0x1c   : > { %v248_v14 = vld [vmem:[#allocation2 + $0x8] sm:$0xff]  ;;  %v264_v21 = vmul.f32 %v263_v7, %v261_v10  ;;  %v265_v24 = vmul.f32 %v263_v7, %v262_v19 }
  0x1d   : > { %v268_v16 = vld [vmem:[#allocation2 + $0x3] sm:$0xff]  ;;  %v251_v17 = vmul.f32 %v249_v5, %v248_v14  ;;  %v259_v20 = vadd.f32 %v257_v12, %v250_v11  ;;  %v269_v22 = vld [vmem:[#allocation2 + $0xb] sm:$0xff] }
  0x1e   : > { %v271_v26 = vmul.f32 %v270_v13, %v268_v16  ;;  %v272_v28 = vmul.f32 %v270_v13, %v269_v22 }
  0x1f   : > { %v260_v23 = vadd.f32 %v258_v18, %v251_v17  ;;  %v266_v25 = vadd.f32 %v264_v21, %v259_v20 }
  0x21   : > { %v267_v27 = vadd.f32 %v265_v24, %v260_v23  ;;  %v273_v29 = vadd.f32 %v271_v26, %v266_v25 }
  0x23   : > { %v274_v30 = vadd.f32 %v272_v28, %v267_v27  ;;  %v448_v31 = vmul.f32 -1.442695, %v273_v29 }
  0x25   : > { %v449_v32 = vmul.f32 -1.442695, %v274_v30  ;;  %483 = vpow2.f32 %v448_v31 }
  0x27   : > { %485 = vpow2.f32 %v449_v32 }
  0x2b   : > { %v484_v33 = vpop.eup %483 }
  0x2c   : > { %v281_v35 = vadd.f32 1.0, %v484_v33 }
  0x2d   : > { %v486_v34 = vpop.eup %485 }
  0x2e   : > { %v282_v36 = vadd.f32 1.0, %v486_v34  ;;  %487 = vrcp.f32 %v281_v35  ;;  %v294_v42 = vand.u32 2147483648, %v281_v35  ;;  %v292_v45 = vand.u32 2147483647, %v281_v35 }
  0x2f   : > { %vm288_vm4 = vweird.f32 %v281_v35 }
  0x30   : > { %489 = vrcp.f32 %v282_v36  ;;  %v309_v46 = vand.u32 2147483648, %v282_v36  ;;  %v307_v48 = vand.u32 2147483647, %v282_v36  ;;  %v295_v50 = vor.u32 1.1754944e-38, %v294_v42 }
  0x31   : > { %vm303_vm6 = vweird.f32 %v282_v36  ;;  %vm293_vm7 = vcmp.eq.f32.partialorder %v292_v45, 8.507059e+37 }
  0x32   : > { %v310_v53 = vor.u32 1.1754944e-38, %v309_v46  ;;  %vm308_vm9 = vcmp.eq.f32.partialorder %v307_v48, 8.507059e+37 }
  0x34   : > { %v488_v37 = vpop.eup %487 }
  0x35   : > { %v284_v39 = vmul.f32 %v488_v37, %v281_v35  ;;  %vm289_vm2 = vweird.f32 %v488_v37 }
  0x36   : > { %v490_v38 = vpop.eup %489  ;;  %vm290_vm5 = vmor %vm288_vm4, %vm289_vm2 }
  0x37   : > { %v299_v40 = vmul.f32 %v490_v38, %v282_v36  ;;  %v285_v41 = vsub.f32 1.0, %v284_v39  ;;  %vm304_vm3 = vweird.f32 %v490_v38 }
  0x38   : > { %vm305_vm8 = vmor %vm303_vm6, %vm304_vm3 }
  0x39   : > { %v300_v43 = vsub.f32 1.0, %v299_v40  ;;  %v286_v44 = vmul.f32 %v488_v37, %v285_v41 }
  0x3b   : > { %v301_v47 = vmul.f32 %v490_v38, %v300_v43  ;;  %v287_v49 = vadd.f32 %v488_v37, %v286_v44 }
  0x3d   : > { %v302_v51 = vadd.f32 %v490_v38, %v301_v47  ;;  %v291_v52 = vsel %vm290_vm5, %v488_v37, %v287_v49 }
  0x3e   : > { %v296_v54 = vsel %vm293_vm7, %v295_v50, %v291_v52 }
  0x3f   : > { %v306_v55 = vsel %vm305_vm8, %v490_v38, %v302_v51  ;;  %v313_v56 = vmul.f32 %v296_v54, %v273_v29 }
  0x40   : > { %v311_v57 = vsel %vm308_vm9, %v310_v53, %v306_v55 }
  0x41   : > { %v314_v58 = vmul.f32 %v311_v57, %v274_v30  ;;  %v315_v59 = vpack.c.bf16 %v313_v56, %v313_v56 }
  0x43   : > { %v316_v60 = vpack.c.bf16 %v314_v58, %v314_v58  ;;  %318 = vst.msk [vmem:[%s224_s21] sm:$0xf] %vm317_vm10, %v315_v59 }
  0x45   : > { %319 = vst.msk [vmem:[%s224_s21 + $0x4] sm:$0xf] %vm317_vm10, %v316_v60 }
  0x46 PF: > { %s12_s11 = sadd.s32 1, %s513_s11   ;;  %s577_s9 = smov %s509_s10 }
  0x47   : > { %p9_p5 = scmp.ge.s32.totalorder %s12_s11, 4   ;;  %s578_s10 = smov %s580_s12 }
  0x49   :  { %11 = sbr.rel (!%p9_p5) target bundleno = 2 (0x2), region = 69 }

// kernel: model_forward.29
= control target key start
LH: loop header
LB: loop body
LE: loop exit
PB: predicated region body
PF: predicated region fallthrough
CT: control target
= control target key end

     0   :  { %vm70_vm0 = vcmask 261120   ;;  %s249_s1 = inlined_call_operand.vmem [shape: bf16[32,256], index: 1, kind: input, shape index: {}]   ;;  %s250_s0 = inlined_call_operand.vmem [shape: bf16[32,32], index: 0, kind: input, shape index: {}]   ;;  %s251_s2 = inlined_call_operand.vmem [shape: bf16[32,256], index: 2, kind: output, shape index: {}]  }
   0x1   :  { %v172_v0 = vld [vmem:[%s249_s1 + $0x10] sm:$0xf]  ;;  %v187_v1 = vld [vmem:[%s249_s1 + $0x14] sm:$0xf0]  ;;  %v186_v2 = vld [vmem:[%s249_s1 + $0x14] sm:$0xf] }
   0x2   :  { %v173_v3 = vor.u32 %v187_v1, %v172_v0  ;;  %v174_v4 = vld [vmem:[%s249_s1 + $0x18] sm:$0xf0]  ;;  %v164_v5 = vld [vmem:[%s249_s1] sm:$0xf]  ;;  %v185_v6 = vld [vmem:[%s249_s1 + $0x4] sm:$0xf0] }
   0x3   :  { %v177_v7 = vor.u32 %v186_v2, %v174_v4  ;;  %v184_v8 = vld [vmem:[%s249_s1 + $0x4] sm:$0xf]  ;;  %v166_v9 = vld [vmem:[%s249_s1 + $0x8] sm:$0xf0]  ;;  %v165_v10 = vor.u32 %v185_v6, %v164_v5 }
   0x4   :  { %83 = vmatpush.bf16.msra.mxu0 %v173_v3  ;;  %188 = vmatpush.bf16.msra.mxu2 %v173_v3  ;;  %v169_v11 = vor.u32 %v184_v8, %v166_v9  ;;  %v182_v12 = vld [vmem:[%s250_s0] sm:$0xff]  ;;  %v183_v13 = vld [vmem:[%s250_s0 + $0x8] sm:$0xff] }
   0x5   :  { %102 = vmatpush.bf16.msra.mxu1 %v177_v7  ;;  %190 = vmatpush.bf16.msra.mxu3 %v177_v7 }
   0x8   :  { %84 = vmatpush.bf16.msra.mxu0 %v165_v10  ;;  %189 = vmatpush.bf16.msra.mxu2 %v165_v10 }
   0x9   :  { %103 = vmatpush.bf16.msra.mxu1 %v169_v11  ;;  %191 = vmatpush.bf16.msra.mxu3 %v169_v11 }
   0xb   :  { %178 = vmatmul.msk.bf16.vlgmr.msra.gmra.mxu0 %vm70_vm0, %v182_v12  ;;  %179 = vmatmul.msk.bf16.vlgmr.msra.gmra.mxu2 %vm70_vm0, %v183_v13 }
   0xc   :  { %180 = vmatmul.msk.bf16.vlgmr.msra.gmra.mxu1 %vm70_vm0, %v182_v12  ;;  %181 = vmatmul.msk.bf16.vlgmr.msra.gmra.mxu3 %vm70_vm0, %v183_v13 }
  0x88   :  { %v86_v14 = vpop.f32.mrf.mxu0 }
  0x89   :  { %v105_v15 = vpop.f32.mrf.mxu1 }
  0x8a   :  { %v142_v16 = vpack.c.bf16 %v105_v15, %v86_v14 }
  0x8c   :  { %146 = vst [vmem:[%s251_s2] sm:$0xff] %v142_v16 }
  0x8e   :  { %v91_v17 = vpop.f32.mrf.mxu2 }
  0x8f   :  { %v110_v18 = vpop.f32.mrf.mxu3 }
  0x90   :  { %v144_v19 = vpack.c.bf16 %v110_v18, %v91_v17  ;;  %v88_v20 = vpop.f32.mrf.mxu0 }
  0x91   :  { %v107_v21 = vpop.f32.mrf.mxu1 }
  0x92   :  { %148 = vst [vmem:[%s251_s2 + $0x10] sm:$0xff] %v144_v19  ;;  %v143_v22 = vpack.c.bf16 %v107_v21, %v88_v20 }
  0x94   :  { %147 = vst [vmem:[%s251_s2 + $0x8] sm:$0xff] %v143_v22 }
  0x96   :  { %v93_v23 = vpop.f32.mrf.mxu2 }
  0x97   :  { %v112_v24 = vpop.f32.mrf.mxu3 }
  0x98   :  { %v145_v25 = vpack.c.bf16 %v112_v24, %v93_v23 }
  0x9a   :  { %149 = vst [vmem:[%s251_s2 + $0x18] sm:$0xff] %v145_v25 }

// kernel: model_forward.27
= control target key start
LH: loop header
LB: loop body
LE: loop exit
PB: predicated region body
PF: predicated region fallthrough
CT: control target
= control target key end

     0   :  { %vm16_vm0 = vcmask 261120   ;;  %v129_v1 = vmov 0.0   ;;  %s183_s1 = inlined_call_operand.vmem [shape: bf16[32,32], index: 1, kind: input, shape index: {}]   ;;  %s184_s0 = inlined_call_operand.vmem [shape: bf16[32,32], index: 0, kind: input, shape index: {}]   ;;  %s185_s2 = inlined_call_operand.vmem [shape: f32[32,32], index: 2, kind: output, shape index: {}]  }
   0x1   :  { %v125_v0 = vld [vmem:[%s183_s1 + $0x8] sm:$0xff]  ;;  %17 = vst.msk [vmem:[#allocation2] sm:$0xff] %vm16_vm0, %v129_v1  ;;  %v124_v2 = vld [vmem:[%s183_s1] sm:$0xff] }
   0x2   :  { %18 = vst.msk [vmem:[#allocation2 + $0x8] sm:$0xff] %vm16_vm0, %v129_v1  ;;  %68 = vmatpush.bf16.msra.mxu0 %v125_v0  ;;  %126 = vmatpush.bf16.msra.mxu1 %v125_v0  ;;  %v122_v3 = vld [vmem:[%s184_s0] sm:$0xff]  ;;  %v123_v4 = vld [vmem:[%s184_s0 + $0x8] sm:$0xff] }
   0x3   :  { %19 = vst.msk [vmem:[#allocation2 + $0x10] sm:$0xff] %vm16_vm0, %v129_v1 }
   0x4   :  { %20 = vst.msk [vmem:[#allocation2 + $0x18] sm:$0xff] %vm16_vm0, %v129_v1 }
   0x6   :  { %69 = vmatpush.bf16.msra.mxu0 %v124_v2  ;;  %127 = vmatpush.bf16.msra.mxu1 %v124_v2 }
   0x8   :  { %v21_v5 = vld [vmem:[#allocation2] sm:$0xff] }
   0x9   :  { %120 = vmatmul.msk.bf16.vlgmr.msra.gmra.mxu0 %vm16_vm0, %v122_v3  ;;  %121 = vmatmul.msk.bf16.vlgmr.msra.gmra.mxu1 %vm16_vm0, %v123_v4  ;;  %v22_v11 = vld [vmem:[#allocation2 + $0x8] sm:$0xff] }
   0xa   :  { %v23_v6 = vld [vmem:[#allocation2 + $0x10] sm:$0xff] }
   0xb   :  { %v24_v12 = vld [vmem:[#allocation2 + $0x18] sm:$0xff] }
  0x86   :  { %v71_v7 = vpop.f32.mrf.mxu0  ;;  %v76_v8 = vpop.f32.mrf.mxu1 }
  0x87   :  { %v81_v9 = vadd.f32 %v71_v7, %v21_v5  ;;  %v83_v10 = vadd.f32 %v76_v8, %v23_v6 }
  0x89   :  { %85 = vst.msk [vmem:[#allocation2] sm:$0xff] %vm16_vm0, %v81_v9 }
  0x8a   :  { %87 = vst.msk [vmem:[#allocation2 + $0x10] sm:$0xff] %vm16_vm0, %v83_v10 }
  0x8e   :  { %v73_v13 = vpop.f32.mrf.mxu0  ;;  %v78_v14 = vpop.f32.mrf.mxu1 }
  0x8f   :  { %v82_v15 = vadd.f32 %v73_v13, %v22_v11  ;;  %v84_v17 = vadd.f32 %v78_v14, %v24_v12 }
  0x90   :  { %v92_v16 = vld [vmem:[#allocation2] sm:$0xff] }
  0x91   :  { %96 = vst.msk [vmem:[%s185_s2] sm:$0xff] %vm16_vm0, %v92_v16  ;;  %v94_v18 = vld [vmem:[#allocation2 + $0x10] sm:$0xff] }
  0x92   :  { %98 = vst.msk [vmem:[%s185_s2 + $0x10] sm:$0xff] %vm16_vm0, %v94_v18 }
  0x93   :  { %86 = vst.msk [vmem:[#allocation2 + $0x8] sm:$0xff] %vm16_vm0, %v82_v15 }
  0x94   :  { %88 = vst.msk [vmem:[#allocation2 + $0x18] sm:$0xff] %vm16_vm0, %v84_v17 }
  0x9a   :  { %v93_v19 = vld [vmem:[#allocation2 + $0x8] sm:$0xff] }
  0x9b   :  { %97 = vst.msk [vmem:[%s185_s2 + $0x8] sm:$0xff] %vm16_vm0, %v93_v19  ;;  %v95_v20 = vld [vmem:[#allocation2 + $0x18] sm:$0xff] }
  0x9c   :  { %99 = vst.msk [vmem:[%s185_s2 + $0x18] sm:$0xff] %vm16_vm0, %v95_v20 }

// kernel: model_forward.30
= control target key start
LH: loop header
LB: loop body
LE: loop exit
PB: predicated region body
PF: predicated region fallthrough
CT: control target
= control target key end

     0   :  { %8 = vsyncpa [#allocation5], 0  ;;  %s1267_s15 = smov [#allocation4]   ;;  %s1268_s17 = smov 128   ;;  %s1753_s0 = inlined_call_operand.vmem [shape: bf16[32,256], index: 0, kind: input, shape index: {}]   ;;  %s1754_s1 = inlined_call_operand.vmem [shape: bf16[256,256], index: 1, kind: input, shape index: {}]   ;;  %s1755_s2 = inlined_call_operand.hbm [shape: bf16[256,256], index: 2, kind: input, shape index: {}]   ;;  %s1756_s3 = inlined_call_operand.vmem [shape: bf16[32,256], index: 3, kind: output, shape index: {}]  }
   0x1   :  { %s17_s14 = sshll.u32 %s1755_s2, 4  ;;  %s19_s16 = sshll.u32 %s1267_s15, 4  ;;  %s18_s14 = int_to_ptr.hbm [resolvable:$true] %s17_s14  ;;  %s20_s16 = int_to_ptr.vmem [resolvable:$true] %s19_s16 }
   0x2   :  { %s1269_s18 = smov 8  }
   0x3   :  { %25 = dma.hbm_to_vmem [thread:$0]  %s18_s14, 4096, %s20_s16, [#allocation5], %s1268_s17, %s1268_s17, %s1269_s18  }
   0x4   :  { %1265 = dma.done.wait [#allocation5], 4096  }
   0x5   :  { %1266 = vsyncadd [#allocation5], 4294963200  ;;  %v932_v0 = vld [vmem:[%s1754_s1 + $0x70] sm:$0xf]  ;;  %v1157_v1 = vld [vmem:[%s1754_s1 + $0x74] sm:$0xf0] }
   0x6   :  { %v996_v2 = vld [vmem:[%s1754_s1 + $0xf0] sm:$0xf]  ;;  %v933_v3 = vor.u32 %v1157_v1, %v932_v0  ;;  %v1173_v4 = vld [vmem:[%s1754_s1 + $0xf4] sm:$0xf0]  ;;  %v1156_v5 = vld [vmem:[%s1754_s1 + $0x74] sm:$0xf] }
   0x7   :  { %v934_v6 = vld [vmem:[%s1754_s1 + $0x78] sm:$0xf0]  ;;  %v997_v7 = vor.u32 %v1173_v4, %v996_v2  ;;  %v1172_v9 = vld [vmem:[%s1754_s1 + $0xf4] sm:$0xf]  ;;  %v924_v11 = vld [vmem:[%s1754_s1 + $0x60] sm:$0xf] }
   0x8   :  { %v937_v8 = vor.u32 %v1156_v5, %v934_v6  ;;  %v998_v10 = vld [vmem:[%s1754_s1 + $0xf8] sm:$0xf0]  ;;  %274 = vmatpush.bf16.msra.mxu0 %v933_v3  ;;  %v1155_v13 = vld [vmem:[%s1754_s1 + $0x64] sm:$0xf0]  ;;  %v988_v14 = vld [vmem:[%s1754_s1 + $0xe0] sm:$0xf] }
   0x9   :  { %v1001_v12 = vor.u32 %v1172_v9, %v998_v10  ;;  %v1171_v15 = vld [vmem:[%s1754_s1 + $0xe4] sm:$0xf0]  ;;  %293 = vmatpush.bf16.msra.mxu1 %v997_v7  ;;  %v925_v16 = vor.u32 %v1155_v13, %v924_v11  ;;  %v1154_v18 = vld [vmem:[%s1754_s1 + $0x64] sm:$0xf]  ;;  %v926_v19 = vld [vmem:[%s1754_s1 + $0x68] sm:$0xf0] }
   0xa   :  { %312 = vmatpush.bf16.msra.mxu2 %v937_v8  ;;  %v989_v17 = vor.u32 %v1171_v15, %v988_v14  ;;  %v1170_v20 = vld [vmem:[%s1754_s1 + $0xe4] sm:$0xf]  ;;  %v929_v21 = vor.u32 %v1154_v18, %v926_v19  ;;  %v990_v22 = vld [vmem:[%s1754_s1 + $0xe8] sm:$0xf0]  ;;  %v916_v23 = vld [vmem:[%s1754_s1 + $0x50] sm:$0xf] }
   0xb   :  { %331 = vmatpush.bf16.msra.mxu3 %v1001_v12  ;;  %v1153_v24 = vld [vmem:[%s1754_s1 + $0x54] sm:$0xf0]  ;;  %v993_v25 = vor.u32 %v1170_v20, %v990_v22  ;;  %v980_v26 = vld [vmem:[%s1754_s1 + $0xd0] sm:$0xf]  ;;  %v1152_v28 = vld [vmem:[%s1754_s1 + $0x54] sm:$0xf] }
   0xc   :  { %v1169_v27 = vld [vmem:[%s1754_s1 + $0xd4] sm:$0xf0]  ;;  %275 = vmatpush.bf16.msra.mxu0 %v925_v16  ;;  %v917_v29 = vor.u32 %v1153_v24, %v916_v23  ;;  %v918_v30 = vld [vmem:[%s1754_s1 + $0x58] sm:$0xf0]  ;;  %v1168_v31 = vld [vmem:[%s1754_s1 + $0xd4] sm:$0xf] }
   0xd   :  { %v982_v32 = vld [vmem:[%s1754_s1 + $0xd8] sm:$0xf0]  ;;  %294 = vmatpush.bf16.msra.mxu1 %v989_v17  ;;  %v981_v33 = vor.u32 %v1169_v27, %v980_v26  ;;  %v921_v34 = vor.u32 %v1152_v28, %v918_v30  ;;  %v908_v35 = vld [vmem:[%s1754_s1 + $0x40] sm:$0xf]  ;;  %v1151_v36 = vld [vmem:[%s1754_s1 + $0x44] sm:$0xf0] }
   0xe   :  { %313 = vmatpush.bf16.msra.mxu2 %v929_v21  ;;  %v972_v37 = vld [vmem:[%s1754_s1 + $0xc0] sm:$0xf]  ;;  %v985_v38 = vor.u32 %v1168_v31, %v982_v32  ;;  %v1167_v39 = vld [vmem:[%s1754_s1 + $0xc4] sm:$0xf0]  ;;  %v1150_v40 = vld [vmem:[%s1754_s1 + $0x44] sm:$0xf]  ;;  %v909_v44 = vor.u32 %v1151_v36, %v908_v35 }
   0xf   :  { %332 = vmatpush.bf16.msra.mxu3 %v993_v25  ;;  %v910_v41 = vld [vmem:[%s1754_s1 + $0x48] sm:$0xf0]  ;;  %v1166_v42 = vld [vmem:[%s1754_s1 + $0xc4] sm:$0xf]  ;;  %v973_v45 = vor.u32 %v1167_v39, %v972_v37  ;;  %v900_v47 = vld [vmem:[%s1754_s1 + $0x30] sm:$0xf] }
  0x10   :  { %v974_v43 = vld [vmem:[%s1754_s1 + $0xc8] sm:$0xf0]  ;;  %276 = vmatpush.bf16.msra.mxu0 %v917_v29  ;;  %v913_v46 = vor.u32 %v1150_v40, %v910_v41  ;;  %v1149_v48 = vld [vmem:[%s1754_s1 + $0x34] sm:$0xf0]  ;;  %v964_v49 = vld [vmem:[%s1754_s1 + $0xb0] sm:$0xf] }
  0x11   :  { %295 = vmatpush.bf16.msra.mxu1 %v981_v33  ;;  %v977_v50 = vor.u32 %v1166_v42, %v974_v43  ;;  %v1165_v51 = vld [vmem:[%s1754_s1 + $0xb4] sm:$0xf0]  ;;  %v1148_v52 = vld [vmem:[%s1754_s1 + $0x34] sm:$0xf]  ;;  %v902_v53 = vld [vmem:[%s1754_s1 + $0x38] sm:$0xf0]  ;;  %v901_v56 = vor.u32 %v1149_v48, %v900_v47 }
  0x12   :  { %314 = vmatpush.bf16.msra.mxu2 %v921_v34  ;;  %v1164_v54 = vld [vmem:[%s1754_s1 + $0xb4] sm:$0xf]  ;;  %v966_v55 = vld [vmem:[%s1754_s1 + $0xb8] sm:$0xf0]  ;;  %v965_v57 = vor.u32 %v1165_v51, %v964_v49  ;;  %v905_v58 = vor.u32 %v1148_v52, %v902_v53  ;;  %v892_v59 = vld [vmem:[%s1754_s1 + $0x20] sm:$0xf] }
  0x13   :  { %333 = vmatpush.bf16.msra.mxu3 %v985_v38  ;;  %v1147_v60 = vld [vmem:[%s1754_s1 + $0x24] sm:$0xf0]  ;;  %v956_v61 = vld [vmem:[%s1754_s1 + $0xa0] sm:$0xf]  ;;  %v969_v62 = vor.u32 %v1164_v54, %v966_v55  ;;  %v1146_v0 = vld [vmem:[%s1754_s1 + $0x24] sm:$0xf] }
  0x14   :  { %277 = vmatpush.bf16.msra.mxu0 %v909_v44  ;;  %v1163_v63 = vld [vmem:[%s1754_s1 + $0xa4] sm:$0xf0]  ;;  %v894_v1 = vld [vmem:[%s1754_s1 + $0x28] sm:$0xf0]  ;;  %v1162_v2 = vld [vmem:[%s1754_s1 + $0xa4] sm:$0xf]  ;;  %v893_v4 = vor.u32 %v1147_v60, %v892_v59 }
  0x15   :  { %296 = vmatpush.bf16.msra.mxu1 %v973_v45  ;;  %v958_v3 = vld [vmem:[%s1754_s1 + $0xa8] sm:$0xf0]  ;;  %v957_v5 = vor.u32 %v1163_v63, %v956_v61  ;;  %v897_v6 = vor.u32 %v1146_v0, %v894_v1  ;;  %v884_v7 = vld [vmem:[%s1754_s1 + $0x10] sm:$0xf]  ;;  %v1145_v8 = vld [vmem:[%s1754_s1 + $0x14] sm:$0xf0] }
  0x16   :  { %315 = vmatpush.bf16.msra.mxu2 %v913_v46  ;;  %v948_v9 = vld [vmem:[%s1754_s1 + $0x90] sm:$0xf]  ;;  %v961_v10 = vor.u32 %v1162_v2, %v958_v3  ;;  %v1161_v11 = vld [vmem:[%s1754_s1 + $0x94] sm:$0xf0]  ;;  %v1144_v12 = vld [vmem:[%s1754_s1 + $0x14] sm:$0xf]  ;;  %v885_v16 = vor.u32 %v1145_v8, %v884_v7 }
  0x17   :  { %334 = vmatpush.bf16.msra.mxu3 %v977_v50  ;;  %v886_v13 = vld [vmem:[%s1754_s1 + $0x18] sm:$0xf0]  ;;  %v1160_v14 = vld [vmem:[%s1754_s1 + $0x94] sm:$0xf]  ;;  %v876_v17 = vld [vmem:[%s1754_s1] sm:$0xf]  ;;  %v949_v19 = vor.u32 %v1161_v11, %v948_v9 }
  0x18   :  { %278 = vmatpush.bf16.msra.mxu0 %v901_v56  ;;  %v950_v15 = vld [vmem:[%s1754_s1 + $0x98] sm:$0xf0]  ;;  %v1143_v18 = vld [vmem:[%s1754_s1 + $0x4] sm:$0xf0]  ;;  %v889_v20 = vor.u32 %v1144_v12, %v886_v13  ;;  %v940_v21 = vld [vmem:[%s1754_s1 + $0x80] sm:$0xf] }
  0x19   :  { %297 = vmatpush.bf16.msra.mxu1 %v965_v57  ;;  %v1159_v22 = vld [vmem:[%s1754_s1 + $0x84] sm:$0xf0]  ;;  %v1142_v23 = vld [vmem:[%s1754_s1 + $0x4] sm:$0xf]  ;;  %v953_v24 = vor.u32 %v1160_v14, %v950_v15  ;;  %v878_v25 = vld [vmem:[%s1754_s1 + $0x8] sm:$0xf0]  ;;  %v877_v31 = vor.u32 %v1143_v18, %v876_v17 }
  0x1a   :  { %316 = vmatpush.bf16.msra.mxu2 %v905_v58  ;;  %v1158_v26 = vld [vmem:[%s1754_s1 + $0x84] sm:$0xf]  ;;  %v942_v27 = vld [vmem:[%s1754_s1 + $0x88] sm:$0xf0]  ;;  %v860_v28 = vld [vmem:[%s1753_s0] sm:$0xf]  ;;  %v941_v35 = vor.u32 %v1159_v22, %v940_v21  ;;  %v881_v36 = vor.u32 %v1142_v23, %v878_v25 }
  0x1b   :  { %335 = vmatpush.bf16.msra.mxu3 %v969_v62  ;;  %v1188_v29 = vld [vmem:[#allocation4 + $0x74] sm:$0xf]  ;;  %v1062_v30 = vld [vmem:[#allocation4 + $0x78] sm:$0xf0]  ;;  %v1139_v32 = vld [vmem:[%s1753_s0 + $0x4] sm:$0xf0]  ;;  %v945_v39 = vor.u32 %v1158_v26, %v942_v27 }
  0x1c   :  { %279 = vmatpush.bf16.msra.mxu0 %v893_v4  ;;  %v1204_v33 = vld [vmem:[#allocation4 + $0xf4] sm:$0xf]  ;;  %v1126_v34 = vld [vmem:[#allocation4 + $0xf8] sm:$0xf0]  ;;  %v1138_v37 = vld [vmem:[%s1753_s0 + $0x4] sm:$0xf]  ;;  %v1065_v40 = vor.u32 %v1188_v29, %v1062_v30  ;;  %v1497_v44 = vor.u32 %v1139_v32, %v860_v28 }
  0x1d   :  { %298 = vmatpush.bf16.msra.mxu1 %v957_v5  ;;  %v862_v38 = vld [vmem:[%s1753_s0 + $0x8] sm:$0xf0]  ;;  %v1060_v41 = vld [vmem:[#allocation4 + $0x70] sm:$0xf]  ;;  %v1189_v42 = vld [vmem:[#allocation4 + $0x74] sm:$0xf0]  ;;  %v1129_v45 = vor.u32 %v1204_v33, %v1126_v34 }
  0x1e   :  { %317 = vmatpush.bf16.msra.mxu2 %v897_v6  ;;  %v1124_v43 = vld [vmem:[#allocation4 + $0xf0] sm:$0xf]  ;;  %v1205_v46 = vld [vmem:[#allocation4 + $0xf4] sm:$0xf0]  ;;  %v1186_v47 = vld [vmem:[#allocation4 + $0x64] sm:$0xf]  ;;  %v1499_v49 = vor.u32 %v1138_v37, %v862_v38  ;;  %v1061_v52 = vor.u32 %v1189_v42, %v1060_v41 }
  0x1f   :  { %336 = vmatpush.bf16.msra.mxu3 %v961_v10  ;;  %v1054_v48 = vld [vmem:[#allocation4 + $0x68] sm:$0xf0]  ;;  %v1202_v50 = vld [vmem:[#allocation4 + $0xe4] sm:$0xf]  ;;  %v1125_v53 = vor.u32 %v1205_v46, %v1124_v43  ;;  %v1052_v55 = vld [vmem:[#allocation4 + $0x60] sm:$0xf] }
  0x20   :  { %280 = vmatpush.bf16.msra.mxu0 %v885_v16  ;;  %v1118_v51 = vld [vmem:[#allocation4 + $0xe8] sm:$0xf0]  ;;  %v1057_v54 = vor.u32 %v1186_v47, %v1054_v48  ;;  %v1187_v56 = vld [vmem:[#allocation4 + $0x64] sm:$0xf0]  ;;  %v1116_v57 = vld [vmem:[#allocation4 + $0xe0] sm:$0xf] }
  0x21   :  { %299 = vmatpush.bf16.msra.mxu1 %v949_v19  ;;  %v1121_v58 = vor.u32 %v1202_v50, %v1118_v51  ;;  %v1203_v59 = vld [vmem:[#allocation4 + $0xe4] sm:$0xf0]  ;;  %v1184_v60 = vld [vmem:[#allocation4 + $0x54] sm:$0xf]  ;;  %v1046_v61 = vld [vmem:[#allocation4 + $0x58] sm:$0xf0]  ;;  %v1053_v0 = vor.u32 %v1187_v56, %v1052_v55 }
  0x22   :  { %318 = vmatpush.bf16.msra.mxu2 %v889_v20  ;;  %v1200_v62 = vld [vmem:[#allocation4 + $0xd4] sm:$0xf]  ;;  %v1110_v63 = vld [vmem:[#allocation4 + $0xd8] sm:$0xf0]  ;;  %v1117_v1 = vor.u32 %v1203_v59, %v1116_v57  ;;  %v1049_v2 = vor.u32 %v1184_v60, %v1046_v61  ;;  %v1044_v3 = vld [vmem:[#allocation4 + $0x50] sm:$0xf] }
  0x23   :  { %337 = vmatpush.bf16.msra.mxu3 %v953_v24  ;;  %v1185_v4 = vld [vmem:[#allocation4 + $0x54] sm:$0xf0]  ;;  %v1108_v5 = vld [vmem:[#allocation4 + $0xd0] sm:$0xf]  ;;  %v1113_v6 = vor.u32 %v1200_v62, %v1110_v63  ;;  %v1182_v8 = vld [vmem:[#allocation4 + $0x44] sm:$0xf] }
  0x24   :  { %281 = vmatpush.bf16.msra.mxu0 %v877_v31  ;;  %v1201_v7 = vld [vmem:[#allocation4 + $0xd4] sm:$0xf0]  ;;  %v1038_v9 = vld [vmem:[#allocation4 + $0x48] sm:$0xf0]  ;;  %v1198_v10 = vld [vmem:[#allocation4 + $0xc4] sm:$0xf]  ;;  %v1045_v12 = vor.u32 %v1185_v4, %v1044_v3 }
  0x25   :  { %300 = vmatpush.bf16.msra.mxu1 %v941_v35  ;;  %v1102_v11 = vld [vmem:[#allocation4 + $0xc8] sm:$0xf0]  ;;  %v1036_v13 = vld [vmem:[#allocation4 + $0x40] sm:$0xf]  ;;  %v1109_v14 = vor.u32 %v1201_v7, %v1108_v5  ;;  %v1041_v15 = vor.u32 %v1182_v8, %v1038_v9  ;;  %v1183_v16 = vld [vmem:[#allocation4 + $0x44] sm:$0xf0] }
  0x26   :  { %319 = vmatpush.bf16.msra.mxu2 %v881_v36  ;;  %v1100_v17 = vld [vmem:[#allocation4 + $0xc0] sm:$0xf]  ;;  %v1199_v18 = vld [vmem:[#allocation4 + $0xc4] sm:$0xf0]  ;;  %v1105_v19 = vor.u32 %v1198_v10, %v1102_v11  ;;  %v868_v20 = vld [vmem:[%s1753_s0 + $0x10] sm:$0xf]  ;;  %v1037_v26 = vor.u32 %v1183_v16, %v1036_v13 }
  0x27   :  { %338 = vmatpush.bf16.msra.mxu3 %v945_v39  ;;  %282 = vmatmul.bf16.vlgmr.msra.gmra.mxu0 %v1497_v44  ;;  %v1180_v21 = vld [vmem:[#allocation4 + $0x34] sm:$0xf]  ;;  %v1030_v22 = vld [vmem:[#allocation4 + $0x38] sm:$0xf0]  ;;  %v1141_v23 = vld [vmem:[%s1753_s0 + $0x14] sm:$0xf0]  ;;  %v1101_v29 = vor.u32 %v1199_v18, %v1100_v17 }
  0x28   :  { %301 = vmatmul.bf16.vlgmr.msra.gmra.mxu1 %v1499_v49  ;;  %566 = vmatpush.bf16.msrb.mxu0 %v1061_v52  ;;  %v1196_v24 = vld [vmem:[#allocation4 + $0xb4] sm:$0xf]  ;;  %v1094_v25 = vld [vmem:[#allocation4 + $0xb8] sm:$0xf0]  ;;  %v1033_v30 = vor.u32 %v1180_v21, %v1030_v22  ;;  %v1028_v31 = vld [vmem:[#allocation4 + $0x30] sm:$0xf]  ;;  %v1517_v34 = vor.u32 %v1141_v23, %v868_v20 }
  0x29   :  { %320 = vmatmul.bf16.vlgmr.msra.gmra.mxu2 %v1497_v44  ;;  %585 = vmatpush.bf16.msrb.mxu1 %v1125_v53  ;;  %v1140_v27 = vld [vmem:[%s1753_s0 + $0x14] sm:$0xf]  ;;  %v870_v28 = vld [vmem:[%s1753_s0 + $0x18] sm:$0xf0]  ;;  %v1181_v32 = vld [vmem:[#allocation4 + $0x34] sm:$0xf0]  ;;  %v1097_v35 = vor.u32 %v1196_v24, %v1094_v25 }
  0x2a   :  { %604 = vmatpush.bf16.msrb.mxu2 %v1065_v40  ;;  %339 = vmatmul.bf16.vlgmr.msra.gmra.mxu3 %v1499_v49  ;;  %v1092_v33 = vld [vmem:[#allocation4 + $0xb0] sm:$0xf]  ;;  %v1197_v36 = vld [vmem:[#allocation4 + $0xb4] sm:$0xf0]  ;;  %v1178_v37 = vld [vmem:[#allocation4 + $0x24] sm:$0xf]  ;;  %v1519_v39 = vor.u32 %v1140_v27, %v870_v28  ;;  %v1029_v42 = vor.u32 %v1181_v32, %v1028_v31 }
  0x2b   :  { %623 = vmatpush.bf16.msrb.mxu3 %v1129_v45  ;;  %v1022_v38 = vld [vmem:[#allocation4 + $0x28] sm:$0xf0]  ;;  %v1194_v40 = vld [vmem:[#allocation4 + $0xa4] sm:$0xf]  ;;  %v1093_v43 = vor.u32 %v1197_v36, %v1092_v33  ;;  %v1020_v46 = vld [vmem:[#allocation4 + $0x20] sm:$0xf] }
  0x2c   :  { %567 = vmatpush.bf16.msrb.mxu0 %v1053_v0  ;;  %v1086_v41 = vld [vmem:[#allocation4 + $0xa8] sm:$0xf0]  ;;  %v1025_v45 = vor.u32 %v1178_v37, %v1022_v38  ;;  %v1179_v47 = vld [vmem:[#allocation4 + $0x24] sm:$0xf0]  ;;  %v1084_v48 = vld [vmem:[#allocation4 + $0xa0] sm:$0xf] }
  0x2d   :  { %586 = vmatpush.bf16.msrb.mxu1 %v1117_v1  ;;  %v1089_v50 = vor.u32 %v1194_v40, %v1086_v41  ;;  %v1195_v51 = vld [vmem:[#allocation4 + $0xa4] sm:$0xf0]  ;;  %v1176_v52 = vld [vmem:[#allocation4 + $0x14] sm:$0xf]  ;;  %v1014_v53 = vld [vmem:[#allocation4 + $0x18] sm:$0xf0]  ;;  %v1021_v56 = vor.u32 %v1179_v47, %v1020_v46 }
  0x2e   :  { %605 = vmatpush.bf16.msrb.mxu2 %v1057_v54  ;;  %v1192_v54 = vld [vmem:[#allocation4 + $0x94] sm:$0xf]  ;;  %v1078_v55 = vld [vmem:[#allocation4 + $0x98] sm:$0xf0]  ;;  %v1085_v57 = vor.u32 %v1195_v51, %v1084_v48  ;;  %v1012_v59 = vld [vmem:[#allocation4 + $0x10] sm:$0xf] }
  0x2f   :  { %624 = vmatpush.bf16.msrb.mxu3 %v1121_v58  ;;  %v1017_v58 = vor.u32 %v1176_v52, %v1014_v53  ;;  %v1177_v60 = vld [vmem:[#allocation4 + $0x14] sm:$0xf0]  ;;  %v1076_v61 = vld [vmem:[#allocation4 + $0x90] sm:$0xf]  ;;  %v1081_v62 = vor.u32 %v1192_v54, %v1078_v55  ;;  %v1174_v0 = vld [vmem:[#allocation4 + $0x4] sm:$0xf] }
  0x30   :  { %568 = vmatpush.bf16.msrb.mxu0 %v1045_v12  ;;  %v1193_v63 = vld [vmem:[#allocation4 + $0x94] sm:$0xf0]  ;;  %v1006_v1 = vld [vmem:[#allocation4 + $0x8] sm:$0xf0]  ;;  %v1013_v4 = vor.u32 %v1177_v60, %v1012_v59  ;;  %v1004_v7 = vld [vmem:[#allocation4] sm:$0xf] }
  0x31   :  { %587 = vmatpush.bf16.msrb.mxu1 %v1109_v14  ;;  %v1070_v3 = vld [vmem:[#allocation4 + $0x88] sm:$0xf0]  ;;  %v1077_v5 = vor.u32 %v1193_v63, %v1076_v61  ;;  %v1175_v8 = vld [vmem:[#allocation4 + $0x4] sm:$0xf0]  ;;  %v1068_v10 = vld [vmem:[#allocation4 + $0x80] sm:$0xf] }
  0x32   :  { %606 = vmatpush.bf16.msrb.mxu2 %v1049_v2  ;;  %v1190_v2 = vld [vmem:[#allocation4 + $0x84] sm:$0xf]  ;;  %v1191_v11 = vld [vmem:[#allocation4 + $0x84] sm:$0xf0]  ;;  %v1005_v12 = vor.u32 %v1175_v8, %v1004_v7 }
  0x33   :  { %625 = vmatpush.bf16.msrb.mxu3 %v1113_v6  ;;  %v1009_v6 = vor.u32 %v1174_v0, %v1006_v1  ;;  %v1073_v9 = vor.u32 %v1190_v2, %v1070_v3  ;;  %v1069_v13 = vor.u32 %v1191_v11, %v1068_v10 }
  0x34   :  { %569 = vmatpush.bf16.msrb.mxu0 %v1037_v26 }
  0x35   :  { %588 = vmatpush.bf16.msrb.mxu1 %v1101_v29 }
  0x36   :  { %607 = vmatpush.bf16.msrb.mxu2 %v1041_v15 }
  0x37   :  { %626 = vmatpush.bf16.msrb.mxu3 %v1105_v19  ;;  %287 = vmatmul.bf16.gmra.mxu0 %v1517_v34 }
  0x38   :  { %306 = vmatmul.bf16.gmra.mxu1 %v1519_v39  ;;  %570 = vmatpush.bf16.msrb.mxu0 %v1029_v42 }
  0x39   :  { %325 = vmatmul.bf16.gmra.mxu2 %v1517_v34  ;;  %589 = vmatpush.bf16.msrb.mxu1 %v1093_v43 }
  0x3a   :  { %608 = vmatpush.bf16.msrb.mxu2 %v1033_v30  ;;  %344 = vmatmul.bf16.gmra.mxu3 %v1519_v39 }
  0x3b   :  { %627 = vmatpush.bf16.msrb.mxu3 %v1097_v35 }
  0x3c   :  { %571 = vmatpush.bf16.msrb.mxu0 %v1021_v56 }
  0x3d   :  { %590 = vmatpush.bf16.msrb.mxu1 %v1085_v57 }
  0x3e   :  { %609 = vmatpush.bf16.msrb.mxu2 %v1025_v45 }
  0x3f   :  { %628 = vmatpush.bf16.msrb.mxu3 %v1089_v50 }
  0x40   :  { %572 = vmatpush.bf16.msrb.mxu0 %v1013_v4 }
  0x41   :  { %591 = vmatpush.bf16.msrb.mxu1 %v1077_v5 }
  0x42   :  { %610 = vmatpush.bf16.msrb.mxu2 %v1017_v58 }
  0x43   :  { %629 = vmatpush.bf16.msrb.mxu3 %v1081_v62 }
  0x44   :  { %573 = vmatpush.bf16.msrb.mxu0 %v1005_v12 }
  0x45   :  { %592 = vmatpush.bf16.msrb.mxu1 %v1069_v13 }
  0x46   :  { %611 = vmatpush.bf16.msrb.mxu2 %v1009_v6 }
  0x47   :  { %630 = vmatpush.bf16.msrb.mxu3 %v1073_v9  ;;  %574 = vmatmul.bf16.vlgmr.msrb.gmra.mxu0 %v1497_v44 }
  0x48   :  { %593 = vmatmul.bf16.vlgmr.msrb.gmra.mxu1 %v1499_v49 }
  0x49   :  { %612 = vmatmul.bf16.vlgmr.msrb.gmra.mxu2 %v1497_v44 }
  0x4a   :  { %631 = vmatmul.bf16.vlgmr.msrb.gmra.mxu3 %v1499_v49 }
  0x57   :  { %579 = vmatmul.bf16.gmra.mxu0 %v1517_v34 }
  0x58   :  { %598 = vmatmul.bf16.gmra.mxu1 %v1519_v39 }
  0x59   :  { %617 = vmatmul.bf16.gmra.mxu2 %v1517_v34 }
  0x5a   :  { %636 = vmatmul.bf16.gmra.mxu3 %v1519_v39 }
  0xa4   :  { %v283_v14 = vpop.f32.mrf.mxu0 }
  0xa5   :  { %v302_v15 = vpop.f32.mrf.mxu1 }
  0xa6   :  { %v1533_v16 = vadd.f32 %v302_v15, %v283_v14 }
  0xa8   :  { %v1130_v17 = vmul.f32 -1.442695, %v1533_v16 }
  0xaa   :  { %1209 = vpow2.f32 %v1130_v17 }
  0xac   :  { %v321_v44 = vpop.f32.mrf.mxu2  ;;  %v285_v19 = vpop.f32.mrf.mxu0 }
  0xad   :  { %v340_v18 = vpop.f32.mrf.mxu3  ;;  %v304_v49 = vpop.f32.mrf.mxu1 }
  0xae   :  { %v1536_v20 = vadd.f32 %v340_v18, %v321_v44  ;;  %v1538_v21 = vadd.f32 %v304_v49, %v285_v19 }
  0xb0   :  { %v1131_v22 = vmul.f32 -1.442695, %v1536_v20  ;;  %v1210_v23 = vpop.eup %1209  ;;  %v1132_v24 = vmul.f32 -1.442695, %v1538_v21 }
  0xb1   :  { %v1542_v25 = vadd.f32 1.0, %v1210_v23 }
  0xb2   :  { %1211 = vpow2.f32 %v1131_v22 }
  0xb3   :  { %1213 = vpow2.f32 %v1132_v24  ;;  %vm706_vm0 = vweird.f32 %v1542_v25  ;;  %v710_v59 = vand.u32 2147483647, %v1542_v25  ;;  %v712_v60 = vand.u32 2147483648, %v1542_v25 }
  0xb4   :  { %1215 = vrcp.f32 %v1542_v25  ;;  %v323_v26 = vpop.f32.mrf.mxu2  ;;  %v288_v28 = vpop.f32.mrf.mxu0 }
  0xb5   :  { %v342_v27 = vpop.f32.mrf.mxu3  ;;  %v307_v30 = vpop.f32.mrf.mxu1  ;;  %vm1594_vm3 = vcmp.eq.f32.partialorder %v710_v59, 8.507059e+37  ;;  %v713_v12 = vor.u32 1.1754944e-38, %v712_v60 }
  0xb6   :  { %v1545_v29 = vadd.f32 %v342_v27, %v323_v26  ;;  %v1547_v31 = vadd.f32 %v307_v30, %v288_v28 }
  0xb8   :  { %v1212_v32 = vpop.eup %1211  ;;  %v1133_v33 = vmul.f32 -1.442695, %v1545_v29  ;;  %v1134_v36 = vmul.f32 -1.442695, %v1547_v31 }
  0xb9   :  { %v1214_v34 = vpop.eup %1213  ;;  %v1550_v35 = vadd.f32 1.0, %v1212_v32 }
  0xba   :  { %v1553_v37 = vpop.eup %1215  ;;  %v1555_v38 = vadd.f32 1.0, %v1214_v34  ;;  %1217 = vpow2.f32 %v1133_v33 }
  0xbb   :  { %v702_v39 = vmul.f32 %v1553_v37, %v1542_v25  ;;  %1219 = vrcp.f32 %v1550_v35  ;;  %vm707_vm1 = vweird.f32 %v1553_v37  ;;  %v725_v63 = vand.u32 2147483647, %v1550_v35 }
  0xbc   :  { %1221 = vrcp.f32 %v1555_v38  ;;  %v326_v40 = vpop.f32.mrf.mxu2  ;;  %v290_v42 = vpop.f32.mrf.mxu0  ;;  %v727_v7 = vand.u32 2147483648, %v1550_v35  ;;  %v740_v8 = vand.u32 2147483647, %v1555_v38  ;;  %v742_v14 = vand.u32 2147483648, %v1555_v38  ;;  %vm1606_vm4 = vmor %vm706_vm0, %vm707_vm1 }
  0xbd   :  { %1223 = vpow2.f32 %v1134_v36  ;;  %v345_v41 = vpop.f32.mrf.mxu3  ;;  %v703_v43 = vsub.f32 1.0, %v702_v39  ;;  %v309_v46 = vpop.f32.mrf.mxu1  ;;  %vm721_vm5 = vweird.f32 %v1550_v35  ;;  %vm736_vm6 = vweird.f32 %v1555_v38 }
  0xbe   :  { %v1561_v45 = vadd.f32 %v345_v41, %v326_v40  ;;  %v1563_v47 = vadd.f32 %v309_v46, %v290_v42  ;;  %vm1624_vm8 = vcmp.eq.f32.partialorder %v725_v63, 8.507059e+37  ;;  %v728_v26 = vor.u32 1.1754944e-38, %v727_v7 }
  0xbf   :  { %v704_v54 = vmul.f32 %v1553_v37, %v703_v43  ;;  %vm1634_vm9 = vcmp.eq.f32.partialorder %v740_v8, 8.507059e+37  ;;  %v743_v30 = vor.u32 1.1754944e-38, %v742_v14 }
  0xc0   :  { %v1218_v48 = vpop.eup %1217  ;;  %v1135_v50 = vmul.f32 -1.442695, %v1561_v45  ;;  %v1136_v56 = vmul.f32 -1.442695, %v1563_v47 }
  0xc1   :  { %v1566_v51 = vpop.eup %1219  ;;  %v1568_v52 = vadd.f32 1.0, %v1218_v48  ;;  %v705_v3 = vadd.f32 %v1553_v37, %v704_v54 }
  0xc2   :  { %v1570_v53 = vpop.eup %1221  ;;  %v717_v55 = vmul.f32 %v1566_v51, %v1550_v35  ;;  %1225 = vpow2.f32 %v1135_v50  ;;  %vm722_vm2 = vweird.f32 %v1566_v51 }
  0xc3   :  { %v1224_v57 = vpop.eup %1223  ;;  %v732_v58 = vmul.f32 %v1570_v53, %v1555_v38  ;;  %1227 = vrcp.f32 %v1568_v52  ;;  %v709_v19 = vsel %vm1606_vm4, %v1553_v37, %v705_v3  ;;  %vm1620_vm7 = vmor %vm721_vm5, %vm722_vm2  ;;  %vm737_vm10 = vweird.f32 %v1570_v53 }
  0xc4   :  { %v718_v61 = vsub.f32 1.0, %v717_v55  ;;  %v328_v62 = vpop.f32.mrf.mxu2  ;;  %v1584_v1 = vadd.f32 1.0, %v1224_v57  ;;  %1229 = vpow2.f32 %v1136_v56  ;;  %v575_v6 = vpop.f32.mrf.mxu0  ;;  %v755_v33 = vand.u32 2147483647, %v1568_v52  ;;  %vm1662_vm13 = vmor %vm736_vm6, %vm737_vm10 }
  0xc5   :  { %v733_v0 = vsub.f32 1.0, %v732_v58  ;;  %v347_v2 = vpop.f32.mrf.mxu3  ;;  %v594_v9 = vpop.f32.mrf.mxu1  ;;  %v714_v36 = vsel %vm1594_vm3, %v713_v12, %v709_v19  ;;  %v757_v39 = vand.u32 2147483648, %v1568_v52  ;;  %vm751_vm11 = vweird.f32 %v1568_v52 }
  0xc6   :  { %v719_v4 = vmul.f32 %v1566_v51, %v718_v61  ;;  %v1588_v5 = vadd.f32 %v347_v2, %v328_v62  ;;  %1231 = vrcp.f32 %v1584_v1  ;;  %v595_v48 = vadd.f32 %v594_v9, %v575_v6 }
  0xc7   :  { %v734_v44 = vmul.f32 %v1570_v53, %v733_v0  ;;  %v821_v54 = vmul.f32 %v714_v36, %v1533_v16  ;;  %vm1667_vm14 = vcmp.eq.f32.partialorder %v755_v33, 8.507059e+37  ;;  %v758_v61 = vor.u32 1.1754944e-38, %v757_v39 }
  0xc8   :  { %v1226_v10 = vpop.eup %1225  ;;  %v720_v13 = vadd.f32 %v1566_v51, %v719_v4  ;;  %v1137_v24 = vmul.f32 -1.442695, %v1588_v5  ;;  %vm766_vm0 = vweird.f32 %v1584_v1  ;;  %v772_v7 = vand.u32 2147483648, %v1584_v1 }
  0xc9   :  { %v1600_v15 = vpop.eup %1227  ;;  %v1613_v18 = vadd.f32 1.0, %v1226_v10  ;;  %v735_v37 = vadd.f32 %v1570_v53, %v734_v44  ;;  %v837_v2 = vmul.f32 %v821_v54, %v595_v48 }
  0xca   :  { %v747_v23 = vmul.f32 %v1600_v15, %v1568_v52  ;;  %v724_v25 = vsel %vm1620_vm7, %v1566_v51, %v720_v13  ;;  %v1230_v28 = vpop.eup %1229  ;;  %vm752_vm12 = vweird.f32 %v1600_v15 }
  0xcb   :  { %1233 = vrcp.f32 %v1613_v18  ;;  %v1647_v40 = vadd.f32 1.0, %v1230_v28  ;;  %v729_v42 = vsel %vm1624_vm8, %v728_v26, %v724_v25  ;;  %v739_v16 = vsel %vm1662_vm13, %v1570_v53, %v735_v37  ;;  %vm1679_vm15 = vmor %vm751_vm11, %vm752_vm12 }
  0xcc   :  { %v748_v32 = vsub.f32 1.0, %v747_v23  ;;  %v613_v34 = vpop.f32.mrf.mxu2  ;;  %v1641_v35 = vpop.eup %1231  ;;  %1235 = vpow2.f32 %v1137_v24  ;;  %v822_v60 = vmul.f32 %v729_v42, %v1536_v20  ;;  %v770_v20 = vand.u32 2147483647, %v1584_v1 }
  0xcd   :  { %v632_v41 = vpop.f32.mrf.mxu3  ;;  %v762_v46 = vmul.f32 %v1641_v35, %v1584_v1  ;;  %1237 = vrcp.f32 %v1647_v40  ;;  %v577_v50 = vpop.f32.mrf.mxu0  ;;  %vm767_vm1 = vweird.f32 %v1641_v35  ;;  %v744_v4 = vsel %vm1634_vm9, %v743_v30, %v739_v16 }
  0xce   :  { %v749_v43 = vmul.f32 %v1600_v15, %v748_v32  ;;  %v596_v51 = vpop.f32.mrf.mxu1  ;;  %v633_v38 = vadd.f32 %v632_v41, %v613_v34  ;;  %v785_v11 = vand.u32 2147483647, %v1613_v18  ;;  %v787_v12 = vand.u32 2147483648, %v1613_v18  ;;  %vm1707_vm2 = vmor %vm766_vm0, %vm767_vm1 }
  0xcf   :  { %v763_v58 = vsub.f32 1.0, %v762_v46  ;;  %vm771_vm4 = vcmp.eq.f32.partialorder %v770_v20, 8.507059e+37  ;;  %v597_v1 = vadd.f32 %v596_v51, %v577_v50  ;;  %v773_v23 = vor.u32 1.1754944e-38, %v772_v7 }
  0xd0   :  { %v750_v56 = vadd.f32 %v1600_v15, %v749_v43  ;;  %v838_v52 = vmul.f32 %v822_v60, %v633_v38  ;;  %vm781_vm5 = vweird.f32 %v1613_v18  ;;  %v823_v26 = vmul.f32 %v744_v4, %v1538_v21 }
  0xd1   :  { %v1234_v59 = vpop.eup %1233  ;;  %v764_v63 = vmul.f32 %v1641_v35, %v763_v58  ;;  %v788_v28 = vor.u32 1.1754944e-38, %v787_v12  ;;  %vm786_vm7 = vcmp.eq.f32.partialorder %v785_v11, 8.507059e+37  ;;  %vm796_vm9 = vweird.f32 %v1647_v40 }
  0xd2   :  { %v777_v0 = vmul.f32 %v1234_v59, %v1613_v18  ;;  %v754_v53 = vsel %vm1679_vm15, %v1600_v15, %v750_v56  ;;  %v1236_v3 = vpop.eup %1235  ;;  %v845_v14 = vpack.c.bf16 %v838_v52, %v837_v2  ;;  %vm782_vm3 = vweird.f32 %v1234_v59 }
  0xd3   :  { %v765_v6 = vadd.f32 %v1641_v35, %v764_v63  ;;  %v1695_v10 = vpop.eup %1237  ;;  %v1699_v13 = vadd.f32 1.0, %v1236_v3  ;;  %v759_v17 = vsel %vm1667_vm14, %v758_v61, %v754_v53  ;;  %vm783_vm6 = vmor %vm781_vm5, %vm782_vm3  ;;  %v839_v39 = vmul.f32 %v823_v26, %v597_v1 }
  0xd4   :  { %v778_v8 = vsub.f32 1.0, %v777_v0  ;;  %v615_v9 = vpop.f32.mrf.mxu2  ;;  %v792_v49 = vmul.f32 %v1695_v10, %v1647_v40  ;;  %849 = vst [vmem:[%s1756_s3] sm:$0xff] %v845_v14  ;;  %v824_v27 = vmul.f32 %v759_v17, %v1545_v29  ;;  %vm797_vm8 = vweird.f32 %v1695_v10 }
  0xd5   :  { %v634_v15 = vpop.f32.mrf.mxu3  ;;  %v769_v22 = vsel %vm1707_vm2, %v1641_v35, %v765_v6  ;;  %1239 = vrcp.f32 %v1699_v13  ;;  %v580_v32 = vpop.f32.mrf.mxu0  ;;  %v802_v55 = vand.u32 2147483648, %v1647_v40  ;;  %vm1735_vm10 = vmor %vm796_vm9, %vm797_vm8  ;;  %v817_v60 = vand.u32 2147483648, %v1699_v13 }
  0xd6   :  { %v779_v19 = vmul.f32 %v1234_v59, %v778_v8  ;;  %v793_v25 = vsub.f32 1.0, %v792_v49  ;;  %v635_v30 = vadd.f32 %v634_v15, %v615_v9  ;;  %v599_v33 = vpop.f32.mrf.mxu1  ;;  %v774_v34 = vsel %vm771_vm4, %v773_v23, %v769_v22 }
  0xd7   :  { %v600_v42 = vadd.f32 %v599_v33, %v580_v32  ;;  %v825_v21 = vmul.f32 %v774_v34, %v1547_v31  ;;  %v800_v31 = vand.u32 2147483647, %v1647_v40  ;;  %v803_v62 = vor.u32 1.1754944e-38, %v802_v55 }
  0xd8   :  { %v780_v24 = vadd.f32 %v1234_v59, %v779_v19  ;;  %v794_v36 = vmul.f32 %v1695_v10, %v793_v25  ;;  %v840_v41 = vmul.f32 %v824_v27, %v635_v30  ;;  %vm811_vm13 = vweird.f32 %v1699_v13 }
  0xd9   :  { %v841_v57 = vmul.f32 %v825_v21, %v600_v42  ;;  %vm801_vm12 = vcmp.eq.f32.partialorder %v800_v31, 8.507059e+37  ;;  %v818_v2 = vor.u32 1.1754944e-38, %v817_v60 }
  0xda   :  { %v784_v35 = vsel %vm783_vm6, %v1234_v59, %v780_v24  ;;  %v846_v29 = vpack.c.bf16 %v840_v41, %v839_v39  ;;  %v795_v50 = vadd.f32 %v1695_v10, %v794_v36  ;;  %v815_v59 = vand.u32 2147483647, %v1699_v13 }
  0xdb   :  { %v789_v37 = vsel %vm786_vm7, %v788_v28, %v784_v35  ;;  %v1240_v43 = vpop.eup %1239 }
  0xdc   :  { %v618_v18 = vpop.f32.mrf.mxu2  ;;  %v826_v48 = vmul.f32 %v789_v37, %v1561_v45  ;;  %v807_v51 = vmul.f32 %v1240_v43, %v1699_v13  ;;  %850 = vst [vmem:[%s1756_s3 + $0x8] sm:$0xff] %v846_v29  ;;  %v799_v16 = vsel %vm1735_vm10, %v1695_v10, %v795_v50  ;;  %vm812_vm11 = vweird.f32 %v1240_v43 }
  0xdd   :  { %v637_v46 = vpop.f32.mrf.mxu3  ;;  %v582_v40 = vpop.f32.mrf.mxu0  ;;  %v804_v53 = vsel %vm801_vm12, %v803_v62, %v799_v16  ;;  %vm813_vm14 = vmor %vm811_vm13, %vm812_vm11  ;;  %vm816_vm15 = vcmp.eq.f32.partialorder %v815_v59, 8.507059e+37 }
  0xde   :  { %v638_v54 = vadd.f32 %v637_v46, %v618_v18  ;;  %v808_v56 = vsub.f32 1.0, %v807_v51  ;;  %v601_v63 = vpop.f32.mrf.mxu1  ;;  %v827_v8 = vmul.f32 %v804_v53, %v1563_v47 }
  0xdf   :  { %v602_v4 = vadd.f32 %v601_v63, %v582_v40 }
  0xe0   :  { %v842_v58 = vmul.f32 %v826_v48, %v638_v54  ;;  %v809_v61 = vmul.f32 %v1240_v43, %v808_v56 }
  0xe1   :  { %v843_v10 = vmul.f32 %v827_v8, %v602_v4 }
  0xe2   :  { %v847_v38 = vpack.c.bf16 %v842_v58, %v841_v57  ;;  %v810_v20 = vadd.f32 %v1240_v43, %v809_v61 }
  0xe4   :  { %851 = vst [vmem:[%s1756_s3 + $0x10] sm:$0xff] %v847_v38  ;;  %v620_v0 = vpop.f32.mrf.mxu2  ;;  %v814_v3 = vsel %vm813_vm14, %v1240_v43, %v810_v20 }
  0xe5   :  { %v639_v52 = vpop.f32.mrf.mxu3  ;;  %v819_v7 = vsel %vm816_vm15, %v818_v2, %v814_v3 }
  0xe6   :  { %v640_v6 = vadd.f32 %v639_v52, %v620_v0  ;;  %v828_v9 = vmul.f32 %v819_v7, %v1588_v5 }
  0xe8   :  { %v844_v11 = vmul.f32 %v828_v9, %v640_v6 }
  0xea   :  { %v848_v12 = vpack.c.bf16 %v844_v11, %v843_v10 }
  0xec   :  { %852 = vst [vmem:[%s1756_s3 + $0x18] sm:$0xff] %v848_v12 }
  0xed   :  { %857 = vsyncpa [#allocation5], 1 }

// kernel: model_forward.26
= control target key start
LH: loop header
LB: loop body
LE: loop exit
PB: predicated region body
PF: predicated region fallthrough
CT: control target
= control target key end

     0   :  { %12 = vsyncpa [#allocation4], 0  ;;  %s2119_s0 = inlined_call_operand.vmem [shape: bf16[2,16,96], index: 0, kind: input, shape index: {}]   ;;  %s2120_s1 = inlined_call_operand.vmem [shape: f32[2,16,4], index: 1, kind: input, shape index: {}]   ;;  %s2121_s2 = inlined_call_operand.vmem [shape: f32[32,4], index: 2, kind: input, shape index: {}]   ;;  %s2122_s3 = inlined_call_operand.vmem [shape: f32[4,32], index: 3, kind: input, shape index: {}]   ;;  %s2123_s4 = inlined_call_operand.vmem [shape: f32[1,32], index: 4, kind: input, shape index: {}]   ;;  %s2124_s5 = inlined_call_operand.vmem [shape: bf16[2,16,32], index: 5, kind: output, shape index: {0}]   ;;  %s2125_s6 = inlined_call_operand.hbm [shape: f32[2,4,8,8], index: 6, kind: output, shape index: {1}]  }
   0x1   :  { %14 = vsyncpa [#allocation4 + $0x1], 0  ;;  %s1742_s21 = smov 0   ;;  %s1744_s22 = smov 0  }
   0x2   :  { %s1746_s23 = smov 0   ;;  %s1748_s24 = smov 0  }
   0x3   :  { %s1750_s25 = smov 0   ;;  %s1752_s26 = smov 0  }
   0x4   :  { %s1754_s27 = smov 0   ;;  %s1756_s28 = smov 0  }
   0x5 LB: > { %2131 = sst [smem:[#allocation6_spill]] %s1673_s23  ;;  %s1458_s29 = sadd.s32 4294967295, %s1693_s28   ;;  %s1693_s28 = sphi %s1756_s28, %s20_s28   ;;  %s1689_s27 = sphi %s1754_s27, %s2145_s27   ;;  %s1685_s26 = sphi %s1752_s26, %s2144_s26   ;;  %s1681_s25 = sphi %s1750_s25, %s2143_s25   ;;  %s1677_s24 = sphi %s1748_s24, %s2142_s24   ;;  %s1673_s23 = sphi %s1746_s23, %s2141_s23   ;;  %s1669_s22 = sphi %s1744_s22, %s2147_s22   ;;  %s1665_s21 = sphi %s1742_s21, %s2146_s21  }
   0x6   : > { %2132 = sst [smem:[#allocation7_spill]] %s1685_s26  ;;  %s1459_s30 = sadd.s32 4294967294, %s1693_s28  }
   0x7   : > { %2133 = sst [smem:[#allocation8_spill]] %s1689_s27  ;;  %s29_s7 = sadd.s32 1, %s1685_s26 }
   0x8   : > { %p30_p0 = scmp.ge.s32.totalorder %s29_s7, 2  ;;  %s32_s8 = sadd.s32 1, %s1689_s27 }
   0x9   : > { %p196_p1 = scmp.ne.s32.totalorder %s1673_s23, %s1669_s22  ;;  %p197_p2 = scmp.eq.s32.totalorder %s1458_s29, 3 }
   0xa   : > { %s2149_s7 = smov (%p30_p0, %s29_s7), 0  ;;  %s2151_s8 = smov (!%p30_p0, %s32_s8), %s1689_s27 }
   0xb   : > { %2134 = sst [smem:[#allocation9_spill]] %s2149_s7  ;;  %p1791_p3 = por %p197_p2, %p196_p1 }
   0xc   : > { %p202_p4 = scmp.ne.s32.totalorder %s1669_s22, %s1665_s21  ;;  %p34_p5 = scmp.ge.s32.totalorder %s2151_s8, 2 }
   0xd   : > { %p203_p6 = scmp.eq.s32.totalorder %s1459_s30, 3  ;;  %p1462_p7 = scmp.ge.s32.totalorder %s1693_s28, 1 }
   0xe   : > { %p252_p8 = scmp.lt.s32.totalorder %s1693_s28, 5  ;;  %s2153_s8 = smov (%p34_p5, %s2151_s8), 0 }
   0xf   : > { %2136 = sst [smem:[#allocation10_spill]] %s2153_s8  ;;  %p1801_p9 = por %p203_p6, %p202_p4 }
  0x10   : > { %p253_p10 = pnand %p1462_p7, %p252_p8  ;;  %s183_s11 = ssub.s32 %s1689_s27, %s2153_s8 }
  0x11   : > { %s186_s12 = sadd.s32 1, %s1673_s23  ;;  %p184_p11 = scmp.eq.s32.totalorder %s183_s11, 0 }
  0x12   : > { %256 = sbr.rel (%p253_p10) target bundleno = 1717 (0x6b5), region = 40  ;;  %s2129_s14 = sand.u32 (!%p253_p10), 1, %s1669_s22  }
  0x13   : > { %s1809_s13 = scalar_select %p184_p11, %s1673_s23, %s186_s12  }
  0x14   : > { %p301_p12 = scmp.lt.s32.totalorder (!%p253_p10), %s1681_s25, 1  ;;  %s1463_s15 = sshll.u32 (!%p253_p10), %s2129_s14, 5 }
  0x15   : > { %2138 = sst [smem:[#allocation11_spill]] %s1809_s13  ;;  %p303_p13 = scmp.lt.s32.totalorder (!%p253_p10), %s1677_s24, 1 }
  0x16   : > { %s1831_s23 = scalar_lea.vmem (!%p253_p10), [#allocation3], %s1463_s15  ;;  %p1470_p0 = scmp.ne.s32.totalorder (!%p253_p10), %s1677_s24, 0 }
  0x17   : > { %s302_s16 = scalar_select %p301_p12, %s1681_s25, 1 }
  0x18   : > { %s304_s17 = scalar_select %p303_p13, %s1677_s24, 1 }
  0x19   : > { %s1464_s18 = sshll.u32 %s302_s16, 1  ;;  %328 = sbr.rel (%p1470_p0) target bundleno = 36 (0x24), region = 44 }
  0x1a   : > { %s306_s19 = sadd.s32 %s1464_s18, %s304_s17 }
  0x1b   : > { %s1465_s20 = sshll.u32 %s306_s19, 2  ;;  %s1467_s29 = sshll.u32 %s306_s19, 3 }
  0x1c   : > { %s308_s12 = scalar_lea.vmem %s2119_s0, %s1465_s20  ;;  %s1824_s27 = scalar_lea.vmem %s2120_s1, %s1467_s29 }
  0x1d   : > { %s1829_s14 = scalar_lea.vmem %s2124_s5, %s1465_s20 }
  0x1e   : > { %vm329_vm0 = vcmask 64512   ;;  %v1695_v0 = vmov 0.0   ;;  %vm334_vm1 = vcmask 253952  }
  0x1f   : > { %330 = vst.msk [vmem:[%s1831_s23] sm:$0xff] %vm329_vm0, %v1695_v0 }
  0x20   : > { %331 = vst.msk [vmem:[%s1831_s23 + $0x8] sm:$0xff] %vm329_vm0, %v1695_v0 }
  0x21   : > { %332 = vst.msk [vmem:[%s1831_s23 + $0x10] sm:$0xff] %vm329_vm0, %v1695_v0 }
  0x22   : > { %333 = vst.msk [vmem:[%s1831_s23 + $0x18] sm:$0xff] %vm329_vm0, %v1695_v0 }
  0x23   : > { %335 = vst.msk [vmem:[#allocation2] sm:$0x1] %vm334_vm1, %v1695_v0 }
  0x24 PF: > { %v341_v1 = vld [vmem:[%s308_s12] sm:$0xf]  ;;  %v1841_v2 = vld [vmem:[%s2121_s2 + $0x18] sm:$0xff]  ;;  %v1846_v3 = vld [vmem:[%s2121_s2 + $0x10] sm:$0xff]  ;;  %s1696_s17 = smov 96   ;;  %vm350_vm2 = vcmask 261120   ;;  %v343_v43 = vlaneseq }
  0x25   : > { %v1848_v4 = vunpack.c.l.bf16 %v341_v1  ;;  %432 = vmatpush.msra.mxu2 %v1841_v2  ;;  %366 = vmatpush.msra.mxu0 %v1841_v2  ;;  %v1855_v5 = vld [vmem:[%s2121_s2 + $0x8] sm:$0xff]  ;;  %v1867_v7 = vld [vmem:[%s2121_s2] sm:$0xff]  ;;  %vm388_vm3 = vcmask 1043456   ;;  %vm384_vm5 = vcmask 31744   ;;  %s1471_s30 = sshll.u32 %s1677_s24, 3  ;;  %s1698_s24 = smov 64  }
  0x26   : > { %v479_v9 = vld [vmem:[%s1824_s27] sm:$0xff]  ;;  %s1697_s27 = smov 32   ;;  %v1891_v44 = vshrl.u32 %v343_v43, 7  ;;  %v346_v45 = vstv %s1471_s30  ;;  %s1699_s11 = smov 112   ;;  %v1922_v0 = vand.u32 127, %v343_v43  ;;  %vm570_vm1 = vcmask 64512  }
  0x27   : > { %v349_v6 = vmul.f32 %v1848_v4, %v1848_v4  ;;  %433 = vmatpush.msra.mxu2 %v1846_v3  ;;  %367 = vmatpush.msra.mxu0 %v1846_v3  ;;  %v1478_v10 = vmul.f32 -1.442695, %v479_v9  ;;  %v1877_v18 = vld [vmem:[%s2122_s3] sm:$0xf]  ;;  %s1700_s12 = smov 120   ;;  %s1701_s26 = smov 104  }
  0x28   : > { %1476 = vmatpush.msk.msra.mxu3 %vm388_vm3, %v1877_v18  ;;  %1473 = vmatpush.msk.msra.mxu1 %vm388_vm3, %v1877_v18  ;;  %v347_v46 = vadd.s32 %v346_v45, %v1891_v44  ;;  %vm566_vm0 = vcmp.gt.s32.totalorder %v1891_v44, %v1922_v0  ;;  %v1702_v9 = vmov 1983009808   ;;  %s1503_s13 = sshll.u32 %s1681_s25, 5  ;;  %s1322_s18 = sshll.u32 %s1831_s23, 4  ;;  %s1323_s18 = int_to_ptr.vmem [resolvable:$true] %s1322_s18 }
  0x29   : > { %416 = vrot.lane.b32.xlu0 %v349_v6, %s1696_s17  ;;  %434 = vmatpush.msra.mxu2 %v1855_v5 }
  0x2a   : > { %368 = vmatpush.msra.mxu0 %v1855_v5  ;;  %1479 = vmatpush.msk.msrb.mxu1 %vm388_vm3, %v1877_v18  ;;  %vm348_vm15 = vcmp.lt.s32.totalorder %v347_v46, 16 }
  0x2b   : > { %435 = vmatpush.msra.mxu2 %v1867_v7 }
  0x2c   : > { %369 = vmatpush.msra.mxu0 %v1867_v7 }
  0x2d   : > { %1472 = vmatmul.msk.f32.vlgmr.msra.gmra.mxu0 %vm350_vm2, %v349_v6 }
  0x9b   : > { %v417_v8 = vpop.permute.xlu0 %416 }
  0x9c   : > { %1475 = vmatmul.msk.f32.vlgmr.msra.gmra.mxu2 %vm350_vm2, %v417_v8 }
  0xaa   : > { %v371_v11 = vpop.f32.mrf.mxu0 }
  0xab   : > { %1589 = vrsqrt.f32 %v371_v11  ;;  %vm380_vm4 = vweird.f32 %v371_v11 }
  0xac   : > { %1591 = vpow2.f32 %v1478_v10  ;;  %v842_v10 = vunpack.c.l.s4 %v1702_v9 }
  0xb1   : > { %v1590_v12 = vpop.eup %1589 }
  0xb2   : > { %v1592_v13 = vpop.eup %1591  ;;  %v375_v14 = vmul.f32 %v1590_v12, %v371_v11  ;;  %vm381_vm6 = vweird.f32 %v1590_v12 }
  0xb3   : > { %v483_v15 = vadd.f32 1.0, %v1592_v13  ;;  %vm382_vm7 = vmor %vm380_vm4, %vm381_vm6  ;;  %vm837_vm4 = vcmask 1047556   ;;  %v1930_v13 = vunpack.c.0.s8 %v842_v10  ;;  %vm563_vm6 = vcmp.eq.s32.totalorder %v1891_v44, %v1922_v0 }
  0xb4   : > { %v376_v16 = vmul.f32 %v1590_v12, %v375_v14 }
  0xb5   : > { %1593 = vrcp.f32 %v483_v15  ;;  %v495_v24 = vand.u32 2147483648, %v483_v15  ;;  %vm489_vm8 = vweird.f32 %v483_v15  ;;  %v493_v26 = vand.u32 2147483647, %v483_v15 }
  0xb6   : > { %v377_v17 = vmul.f32 0.5, %v376_v16 }
  0xb7   : > { %v496_v28 = vor.u32 1.1754944e-38, %v495_v24  ;;  %vm494_vm11 = vcmp.eq.f32.partialorder %v493_v26, 8.507059e+37 }
  0xb8   : > { %v378_v19 = vsub.f32 1.5, %v377_v17  ;;  %v1703_v17 = vmov 1934713408  }
  0xba   : > { %v379_v20 = vmul.f32 %v1590_v12, %v378_v19  ;;  %v866_v19 = vunpack.c.l.s4 %v1703_v17 }
  0xbb   : > { %v1594_v21 = vpop.eup %1593 }
  0xbc   : > { %v383_v22 = vsel %vm382_vm7, %v1590_v12, %v379_v20  ;;  %v485_v23 = vmul.f32 %v1594_v21, %v483_v15  ;;  %vm490_vm9 = vweird.f32 %v1594_v21  ;;  %v1936_v24 = vunpack.c.0.s8 %v866_v19 }
  0xbd   : > { %1474 = vmatmul.msk.f32.vlgmr.msra.gmra.mxu1 %vm384_vm5, %v383_v22  ;;  %vm491_vm10 = vmor %vm489_vm8, %vm490_vm9  ;;  %vm806_vm9 = vcmask 523520  }
  0xbe   : > { %v486_v25 = vsub.f32 1.0, %v485_v23 }
  0xc0   : > { %v487_v27 = vmul.f32 %v1594_v21, %v486_v25 }
  0xc2   : > { %v488_v29 = vadd.f32 %v1594_v21, %v487_v27 }
  0xc4   : > { %v492_v30 = vsel %vm491_vm10, %v1594_v21, %v488_v29 }
  0xc5   : > { %v497_v31 = vsel %vm494_vm11, %v496_v28, %v492_v30 }
  0xc6   : > { %1480 = vmatmul.msk.f32.vlgmr.msrb.gmra.mxu1 %vm384_vm5, %v497_v31 }
 0x11f   : > { %v437_v32 = vpop.f32.mrf.mxu2 }
 0x120   : > { %1595 = vrsqrt.f32 %v437_v32  ;;  %vm446_vm13 = vweird.f32 %v437_v32 }
 0x126   : > { %v1596_v33 = vpop.eup %1595 }
 0x127   : > { %v441_v34 = vmul.f32 %v1596_v33, %v437_v32  ;;  %vm447_vm12 = vweird.f32 %v1596_v33 }
 0x128   : > { %vm448_vm14 = vmor %vm446_vm13, %vm447_vm12 }
 0x129   : > { %v442_v35 = vmul.f32 %v1596_v33, %v441_v34 }
 0x12b   : > { %v443_v36 = vmul.f32 0.5, %v442_v35 }
 0x12d   : > { %v444_v37 = vsub.f32 1.5, %v443_v36 }
 0x12f   : > { %v445_v38 = vmul.f32 %v1596_v33, %v444_v37 }
 0x131   : > { %v449_v39 = vsel %vm448_vm14, %v1596_v33, %v445_v38 }
 0x132   : > { %1477 = vmatmul.msk.f32.vlgmr.msra.gmra.mxu3 %vm384_vm5, %v449_v39 }
 0x13a   : > { %v409_v40 = vpop.f32.mrf.mxu1 }
 0x13b   : > { %v412_v55 = vmul.f32 %v409_v40, %v1848_v4 }
 0x13d   : > { %v1911_v56 = vsel %vm348_vm15, %v412_v55, 0.0 }
 0x143   : > { %v519_v41 = vpop.f32.mrf.mxu1 }
 0x144   : > { %523 = vrot.lane.b32.xlu1 %v519_v41, %s1697_s27 }
 0x1b5   : > { %v470_v42 = vpop.f32.mrf.mxu3 }
 0x1b6   : > { %474 = vrot.lane.b32.xlu0 %v470_v42, %s1697_s27  ;;  %v524_v49 = vpop.permute.xlu1 %523 }
 0x228   : > { %v475_v47 = vpop.permute.xlu0 %474 }
 0x229   : > { %v477_v48 = vmul.f32 %v475_v47, %v1848_v4 }
 0x22b   : > { %v1896_v50 = vsel %vm348_vm15, %v477_v48, 0.0 }
 0x22c   : > { %v526_v51 = vmul.f32 %v524_v49, %v1896_v50  ;;  %535 = vrot.lane.b32.xlu1 %v1896_v50, %s1696_s17 }
 0x22e   : > { %532 = vrot.lane.b32.xlu2 %v526_v51, %s1696_s17 }
 0x236   : > { %527 = vrot.lane.b32.xlu2 %v519_v41, %s1698_s24 }
 0x23e   : > { %823 = vrot.lane.b32.xlu2 %v1896_v50, %s1699_s11 }
 0x246   : > { %821 = vrot.lane.b32.xlu2 %v1896_v50, %s1700_s12 }
 0x288   : > { %v533_v52 = vpop.permute.xlu2 %532 }
 0x290   : > { %v528_v53 = vpop.permute.xlu2 %527 }
 0x291   : > { %v530_v54 = vmul.f32 %v528_v53, %v1848_v4 }
 0x293   : > { %694 = vrot.lane.b32.xlu0 %v530_v54, %s1698_s24  ;;  %s1619_s24 = scalar_lea.hbm %s2125_s6, 64 }
 0x298   : > { %v824_v59 = vpop.permute.xlu2 %823 }
 0x29b   : > { %825 = vrot.lane.b32.xlu0 %v1896_v50, %s1701_s26 }
 0x29e   : > { %v536_v57 = vpop.permute.xlu1 %535 }
 0x29f   : > { %1481 = vmatpush.xpose.msk.msrb.mxu3 %vm350_vm2, %v536_v57  ;;  %v723_v58 = vmul.f32 %v536_v57, %v1911_v56  ;;  %v839_v11 = vrot.slane %v536_v57, 4 }
 0x2a0   : > { %v822_v61 = vpop.permute.xlu2 %821 }
 0x2a1   : > { %v724_v60 = vsel %vm350_vm2, %v723_v58, 0.0 }
 0x2a2   : > { %1482 = vmatmul.msk.f32.vlgmr.msrb.gmra.mxu3 %vm350_vm2, %v533_v52  ;;  %725 = vadd.xlane.f32.xlu1 %v724_v60 }
 0x2a3   : > { %829 = vrot.lane.b32.xlu0 %v824_v59, %s1696_s17 }
 0x2ab   : > { %827 = vrot.lane.b32.xlu0 %v822_v61, %s1696_s17 }
 0x305   : > { %v1919_v62 = vpop.permute.xlu0 %694 }
 0x30d   : > { %v826_v63 = vpop.permute.xlu0 %825 }
 0x30e   : > { %831 = vrot.lane.b32.xlu2 %v826_v63, %s1696_s17 }
 0x315   : > { %v830_v8 = vpop.permute.xlu0 %829 }
 0x316   : > { %v836_v12 = vrot.slane %v830_v8, 4  ;;  %v840_v14 = vsel %vm837_vm4, %v830_v8, %v839_v11 }
 0x317   : > { %v848_v20 = vperm.slane %v840_v14, %v1930_v13 }
 0x318   : > { %v838_v16 = vsel %vm837_vm4, %v836_v12, %v536_v57 }
 0x319   : > { %v844_v22 = vperm.slane %v838_v16, %v1930_v13  ;;  %v875_v27 = vrot.slane %v848_v20, 4 }
 0x31b   : > { %v863_v30 = vrot.slane %v844_v22, 4 }
 0x31d   : > { %v828_v15 = vpop.permute.xlu0 %827 }
 0x31e   : > { %v851_v21 = vrot.slane %v828_v15, 4 }
 0x325   : > { %v558_v1 = vpop.f32.mrf.mxu3 }
 0x326   : > { %v567_v4 = vsub.f32 0.0, %v558_v1 }
 0x328   : > { %v1926_v6 = vsel %vm566_vm0, %v567_v4, 0.0  ;;  %1484 = vmatpush.msk.msrb.mxu0 %vm566_vm0, %v567_v4 }
 0x329   : > { %1485 = vmatmul.msk.f32.vlgmr.msrb.gmra.mxu0 %vm570_vm1, %v1926_v6 }
 0x32a   : > { %688 = vmatpush.msra.mxu0 %v533_v52 }
 0x368   : > { %v832_v23 = vpop.permute.xlu2 %831 }
 0x369   : > { %v849_v25 = vrot.slane %v832_v23, 4  ;;  %v852_v26 = vsel %vm837_vm4, %v832_v23, %v851_v21 }
 0x36a   : > { %v860_v28 = vperm.slane %v852_v26, %v1930_v13 }
 0x36b   : > { %v850_v29 = vsel %vm837_vm4, %v849_v25, %v828_v15 }
 0x36c   : > { %v856_v31 = vperm.slane %v850_v29, %v1930_v13  ;;  %v873_v32 = vrot.slane %v860_v28, 4  ;;  %v876_v33 = vsel %vm837_vm4, %v860_v28, %v875_v27  ;;  %v1704_v29 = vmov 0.0  }
 0x36d   : > { %v884_v34 = vperm.slane %v876_v33, %v1936_v24 }
 0x36e   : > { %v861_v35 = vrot.slane %v856_v31, 4  ;;  %v864_v36 = vsel %vm837_vm4, %v856_v31, %v863_v30  ;;  %v874_v37 = vsel %vm837_vm4, %v873_v32, %v848_v20  ;;  %v1483_v30 = vsel %vm563_vm6, 1.0, %v1704_v29 }
 0x36f   : > { %v872_v38 = vperm.slane %v864_v36, %v1936_v24  ;;  %v880_v39 = vperm.slane %v874_v37, %v1936_v24  ;;  %v891_v40 = vrot.slane %v884_v34, 4  ;;  %v569_v31 = vadd.f32 %v1483_v30, %v1926_v6  ;;  %v726_v37 = vpop.xlane.xlu1 %725 }
 0x370   : > { %v862_v41 = vsel %vm837_vm4, %v861_v35, %v844_v22  ;;  %v666_v35 = vmul.f32 2.0, %v1483_v30 }
 0x371   : > { %v868_v42 = vperm.slane %v862_v41, %v1936_v24  ;;  %v887_v43 = vrot.slane %v872_v38, 4  ;;  %v889_v45 = vrot.slane %v880_v39, 4  ;;  %v892_v46 = vsel %vm837_vm4, 0.0, %v891_v40 }
 0x372   : > { %v904_v47 = vsel %vm837_vm4, %v891_v40, %v880_v39  ;;  %v909_v48 = vrot.slane %v892_v46, 4 }
 0x373   : > { %v885_v49 = vrot.slane %v868_v42, 4  ;;  %v888_v51 = vsel %vm837_vm4, 0.0, %v887_v43  ;;  %v890_v52 = vsel %vm837_vm4, 0.0, %v889_v45  ;;  %v893_v53 = vsel %vm837_vm4, %v887_v43, %v868_v42 }
 0x374   : > { %v898_v54 = vrot.slane %v888_v51, 4  ;;  %v897_v55 = vperm.slane %v893_v53, %v1930_v13  ;;  %v908_v57 = vperm.slane %v904_v47, %v1930_v13  ;;  %v910_v58 = vsel %vm837_vm4, %v909_v48, %v890_v52 }
 0x375   : > { %v886_v59 = vsel %vm837_vm4, 0.0, %v885_v49  ;;  %v914_v60 = vperm.slane %v910_v58, %v1930_v13 }
 0x376   : > { %v899_v61 = vsel %vm837_vm4, %v898_v54, %v886_v59  ;;  %v917_v63 = vrot.slane %v897_v55, 4  ;;  %v929_v1 = vrot.slane %v908_v57, 4 }
 0x377   : > { %v903_v4 = vperm.slane %v899_v61, %v1930_v13  ;;  %v927_v8 = vrot.slane %v914_v60, 4 }
 0x378   : > { %v930_v9 = vsel %vm837_vm4, %v914_v60, %v929_v1 }
 0x379   : > { %v915_v10 = vrot.slane %v903_v4, 4  ;;  %v928_v11 = vsel %vm837_vm4, %v927_v8, %v908_v57  ;;  %v918_v12 = vsel %vm837_vm4, %v903_v4, %v917_v63  ;;  %v938_v14 = vperm.slane %v930_v9, %v1936_v24 }
 0x37a   : > { %v934_v15 = vperm.slane %v928_v11, %v1936_v24  ;;  %v926_v16 = vperm.slane %v918_v12, %v1936_v24 }
 0x37b   : > { %v916_v17 = vsel %vm837_vm4, %v915_v10, %v897_v55  ;;  %v943_v19 = vrot.slane %v938_v14, 4 }
 0x37c   : > { %v922_v20 = vperm.slane %v916_v17, %v1936_v24  ;;  %v939_v21 = vrot.slane %v934_v15, 4  ;;  %v945_v22 = vrot.slane %v926_v16, 4 }
 0x37d   : > { %v944_v23 = vsel %vm837_vm4, %v943_v19, %v926_v16 }
 0x37e   : > { %v940_v25 = vsel %vm837_vm4, %v939_v21, %v922_v20  ;;  %v941_v26 = vrot.slane %v922_v20, 4  ;;  %v946_v27 = vsel %vm837_vm4, %v938_v14, %v945_v22 }
 0x37f   : > { %1070 = vxpose.xlu1.b32.start.end [1/1] (short) (narrow) %v940_v25, 8 }
 0x380   : > { %v942_v28 = vsel %vm837_vm4, %v934_v15, %v941_v26 }
 0x3a6   : > { %v591_v32 = vpop.f32.mrf.mxu0 }
 0x3a7   : > { %612 = vmatpush.msrb.mxu2 %v591_v32  ;;  %636 = vmatpush.msra.mxu1 %v591_v32 }
 0x3a8   : > { %1486 = vmatmul.msk.f32.vlgmr.msrb.gmra.mxu2 %vm570_vm1, %v569_v31  ;;  %1487 = vmatmul.msk.f32.vlgmr.msra.gmra.mxu1 %vm570_vm1, %v591_v32 }
 0x3a9   : > { %712 = vmatpush.msra.mxu2 %v1919_v62  ;;  %749 = vmatpush.msrb.mxu1 %v1841_v2 }
 0x3ab   : > { %750 = vmatpush.msrb.mxu1 %v1846_v3  ;;  %v727_v3 = vstv %s1681_s25  ;;  %s2139_s25 = sand.u32 1, %s1669_s22  }
 0x3ac   : > { %vm728_vm7 = vcmp.le.s32.totalorder %v1891_v44, %v727_v3 }
 0x3ad   : > { %751 = vmatpush.msrb.mxu1 %v1855_v5  ;;  %v729_v40 = vsel %vm728_vm7, %v726_v37, 0.0 }
 0x3af   : > { %752 = vmatpush.msrb.mxu1 %v1867_v7  ;;  %v1587_v7 = vld [vmem:[#allocation2] ss:$0 sm:$0xff] }
 0x3b0   : > { %v730_v41 = vmul.f32 %v1587_v7, %v1911_v56 }
 0x425   : > { %v638_v0 = vpop.f32.mrf.mxu1 }
 0x426   : > { %659 = vmatpush.msra.mxu3 %v638_v0 }
 0x428   : > { %1492 = vmatpush.msk.msrb.mxu3 %vm388_vm3, %v1877_v18 }
 0x42b   : > { %v614_v6 = vpop.f32.mrf.mxu2 }
 0x42c   : > { %v617_v33 = vadd.f32 %v614_v6, %v569_v31 }
 0x42e   : > { %1488 = vmatmul.msk.f32.vlgmr.msra.gmra.mxu3 %vm570_vm1, %v617_v33 }
 0x4b1   : > { %v661_v34 = vpop.f32.mrf.mxu3 }
 0x4b2   : > { %v664_v62 = vadd.f32 %v661_v34, %v617_v33 }
 0x4b4   : > { %v665_v2 = vmul.f32 3.0, %v664_v62 }
 0x4b6   : > { %v667_v36 = vsub.f32 %v665_v2, %v666_v35 }
 0x4b8   : > { %1489 = vmatmul.msk.f32.vlgmr.msra.gmra.mxu0 %vm570_vm1, %v667_v36  ;;  %1490 = vmatmul.msk.f32.vlgmr.msra.gmra.mxu2 %vm570_vm1, %v667_v36 }
 0x535   : > { %v690_v5 = vpop.f32.mrf.mxu0 }
 0x536   : > { %v720_v18 = vmul.f32 %v1587_v7, %v690_v5 }
 0x53b   : > { %v714_v38 = vpop.f32.mrf.mxu2 }
 0x53c   : > { %v1991_v39 = vsub.f32 %v714_v38, %v720_v18 }
 0x53e   : > { %953 = vrot.lane.b32.xlu0 %v1991_v39, %s1701_s26  ;;  %950 = vrot.lane.b32.xlu2 %v1991_v39, %s1699_s11  ;;  %v731_v42 = vmul.f32 %v729_v40, %v1991_v39  ;;  %v958_v46 = vrot.slane %v1991_v39, 4 }
 0x540   : > { %v1999_v43 = vadd.f32 %v731_v42, %v730_v41 }
 0x542   : > { %v733_v44 = vmul.f32 %v1999_v43, %v1999_v43 }
 0x544   : > { %1491 = vmatmul.msk.f32.vlgmr.msrb.gmra.mxu1 %vm350_vm2, %v733_v44 }
 0x546   : > { %947 = vrot.lane.b32.xlu2 %v1991_v39, %s1700_s12 }
 0x560   : > { %1125 = vxpose.xlu0.b32.start.end [1/1] (short) (narrow) %v942_v28, 8 }
 0x568   : > { %1180 = vxpose.xlu0.b32.start.end [1/1] (short) (narrow) %v944_v23, 8 }
 0x56c   : > { %1235 = vxpose.xlu2.b32.start.end [1/1] (short) (narrow) %v946_v27, 8 }
 0x598   : > { %v951_v56 = vpop.permute.xlu2 %950 }
 0x599   : > { %v956_v45 = vrot.slane %v951_v56, 4  ;;  %v959_v47 = vsel %vm837_vm4, %v951_v56, %v958_v46 }
 0x59a   : > { %v967_v51 = vperm.slane %v959_v47, %v1930_v13 }
 0x59b   : > { %v957_v49 = vsel %vm837_vm4, %v956_v45, %v1991_v39 }
 0x59c   : > { %v963_v53 = vperm.slane %v957_v49, %v1930_v13  ;;  %v994_v58 = vrot.slane %v967_v51, 4 }
 0x59e   : > { %v982_v61 = vrot.slane %v963_v53, 4 }
 0x5a0   : > { %v948_v48 = vpop.permute.xlu2 %947 }
 0x5a1   : > { %v970_v52 = vrot.slane %v948_v48, 4 }
 0x5b0   : > { %v954_v54 = vpop.permute.xlu0 %953 }
 0x5b1   : > { %v968_v55 = vrot.slane %v954_v54, 4  ;;  %v971_v57 = vsel %vm837_vm4, %v954_v54, %v970_v52 }
 0x5b2   : > { %v979_v59 = vperm.slane %v971_v57, %v1930_v13 }
 0x5b3   : > { %v969_v60 = vsel %vm837_vm4, %v968_v55, %v948_v48 }
 0x5b4   : > { %v975_v63 = vperm.slane %v969_v60, %v1930_v13  ;;  %v992_v1 = vrot.slane %v979_v59, 4  ;;  %v995_v4 = vsel %vm837_vm4, %v979_v59, %v994_v58 }
 0x5b5   : > { %v1003_v8 = vperm.slane %v995_v4, %v1936_v24 }
 0x5b6   : > { %v980_v9 = vrot.slane %v975_v63, 4  ;;  %v983_v10 = vsel %vm837_vm4, %v975_v63, %v982_v61  ;;  %v993_v11 = vsel %vm837_vm4, %v992_v1, %v967_v51  ;;  %v1086_v1 = vpop.trf.xlu1 }
 0x5b7   : > { %v991_v12 = vperm.slane %v983_v10, %v1936_v24  ;;  %v999_v14 = vperm.slane %v993_v11, %v1936_v24  ;;  %v1010_v15 = vrot.slane %v1003_v8, 4 }
 0x5b8   : > { %v981_v16 = vsel %vm837_vm4, %v980_v9, %v963_v53 }
 0x5b9   : > { %v987_v17 = vperm.slane %v981_v16, %v1936_v24  ;;  %v1006_v19 = vrot.slane %v991_v12, 4  ;;  %v1008_v20 = vrot.slane %v999_v14, 4  ;;  %v1011_v21 = vsel %vm837_vm4, 0.0, %v1010_v15  ;;  %v1588_v16 = vld [vmem:[%s2123_s4] ss:$0 sm:$0xff] }
 0x5ba   : > { %v1023_v22 = vsel %vm837_vm4, %v1010_v15, %v999_v14  ;;  %v1028_v23 = vrot.slane %v1011_v21, 4  ;;  %v1069_v21 = vld [vmem:[%s1831_s23 + $0x18] sm:$0xff] }
 0x5bb   : > { %v1004_v25 = vrot.slane %v987_v17, 4  ;;  %v1007_v26 = vsel %vm837_vm4, 0.0, %v1006_v19  ;;  %v1009_v27 = vsel %vm837_vm4, 0.0, %v1008_v20  ;;  %v1027_v28 = vperm.slane %v1023_v22, %v1930_v13 }
 0x5bc   : > { %v1017_v29 = vrot.slane %v1007_v26, 4  ;;  %v1029_v30 = vsel %vm837_vm4, %v1028_v23, %v1009_v27  ;;  %v1012_v31 = vsel %vm837_vm4, %v1006_v19, %v987_v17  ;;  %v1066_v27 = vld [vmem:[%s1831_s23] sm:$0xff] }
 0x5bd   : > { %v1005_v32 = vsel %vm837_vm4, 0.0, %v1004_v25  ;;  %v1016_v0 = vperm.slane %v1012_v31, %v1930_v13  ;;  %v1033_v6 = vperm.slane %v1029_v30, %v1930_v13  ;;  %v1048_v33 = vrot.slane %v1027_v28, 4 }
 0x5be   : > { %v1018_v34 = vsel %vm837_vm4, %v1017_v29, %v1005_v32  ;;  %v1068_v29 = vld [vmem:[%s1831_s23 + $0x10] sm:$0xff] }
 0x5bf   : > { %v1022_v62 = vperm.slane %v1018_v34, %v1930_v13  ;;  %v1036_v35 = vrot.slane %v1016_v0, 4  ;;  %v1049_v2 = vsel %vm837_vm4, %v1033_v6, %v1048_v33  ;;  %v1046_v36 = vrot.slane %v1033_v6, 4 }
 0x5c0   : > { %v1057_v3 = vperm.slane %v1049_v2, %v1936_v24 }
 0x5c1   : > { %v754_v5 = vpop.f32.mrf.mxu1  ;;  %v1037_v7 = vsel %vm837_vm4, %v1022_v62, %v1036_v35  ;;  %v1034_v37 = vrot.slane %v1022_v62, 4  ;;  %v1047_v18 = vsel %vm837_vm4, %v1046_v36, %v1027_v28 }
 0x5c2   : > { %v757_v38 = vmul.f32 0.125, %v754_v5  ;;  %v1045_v40 = vperm.slane %v1037_v7, %v1936_v24  ;;  %v1062_v41 = vrot.slane %v1057_v3, 4  ;;  %v1053_v42 = vperm.slane %v1047_v18, %v1936_v24 }
 0x5c3   : > { %v1035_v13 = vsel %vm837_vm4, %v1034_v37, %v1016_v0 }
 0x5c4   : > { %v758_v44 = vadd.f32 1e-06, %v757_v38  ;;  %v1063_v56 = vsel %vm837_vm4, %v1062_v41, %v1045_v40  ;;  %v1041_v45 = vperm.slane %v1035_v13, %v1936_v24  ;;  %v1058_v46 = vrot.slane %v1053_v42, 4 }
 0x5c5   : > { %1230 = vmatpush.msra.mxu1 %v1063_v56  ;;  %v1064_v47 = vrot.slane %v1045_v40, 4 }
 0x5c6   : > { %1597 = vrsqrt.f32 %v758_v44  ;;  %v1059_v48 = vsel %vm837_vm4, %v1058_v46, %v1041_v45  ;;  %v1060_v49 = vrot.slane %v1041_v45, 4  ;;  %vm765_vm3 = vweird.f32 %v758_v44 }
 0x5c7   : > { %1120 = vmatpush.msrb.mxu0 %v1059_v48  ;;  %v1065_v51 = vsel %vm837_vm4, %v1057_v3, %v1064_v47 }
 0x5c8   : > { %1285 = vmatpush.msra.mxu3 %v1065_v51  ;;  %v1061_v52 = vsel %vm837_vm4, %v1053_v42, %v1060_v49  ;;  %1494 = vmatmul.msk.f32.vlgmr.msrb.gmra.mxu0 %vm570_vm1, %v1086_v1 }
 0x5c9   : > { %1175 = vmatpush.msrb.mxu2 %v1061_v52 }
 0x5cc   : > { %v1598_v53 = vpop.eup %1597 }
 0x5cd   : > { %v760_v54 = vmul.f32 %v1598_v53, %v758_v44  ;;  %vm766_vm2 = vweird.f32 %v1598_v53 }
 0x5ce   : > { %vm767_vm8 = vmor %vm765_vm3, %vm766_vm2 }
 0x5cf   : > { %v761_v55 = vmul.f32 %v1598_v53, %v760_v54 }
 0x5d1   : > { %v762_v57 = vmul.f32 0.5, %v761_v55 }
 0x5d3   : > { %v763_v58 = vsub.f32 1.5, %v762_v57 }
 0x5d5   : > { %802 = vrot.lane.b32.xlu2 %v1991_v39, %s1697_s27  ;;  %v764_v24 = vmul.f32 %v1598_v53, %v763_v58 }
 0x5d7   : > { %v768_v59 = vsel %vm767_vm8, %v1598_v53, %v764_v24 }
 0x5d8   : > { %1493 = vmatmul.msk.f32.vlgmr.msrb.gmra.mxu3 %vm384_vm5, %v768_v59  ;;  %vm799_vm5 = vcmask 257024  }
 0x604   : > { %v1141_v61 = vpop.trf.xlu0 }
 0x605   : > { %v1251_v60 = vpop.trf.xlu2  ;;  %1495 = vmatmul.msk.f32.vlgmr.msrb.gmra.mxu2 %vm570_vm1, %v1141_v61 }
 0x606   : > { %1497 = vmatmul.msk.f32.vlgmr.msra.gmra.mxu3 %vm570_vm1, %v1251_v60 }
 0x60c   : > { %v1196_v63 = vpop.trf.xlu0 }
 0x60d   : > { %1496 = vmatmul.msk.f32.vlgmr.msra.gmra.mxu1 %vm570_vm1, %v1196_v63 }
 0x62f   : > { %v803_v4 = vpop.permute.xlu2 %802 }
 0x630   : > { %v805_v39 = vmul.f32 %v803_v4, %v1896_v50 }
 0x632   : > { %v807_v8 = vsel %vm806_vm9, %v805_v39, 0.0 }
 0x633   : > { %v808_v9 = vrot.slane %v807_v8, 4 }
 0x635   : > { %v809_v10 = vadd.f32 %v808_v9, %v807_v8 }
 0x637   : > { %v810_v11 = vrot.slane %v809_v10, 2 }
 0x639   : > { %v811_v12 = vadd.f32 %v810_v11, %v809_v10 }
 0x63b   : > { %v812_v14 = vrot.slane %v811_v12, 1 }
 0x63d   : > { %v813_v15 = vadd.f32 %v812_v14, %v811_v12 }
 0x63f   : > { %815 = vrot.lane.b32.xlu0 %v813_v15, %s1696_s17  ;;  %s1321_s17 = scalar_lea.hbm %s2125_s6, %s1503_s13 }
 0x640   : > { %s1324_s19 = sshll.u32 %s1321_s17, 4  ;;  %s1325_s19 = int_to_ptr.hbm [resolvable:$true] %s1324_s19 }
 0x641   : > { %s1613_s20 = sshra.s32 %s1325_s19, 4  ;;  %s1614_s20 = int_to_ptr.hbm [resolvable:$true] %s1613_s20 }
 0x642   : > { %s1615_s29 = scalar_lea.hbm %s1614_s20, 32  ;;  %p1620_p5 = scmp.lt.s32.totalorder %s1614_s20, %s2125_s6 }
 0x643   : > { %p1616_p1 = scmp.ne.s32.totalorder %s1614_s20, %s1615_s29  ;;  %p1621_p6 = scmp.lt.s32.totalorder %s1619_s24, %s1615_s29 }
 0x645   : > { %v1122_v28 = vpop.f32.mrf.mxu0  ;;  %p1617_p2 = pnand %p1616_p1, %p1791_p3  ;;  %p1622_p7 = por %p1621_p6, %p1620_p5 }
 0x646   : > { %v1290_v31 = vadd.f32 %v1122_v28, %v1066_v27 }
 0x647   : > { %p1618_p4 = pneg %p1617_p2 }
 0x648   : > { %1294 = vst.msk [vmem:[%s1831_s23] sm:$0xff] %vm570_vm1, %v1290_v31 }
 0x649   : > { %p1623_p8 = pnand %p1622_p7, %p1618_p4 }
 0x65b   : > { %v789_v17 = vpop.f32.mrf.mxu3 }
 0x65c   : > { %v792_v50 = vmul.f32 %v789_v17, %v1999_v43  ;;  %v1067_v43 = vld [vmem:[%s1831_s23 + $0x8] sm:$0xff] }
 0x65e   : > { %v797_v19 = vmul.f32 %v1588_v16, %v792_v50 }
 0x660   : > { %v798_v20 = vpack.c.bf16 %v797_v19, %v797_v19 }
 0x662   : > { %800 = vst.msk [vmem:[%s1829_s14] sm:$0xf] %vm799_vm5, %v798_v20  ;;  %s1307_s14 = scalar_lea.sflag [#allocation4], %s2139_s25 }
 0x688   : > { %v1177_v25 = vpop.f32.mrf.mxu2 }
 0x689   : > { %v1287_v22 = vpop.f32.mrf.mxu3  ;;  %v1291_v26 = vadd.f32 %v1177_v25, %v1067_v43 }
 0x68a   : > { %v1293_v23 = vadd.f32 %v1287_v22, %v1069_v21  ;;  %v1232_v30 = vpop.f32.mrf.mxu1 }
 0x68b   : > { %1295 = vst.msk [vmem:[%s1831_s23 + $0x8] sm:$0xff] %vm570_vm1, %v1291_v26  ;;  %v1292_v32 = vadd.f32 %v1232_v30, %v1068_v29 }
 0x68c   : > { %1297 = vst.msk [vmem:[%s1831_s23 + $0x18] sm:$0xff] %vm570_vm1, %v1293_v23 }
 0x68d   : > { %1296 = vst.msk [vmem:[%s1831_s23 + $0x10] sm:$0xff] %vm570_vm1, %v1292_v32 }
 0x68e   : > { %1626 = shalt.err (!%p1623_p8)
}
 0x68f   : > { %s1705_s23 = smov 128   ;;  %s1706_s26 = smov 8   ;;  %v668_v0 = vld [vmem:[#allocation2] sm:$0x1]  ;;  %vm819_vm10 = vcmask 253952  }
 0x690   : > { %1504 = dma.vmem_to_hbm [thread:$0]  (%p1791_p3), %s1323_s18, 512, %s1325_s19, %s1307_s14, %s1705_s23, %s1705_s23, %s1706_s26  }
 0x6b1   : > { %v816_v6 = vpop.permute.xlu0 %815 }
 0x6b2   : > { %v818_v33 = vadd.f32 %v816_v6, %v668_v0 }
 0x6b4   : > { %820 = vst.msk [vmem:[#allocation2] sm:$0x1] %vm819_vm10, %v818_v33 }
 0x6b5 PF: > { %p1510_p10 = scmp.ge.s32.totalorder %s1693_s28, 2  ;;  %s1350_s7 = sand.u32 1, %s1665_s21  }
 0x6b6   : > { %s1351_s8 = scalar_lea.sflag [#allocation4], %s1350_s7 }
 0x6b7   : > { %p1507_p11 = pnand %p1510_p10, %p1801_p9 }
 0x6b9   : > { %p1508_p12 = pneg %p1507_p11 }
 0x6bb   : > { %1660 = dma.done.wait (%p1508_p12), %s1351_s8, 512  }
 0x6bc   : > { %1662 = vsyncadd (%p1508_p12), %s1351_s8, 4294966784  ;;  %s20_s28 = sadd.s32 1, %s1693_s28   ;;  %s2140_s9 = sld [smem:[#allocation6_spill]] }
 0x6bd   : > { %p17_p3 = scmp.ge.s32.totalorder %s20_s28, 6   ;;  %s2141_s23 = sld [smem:[#allocation11_spill]] }
 0x6be   : > { %s2142_s24 = sld [smem:[#allocation7_spill]]  ;;  %s2146_s21 = smov %s1669_s22 }
 0x6bf   : > { %s2143_s25 = sld [smem:[#allocation8_spill]]  ;;  %19 = sbr.rel (!%p17_p3) target bundleno = 5 (0x5), region = 94 }
 0x6c0   : > { %s2144_s26 = sld [smem:[#allocation9_spill]] }
 0x6c1   : > { %s2145_s27 = sld [smem:[#allocation10_spill]] }
 0x6c2   : > { %s2147_s22 = smov %s2140_s9 }
 0x6c4   :  { %1357 = vsyncpa [#allocation4], 1 }
 0x6c5   :  { %1359 = vsyncpa [#allocation4 + $0x1], 1 }

// kernel: model_forward.43
= control target key start
LH: loop header
LB: loop body
LE: loop exit
PB: predicated region body
PF: predicated region fallthrough
CT: control target
= control target key end

     0   :  { %vm17_vm0 = vcmask 523264   ;;  %v174_v1 = vmov 0.0   ;;  %s220_s0 = inlined_call_operand.vmem [shape: bf16[32,32], index: 0, kind: input, shape index: {}]   ;;  %s221_s1 = inlined_call_operand.vmem [shape: bf16[32,64], index: 1, kind: input, shape index: {}]   ;;  %s222_s2 = inlined_call_operand.hbm [shape: f32[32,64], index: 2, kind: output, shape index: {}]  }
   0x1   :  { %v141_v0 = vld [vmem:[%s221_s1 + $0x8] sm:$0xff]  ;;  %18 = vst.msk [vmem:[#allocation2] sm:$0xff] %vm17_vm0, %v174_v1 }
   0x2   :  { %7 = vsyncpa [#allocation4], 0  ;;  %69 = vmatpush.bf16.msra.mxu0 %v141_v0  ;;  %142 = vmatpush.bf16.msra.mxu1 %v141_v0  ;;  %v140_v2 = vld [vmem:[%s221_s1] sm:$0xff]  ;;  %19 = vst.msk [vmem:[#allocation2 + $0x8] sm:$0xff] %vm17_vm0, %v174_v1  ;;  %v139_v4 = vld [vmem:[%s220_s0 + $0x8] sm:$0xff]  ;;  %vm56_vm1 = vcmask 261120  }
   0x3   :  { %20 = vst.msk [vmem:[#allocation2 + $0x10] sm:$0xff] %vm17_vm0, %v174_v1  ;;  %v138_v3 = vld [vmem:[%s220_s0] sm:$0xff]  ;;  %s175_s0 = smov [#allocation3]   ;;  %s108_s19 = sshll.u32 %s222_s2, 4  ;;  %s109_s19 = int_to_ptr.hbm [resolvable:$true] %s108_s19 }
   0x4   :  { %21 = vst.msk [vmem:[#allocation2 + $0x18] sm:$0xff] %vm17_vm0, %v174_v1  ;;  %s106_s1 = sshll.u32 %s175_s0, 4  ;;  %s176_s20 = smov 128   ;;  %s107_s1 = int_to_ptr.vmem [resolvable:$true] %s106_s1 }
   0x5   :  { %s177_s21 = smov 8  }
   0x6   :  { %70 = vmatpush.bf16.msra.mxu0 %v140_v2  ;;  %143 = vmatpush.bf16.msra.mxu1 %v140_v2 }
   0x8   :  { %v22_v5 = vld [vmem:[#allocation2] sm:$0xff] }
   0x9   :  { %136 = vmatmul.msk.bf16.vlgmr.msra.gmra.mxu0 %vm56_vm1, %v138_v3  ;;  %137 = vmatmul.msk.bf16.vlgmr.msra.gmra.mxu1 %vm56_vm1, %v139_v4  ;;  %v23_v11 = vld [vmem:[#allocation2 + $0x8] sm:$0xff] }
   0xa   :  { %v24_v6 = vld [vmem:[#allocation2 + $0x10] sm:$0xff] }
   0xb   :  { %v25_v12 = vld [vmem:[#allocation2 + $0x18] sm:$0xff] }
  0x86   :  { %v72_v7 = vpop.f32.mrf.mxu0  ;;  %v77_v8 = vpop.f32.mrf.mxu1 }
  0x87   :  { %v82_v9 = vadd.f32 %v72_v7, %v22_v5  ;;  %v84_v10 = vadd.f32 %v77_v8, %v24_v6 }
  0x89   :  { %87 = vst.msk [vmem:[#allocation2] sm:$0xff] %vm17_vm0, %v82_v9 }
  0x8a   :  { %89 = vst.msk [vmem:[#allocation2 + $0x10] sm:$0xff] %vm17_vm0, %v84_v10 }
  0x8e   :  { %v74_v13 = vpop.f32.mrf.mxu0  ;;  %v79_v14 = vpop.f32.mrf.mxu1 }
  0x8f   :  { %v83_v15 = vadd.f32 %v74_v13, %v23_v11  ;;  %v85_v16 = vadd.f32 %v79_v14, %v25_v12 }
  0x90   :  { %v94_v17 = vld [vmem:[#allocation2] sm:$0xff] }
  0x91   :  { %88 = vst.msk [vmem:[#allocation2 + $0x8] sm:$0xff] %vm17_vm0, %v83_v15  ;;  %v96_v18 = vld [vmem:[#allocation2 + $0x10] sm:$0xff] }
  0x92   :  { %90 = vst.msk [vmem:[#allocation2 + $0x18] sm:$0xff] %vm17_vm0, %v85_v16 }
  0x93   :  { %98 = vst.msk [vmem:[#allocation3] sm:$0xff] %vm17_vm0, %v94_v17 }
  0x94   :  { %100 = vst.msk [vmem:[#allocation3 + $0x10] sm:$0xff] %vm17_vm0, %v96_v18 }
  0x98   :  { %v95_v19 = vld [vmem:[#allocation2 + $0x8] sm:$0xff] }
  0x99   :  { %v97_v20 = vld [vmem:[#allocation2 + $0x18] sm:$0xff]  ;;  %99 = vst.msk [vmem:[#allocation3 + $0x8] sm:$0xff] %vm17_vm0, %v95_v19 }
  0x9a   :  { %101 = vst.msk [vmem:[#allocation3 + $0x18] sm:$0xff] %vm17_vm0, %v97_v20 }
  0x9b   :  { %114 = dma.vmem_to_hbm [thread:$0]  %s107_s1, 512, %s109_s19, [#allocation4], %s176_s20, %s176_s20, %s177_s21  }
  0x9c   :  { %172 = dma.done.wait [#allocation4], 512  }
  0x9d   :  { %173 = vsyncadd [#allocation4], 4294966784 }
  0x9e   :  { %119 = vsyncpa [#allocation4], 1 }

// kernel: model_forward.31
= control target key start
LH: loop header
LB: loop body
LE: loop exit
PB: predicated region body
PF: predicated region fallthrough
CT: control target
= control target key end

     0   :  { %vm15_vm0 = vcmask 261120   ;;  %v355_v28 = vmov 0.0   ;;  %s467_s1 = inlined_call_operand.vmem [shape: bf16[256,32], index: 1, kind: input, shape index: {}]   ;;  %s468_s0 = inlined_call_operand.vmem [shape: bf16[32,256], index: 0, kind: input, shape index: {}]   ;;  %s469_s2 = inlined_call_operand.vmem [shape: f32[32,32], index: 2, kind: output, shape index: {}]  }
   0x1   :  { %v329_v0 = vld [vmem:[%s467_s1 + $0x38] sm:$0xff]  ;;  %v328_v2 = vld [vmem:[%s467_s1 + $0x30] sm:$0xff]  ;;  %v327_v4 = vld [vmem:[%s467_s1 + $0x28] sm:$0xff]  ;;  %16 = vst.msk [vmem:[#allocation2] sm:$0xff] %vm15_vm0, %v355_v28 }
   0x2   :  { %v337_v1 = vld [vmem:[%s467_s1 + $0x78] sm:$0xff]  ;;  %176 = vmatpush.bf16.msra.mxu0 %v329_v0  ;;  %338 = vmatpush.bf16.msra.mxu2 %v329_v0  ;;  %v336_v3 = vld [vmem:[%s467_s1 + $0x70] sm:$0xff]  ;;  %v335_v5 = vld [vmem:[%s467_s1 + $0x68] sm:$0xff]  ;;  %17 = vst.msk [vmem:[#allocation2 + $0x8] sm:$0xff] %vm15_vm0, %v355_v28 }
   0x3   :  { %195 = vmatpush.bf16.msra.mxu1 %v337_v1  ;;  %346 = vmatpush.bf16.msra.mxu3 %v337_v1  ;;  %v326_v6 = vld [vmem:[%s467_s1 + $0x20] sm:$0xff]  ;;  %v325_v8 = vld [vmem:[%s467_s1 + $0x18] sm:$0xff]  ;;  %v324_v10 = vld [vmem:[%s467_s1 + $0x10] sm:$0xff]  ;;  %18 = vst.msk [vmem:[#allocation2 + $0x10] sm:$0xff] %vm15_vm0, %v355_v28 }
   0x4   :  { %v334_v7 = vld [vmem:[%s467_s1 + $0x60] sm:$0xff]  ;;  %v333_v9 = vld [vmem:[%s467_s1 + $0x58] sm:$0xff]  ;;  %v332_v11 = vld [vmem:[%s467_s1 + $0x50] sm:$0xff]  ;;  %19 = vst.msk [vmem:[#allocation2 + $0x18] sm:$0xff] %vm15_vm0, %v355_v28 }
   0x5   :  { %v323_v12 = vld [vmem:[%s467_s1 + $0x8] sm:$0xff]  ;;  %v322_v14 = vld [vmem:[%s467_s1] sm:$0xff]  ;;  %v248_v18 = vld [vmem:[%s468_s0 + $0x10] sm:$0xf] }
   0x6   :  { %177 = vmatpush.bf16.msra.mxu0 %v328_v2  ;;  %339 = vmatpush.bf16.msra.mxu2 %v328_v2  ;;  %v331_v13 = vld [vmem:[%s467_s1 + $0x48] sm:$0xff]  ;;  %v330_v15 = vld [vmem:[%s467_s1 + $0x40] sm:$0xff]  ;;  %v321_v19 = vld [vmem:[%s468_s0 + $0x14] sm:$0xf0] }
   0x7   :  { %196 = vmatpush.bf16.msra.mxu1 %v336_v3  ;;  %347 = vmatpush.bf16.msra.mxu3 %v336_v3  ;;  %v240_v16 = vld [vmem:[%s468_s0] sm:$0xf]  ;;  %v319_v17 = vld [vmem:[%s468_s0 + $0x4] sm:$0xf0]  ;;  %v318_v20 = vld [vmem:[%s468_s0 + $0x4] sm:$0xf]  ;;  %v249_v25 = vor.u32 %v321_v19, %v248_v18 }
   0x8   :  { %v242_v21 = vld [vmem:[%s468_s0 + $0x8] sm:$0xf0]  ;;  %v320_v22 = vld [vmem:[%s468_s0 + $0x14] sm:$0xf]  ;;  %v250_v23 = vld [vmem:[%s468_s0 + $0x18] sm:$0xf0]  ;;  %v241_v24 = vor.u32 %v319_v17, %v240_v16 }
   0x9   :  { %v245_v26 = vor.u32 %v318_v20, %v242_v21  ;;  %v253_v27 = vor.u32 %v320_v22, %v250_v23  ;;  %v20_v30 = vld [vmem:[#allocation2] sm:$0xff]  ;;  %v21_v39 = vld [vmem:[#allocation2 + $0x8] sm:$0xff] }
   0xa   :  { %178 = vmatpush.bf16.msra.mxu0 %v327_v4  ;;  %340 = vmatpush.bf16.msra.mxu2 %v327_v4  ;;  %v22_v35 = vld [vmem:[#allocation2 + $0x10] sm:$0xff] }
   0xb   :  { %197 = vmatpush.bf16.msra.mxu1 %v335_v5  ;;  %348 = vmatpush.bf16.msra.mxu3 %v335_v5  ;;  %v23_v46 = vld [vmem:[#allocation2 + $0x18] sm:$0xff] }
   0xe   :  { %179 = vmatpush.bf16.msra.mxu0 %v326_v6  ;;  %341 = vmatpush.bf16.msra.mxu2 %v326_v6 }
   0xf   :  { %198 = vmatpush.bf16.msra.mxu1 %v334_v7  ;;  %349 = vmatpush.bf16.msra.mxu3 %v334_v7 }
  0x12   :  { %180 = vmatpush.bf16.msra.mxu0 %v325_v8  ;;  %342 = vmatpush.bf16.msra.mxu2 %v325_v8 }
  0x13   :  { %199 = vmatpush.bf16.msra.mxu1 %v333_v9  ;;  %350 = vmatpush.bf16.msra.mxu3 %v333_v9 }
  0x16   :  { %181 = vmatpush.bf16.msra.mxu0 %v324_v10  ;;  %343 = vmatpush.bf16.msra.mxu2 %v324_v10 }
  0x17   :  { %200 = vmatpush.bf16.msra.mxu1 %v332_v11  ;;  %351 = vmatpush.bf16.msra.mxu3 %v332_v11 }
  0x1a   :  { %182 = vmatpush.bf16.msra.mxu0 %v323_v12  ;;  %344 = vmatpush.bf16.msra.mxu2 %v323_v12 }
  0x1b   :  { %201 = vmatpush.bf16.msra.mxu1 %v331_v13  ;;  %352 = vmatpush.bf16.msra.mxu3 %v331_v13 }
  0x1e   :  { %183 = vmatpush.bf16.msra.mxu0 %v322_v14  ;;  %345 = vmatpush.bf16.msra.mxu2 %v322_v14 }
  0x1f   :  { %202 = vmatpush.bf16.msra.mxu1 %v330_v15  ;;  %353 = vmatpush.bf16.msra.mxu3 %v330_v15 }
  0x21   :  { %184 = vmatmul.bf16.vlgmr.msra.gmra.mxu0 %v241_v24  ;;  %189 = vmatmul.bf16.vlgmr.msra.gmra.mxu2 %v249_v25 }
  0x22   :  { %203 = vmatmul.bf16.vlgmr.msra.gmra.mxu1 %v245_v26  ;;  %208 = vmatmul.bf16.vlgmr.msra.gmra.mxu3 %v253_v27 }
  0x9e   :  { %v185_v29 = vpop.f32.mrf.mxu0 }
  0x9f   :  { %v204_v31 = vpop.f32.mrf.mxu1 }
  0xa0   :  { %v205_v32 = vadd.f32 %v204_v31, %v185_v29 }
  0xa2   :  { %v214_v33 = vadd.f32 %v205_v32, %v20_v30 }
  0xa4   :  { %219 = vst.msk [vmem:[#allocation2] sm:$0xff] %vm15_vm0, %v214_v33  ;;  %v190_v34 = vpop.f32.mrf.mxu2 }
  0xa5   :  { %v209_v36 = vpop.f32.mrf.mxu3 }
  0xa6   :  { %v210_v37 = vadd.f32 %v209_v36, %v190_v34  ;;  %v187_v38 = vpop.f32.mrf.mxu0 }
  0xa7   :  { %v206_v40 = vpop.f32.mrf.mxu1 }
  0xa8   :  { %v216_v41 = vadd.f32 %v210_v37, %v22_v35  ;;  %v207_v42 = vadd.f32 %v206_v40, %v187_v38 }
  0xaa   :  { %221 = vst.msk [vmem:[#allocation2 + $0x10] sm:$0xff] %vm15_vm0, %v216_v41  ;;  %v215_v43 = vadd.f32 %v207_v42, %v21_v39 }
  0xab   :  { %v226_v44 = vld [vmem:[#allocation2] sm:$0xff] }
  0xac   :  { %230 = vst.msk [vmem:[%s469_s2] sm:$0xff] %vm15_vm0, %v226_v44  ;;  %v192_v45 = vpop.f32.mrf.mxu2 }
  0xad   :  { %220 = vst.msk [vmem:[#allocation2 + $0x8] sm:$0xff] %vm15_vm0, %v215_v43  ;;  %v211_v47 = vpop.f32.mrf.mxu3 }
  0xae   :  { %v212_v48 = vadd.f32 %v211_v47, %v192_v45 }
  0xb0   :  { %v217_v49 = vadd.f32 %v212_v48, %v23_v46 }
  0xb1   :  { %v228_v50 = vld [vmem:[#allocation2 + $0x10] sm:$0xff] }
  0xb2   :  { %232 = vst.msk [vmem:[%s469_s2 + $0x10] sm:$0xff] %vm15_vm0, %v228_v50 }
  0xb3   :  { %222 = vst.msk [vmem:[#allocation2 + $0x18] sm:$0xff] %vm15_vm0, %v217_v49 }
  0xb4   :  { %v227_v51 = vld [vmem:[#allocation2 + $0x8] sm:$0xff] }
  0xb5   :  { %231 = vst.msk [vmem:[%s469_s2 + $0x8] sm:$0xff] %vm15_vm0, %v227_v51 }
  0xba   :  { %v229_v52 = vld [vmem:[#allocation2 + $0x18] sm:$0xff] }
  0xbb   :  { %233 = vst.msk [vmem:[%s469_s2 + $0x18] sm:$0xff] %vm15_vm0, %v229_v52 }

</bundles_post_ra>
